<compile_context>
chip_gen: v7x
topology: tpu7x:2x2x1
jax: 0.10.0
libtpu: 0.0.40
codegen_flags: <defaults>
</compile_context>

<pallas_src>
import functools

import jax
import jax.numpy as jnp
from jax.experimental import pallas as pl
from jax.experimental.pallas import tpu as pltpu

EPS = 1e-5
NEG_SLOPE = 0.2
LANE = 128


# ---------------------------------------------------------------------------
# Small helpers
# ---------------------------------------------------------------------------
def _leaky(x):
    return jnp.where(x >= 0, x, NEG_SLOPE * x)


def _round_up(x, m):
    return ((x + m - 1) // m) * m


def _vmem_limit_bytes():
    """~75% of physical VMEM (capped at 100 MiB): large tiles on v5e/v6e
    (128 MiB parts), conservative (<=48 MiB) on v7x (64 MiB per TC)."""
    try:
        cap = int(pltpu.get_tpu_info().vmem_capacity_bytes)
        return int(min(cap * 3 // 4, 100 * 1024 * 1024))
    except Exception:  # pragma: no cover - conservative fallback
        return 48 * 1024 * 1024


def _pick_tile_h(H, W, tile_rows, sub):
    """Largest divisor of H with th*W <= tile_rows and th*W a sublane multiple."""
    target = max(1, min(H, tile_rows // max(W, 1)))
    for th in range(target, 0, -1):
        if H % th == 0 and (th * W) % sub == 0:
            return th
    return H


# ---------------------------------------------------------------------------
# In-kernel building blocks
# ---------------------------------------------------------------------------
def _conv_tile_from_slab(slab, w, *, th, w_img, K, cdtype):
    """slab: (th + 2*pad, w_img + 2*pad, C) halo'd input tile (array).
    Builds the (th*w_img, K*K*C) patch slab in VMEM and runs one deep MXU
    matmul against w (K*K*C, Cout) with f32 accumulation."""
    cols = []
    for dy in range(K):
        for dx in range(K):
            tap = slab[dy:dy + th, dx:dx + w_img, :]
            cols.append(tap.reshape(th * w_img, tap.shape[-1]))
    patches = jnp.concatenate(cols, axis=-1).astype(cdtype)
    return jnp.dot(patches, w, preferred_element_type=jnp.float32)


def _accum_stats(y, s_ref, ss_ref):
    """Accumulate per-channel sum / sum-of-squares into an (1, 8, C) resident
    block: per-tile work is plain VALU adds (no cross-sublane reduce)."""
    tm, cp = y.shape
    if tm % 8 == 0:
        s_new = jnp.sum(y.reshape(tm // 8, 8, cp), axis=0)
        ss_new = jnp.sum((y * y).reshape(tm // 8, 8, cp), axis=0)
    else:  # generic fallback (not hit with the tile picker above)
        s_new = jnp.pad(jnp.sum(y, axis=0, keepdims=True), ((0, 7), (0, 0)))
        ss_new = jnp.pad(jnp.sum(y * y, axis=0, keepdims=True), ((0, 7), (0, 0)))
    s_ref[...] += s_new[None]
    ss_ref[...] += ss_new[None]


# ---------------------------------------------------------------------------
# Pallas kernels
# ---------------------------------------------------------------------------
def _conv_stats_kernel(x_hbm, w_ref, y_ref, s_ref, ss_ref, slab_ref, sem,
                       *, th, pad, w_img, K, cdtype):
    """Pass 1a: conv1 tile (in-kernel patch construction) + BN1 batch stats."""
    n = pl.program_id(0)
    h = pl.program_id(1)

    # Halo'd row-slab of image n: rows [h*th, h*th + th + 2*pad) of the
    # spatially pre-padded input.  TODO(synk): double-buffer this DMA.
    copy = pltpu.make_async_copy(
        x_hbm.at[n, pl.ds(h * th, th + 2 * pad)], slab_ref, sem)
    copy.start()

    @pl.when(h == 0)
    def _init():
        s_ref[...] = jnp.zeros_like(s_ref)
        ss_ref[...] = jnp.zeros_like(ss_ref)

    copy.wait()
    y = _conv_tile_from_slab(slab_ref[...], w_ref[...],
                             th=th, w_img=w_img, K=K, cdtype=cdtype)
    y_ref[...] = y.astype(y_ref.dtype)
    _accum_stats(y, s_ref, ss_ref)


def _bnact_conv_stats_kernel(h_hbm, scale_ref, shift_ref, w_ref,
                             y_ref, s_ref, ss_ref, slab_ref, sem,
                             *, th, pad, w_img, K, cdtype):
    """Pass 1b: fused BN1 affine + LeakyReLU on the halo'd conv1 slab, then
    conv2 (in-kernel patches, one deep matmul) + BN2 batch stats."""
    n = pl.program_id(0)
    h = pl.program_id(1)

    copy = pltpu.make_async_copy(
        h_hbm.at[n, pl.ds(h * th, th + 2 * pad)], slab_ref, sem)
    copy.start()

    @pl.when(h == 0)
    def _init():
        s_ref[...] = jnp.zeros_like(s_ref)
        ss_ref[...] = jnp.zeros_like(ss_ref)

    copy.wait()
    scale = scale_ref[...].reshape(1, 1, -1)
    shift = shift_ref[...].reshape(1, 1, -1)
    act = _leaky(slab_ref[...].astype(jnp.float32) * scale + shift)
    y = _conv_tile_from_slab(act, w_ref[...],
                             th=th, w_img=w_img, K=K, cdtype=cdtype)
    y_ref[...] = y.astype(y_ref.dtype)
    _accum_stats(y, s_ref, ss_ref)


def _bn_skip_act_kernel(y_ref, x_ref, ws_ref, bs_ref, scale_ref, shift_ref, o_ref):
    """Pass 2: folded BN2 affine + in-tile 1x1-conv skip + LeakyReLU(0.2)."""
    skip = jnp.dot(x_ref[...], ws_ref[...],
                   preferred_element_type=jnp.float32) + bs_ref[...]
    y = y_ref[...].astype(jnp.float32) * scale_ref[...] + shift_ref[...]
    o_ref[...] = _leaky(y + skip).astype(o_ref.dtype)


# ---------------------------------------------------------------------------
# pallas_call builders
# ---------------------------------------------------------------------------
def _conv_pass_call(inp_padded, w, scale, shift, *, H, W, th, pad, K,
                    out_dtype, vmem_limit):
    """Pass-1 conv (+ optional fused BN-affine/LeakyReLU preamble) + stats."""
    N, Hp, Wp, cin_p = inp_padded.shape
    kkc, coutp = w.shape
    assert H % th == 0
    n_h = H // th
    tm = th * W
    M = N * H * W
    cdtype = inp_padded.dtype
    fused = scale is not None

    if fused:
        kern = functools.partial(_bnact_conv_stats_kernel,
                                 th=th, pad=pad, w_img=W, K=K, cdtype=cdtype)
        operands = (inp_padded, scale, shift, w)
        in_specs = [pl.BlockSpec(memory_space=pl.ANY),
                    pl.BlockSpec((1, cin_p), lambda n, h: (0, 0)),
                    pl.BlockSpec((1, cin_p), lambda n, h: (0, 0)),
                    pl.BlockSpec((kkc, coutp), lambda n, h: (0, 0))]
    else:
        kern = functools.partial(_conv_stats_kernel,
                                 th=th, pad=pad, w_img=W, K=K, cdtype=cdtype)
        operands = (inp_padded, w)
        in_specs = [pl.BlockSpec(memory_space=pl.ANY),
                    pl.BlockSpec((kkc, coutp), lambda n, h: (0, 0))]

    isz = jnp.dtype(cdtype).itemsize
    osz = jnp.dtype(out_dtype).itemsize
    cost = pl.CostEstimate(
        flops=2 * M * kkc * coutp,
        transcendentals=0,
        bytes_accessed=(inp_padded.size * isz + kkc * coutp * isz
                        + M * coutp * osz + 2 * N * 8 * coutp * 4))

    return pl.pallas_call(
        kern,
        out_shape=(jax.ShapeDtypeStruct((M, coutp), out_dtype),
                   jax.ShapeDtypeStruct((N, 8, coutp), jnp.float32),
                   jax.ShapeDtypeStruct((N, 8, coutp), jnp.float32)),
        grid=(N, n_h),
        in_specs=in_specs,
        out_specs=(pl.BlockSpec((tm, coutp), lambda n, h: (n * n_h + h, 0)),
                   pl.BlockSpec((1, 8, coutp), lambda n, h: (n, 0, 0)),
                   pl.BlockSpec((1, 8, coutp), lambda n, h: (n, 0, 0))),
        scratch_shapes=[pltpu.VMEM((th + 2 * pad, Wp, cin_p), cdtype),
                        pltpu.SemaphoreType.DMA(())],
        compiler_params=pltpu.CompilerParams(
            # batch axis -> megacore (v7x); row-tile axis accumulates stats.
            dimension_semantics=("parallel", "arbitrary"),
            vmem_limit_bytes=vmem_limit),
        cost_estimate=cost,
    )(*operands)


def _bn_skip_act_call(y2, x_flat, ws, bs, scale, shift, *, tm, vmem_limit):
    m, coutp = y2.shape
    cinp = x_flat.shape[1]
    isz = jnp.dtype(x_flat.dtype).itemsize
    ysz = jnp.dtype(y2.dtype).itemsize
    cost = pl.CostEstimate(
        flops=2 * m * cinp * coutp + 6 * m * coutp,
        transcendentals=0,
        bytes_accessed=(m * coutp * (ysz + 4) + m * cinp * isz
                        + (cinp + 3) * coutp * 4))
    return pl.pallas_call(
        _bn_skip_act_kernel,
        out_shape=jax.ShapeDtypeStruct((m, coutp), jnp.float32),
        grid=(m // tm,),
        in_specs=[pl.BlockSpec((tm, coutp), lambda i: (i, 0)),
                  pl.BlockSpec((tm, cinp), lambda i: (i, 0)),
                  pl.BlockSpec((cinp, coutp), lambda i: (0, 0)),
                  pl.BlockSpec((1, coutp), lambda i: (0, 0)),
                  pl.BlockSpec((1, coutp), lambda i: (0, 0)),
                  pl.BlockSpec((1, coutp), lambda i: (0, 0))],
        out_specs=pl.BlockSpec((tm, coutp), lambda i: (i, 0)),
        compiler_params=pltpu.CompilerParams(
            dimension_semantics=("parallel",),
            vmem_limit_bytes=vmem_limit),
        cost_estimate=cost,
    )(y2, x_flat, ws, bs, scale, shift)


# ---------------------------------------------------------------------------
# Glue (plain JAX): channel lane-padding, replicate pad, BN folding
# ---------------------------------------------------------------------------
def _pad_conv_w(w_kkc_co, K, cin, cin_p, cout_p):
    """(K*K*cin, cout) -> (K*K*cin_p, cout_p) zero-padded, preserving the
    (tap-major, channel-minor) row order used by the in-kernel patches."""
    cout = w_kkc_co.shape[1]
    w = w_kkc_co.reshape(K * K, cin, cout)
    w = jnp.pad(w, ((0, 0), (0, cin_p - cin), (0, cout_p - cout)))
    return w.reshape(K * K * cin_p, cout_p)


def _pad_cols(a, cp):
    return jnp.pad(a, ((0, 0), (0, cp - a.shape[-1])))


def _bn_scale_shift(s, ss, m, gamma_p, beta_p):
    """Fold training-mode BN (batch stats, biased var) into scale/shift.
    s/ss: (N, 8, Coutp) partial sums from pass 1."""
    s_tot = jnp.sum(s, axis=(0, 1))
    ss_tot = jnp.sum(ss, axis=(0, 1))
    mean = s_tot / m
    var = jnp.maximum(ss_tot / m - mean * mean, 0.0)
    scale = gamma_p * jax.lax.rsqrt(var + EPS)
    shift = beta_p - mean * scale
    return scale.reshape(1, -1), shift.reshape(1, -1)


def res_block_forward(x_nchw, params, kernel_size=3, tile_rows=1024,
                      compute_dtype=jnp.float32):
    """ResBlock forward (training-mode BN).  Assumes in_ch != out_ch (the
    module then has the 1x1 scale_inp conv); for in_ch == out_ch pass an
    identity ws and zero bs.  Odd kernel_size (same-size conv) assumed."""
    K = kernel_size
    assert K % 2 == 1, "same-size conv requires odd kernel_size"
    pad = (K - 1) // 2
    cdtype = jnp.dtype(compute_dtype)
    sub = 16 if cdtype.itemsize == 2 else 8
    vmem_limit = _vmem_limit_bytes()

    x = jnp.transpose(x_nchw, (0, 2, 3, 1)).astype(jnp.float32)   # NHWC
    N, H, W, Cin = x.shape
    Cout = params["g1"].shape[-1]
    Cin_p = _round_up(Cin, LANE)
    Cout_p = _round_up(Cout, LANE)
    M = N * H * W
    th = _pick_tile_h(H, W, tile_rows, sub)

    # Lane-padded (zero channel) parameters.
    w1 = _pad_conv_w(params["w1"], K, Cin, Cin_p, Cout_p).astype(cdtype)
    w2 = _pad_conv_w(params["w2"], K, Cout, Cout_p, Cout_p).astype(cdtype)
    ws = jnp.pad(params["ws"],
                 ((0, Cin_p - Cin), (0, Cout_p - Cout))).astype(cdtype)
    bs = _pad_cols(params["bs"], Cout_p)
    g1 = _pad_cols(params["g1"], Cout_p)[0]
    b1 = _pad_cols(params["beta1"], Cout_p)[0]
    g2 = _pad_cols(params["g2"], Cout_p)[0]
    b2 = _pad_cols(params["beta2"], Cout_p)[0]

    def pad_spatial(a):     # replicate (edge) padding of H and W
        return jnp.pad(a, ((0, 0), (pad, pad), (pad, pad), (0, 0)), mode="edge")

    # --- pass 1a: conv1 + BN1 batch stats ---------------------------------
    x_lane = jnp.pad(x, ((0, 0), (0, 0), (0, 0), (0, Cin_p - Cin)))
    xp = pad_spatial(x_lane).astype(cdtype)                        # (N,Hp,Wp,Cin_p)
    y1, s1, ss1 = _conv_pass_call(xp, w1, None, None, H=H, W=W, th=th, pad=pad,
                                  K=K, out_dtype=cdtype, vmem_limit=vmem_limit)
    scale1, shift1 = _bn_scale_shift(s1, ss1, M, g1, b1)

    # --- pass 1b: fused BN1 affine + LeakyReLU + conv2 + BN2 stats --------
    # BN1/LeakyReLU are pointwise per channel, so replicate-padding the
    # pre-BN conv1 output and activating inside the kernel is exact.
    y1p = pad_spatial(y1.reshape(N, H, W, Cout_p))                 # (N,Hp,Wp,Cout_p)
    y2, s2, ss2 = _conv_pass_call(y1p, w2, scale1, shift1, H=H, W=W, th=th,
                                  pad=pad, K=K, out_dtype=cdtype,
                                  vmem_limit=vmem_limit)
    scale2, shift2 = _bn_scale_shift(s2, ss2, M, g2, b2)

    # --- pass 2: BN2 fold + 1x1-conv skip + LeakyReLU ----------------------
    x_flat = x_lane.reshape(M, Cin_p).astype(cdtype)
    tm2 = max(sub, min(_round_up(M, sub), _round_up(min(tile_rows, M), sub)))
    Mp = _round_up(M, tm2)
    if Mp != M:
        y2 = jnp.pad(y2, ((0, Mp - M), (0, 0)))
        x_flat = jnp.pad(x_flat, ((0, Mp - M), (0, 0)))
    out = _bn_skip_act_call(y2, x_flat, ws, bs, scale2, shift2,
                            tm=tm2, vmem_limit=vmem_limit)
    out = out[:M, :Cout].reshape(N, H, W, Cout)
    return jnp.transpose(out, (0, 3, 1, 2))                        # NCHW


# ---------------------------------------------------------------------------
# Deterministic parameter init (shapes per ResBlock.__init__)
# ---------------------------------------------------------------------------
def init_params(key, in_ch, out_ch, K):
    ks = jax.random.split(key, 10)
    # PyTorch conv weight layout (Cout, Cin, K, K) -> kernel layout (K*K*Cin, Cout)
    w1_oikk = 0.1 * jax.random.normal(ks[0], (out_ch, in_ch, K, K), jnp.float32)
    w2_oikk = 0.1 * jax.random.normal(ks[1], (out_ch, out_ch, K, K), jnp.float32)
    ws_oi11 = 0.1 * jax.random.normal(ks[2], (out_ch, in_ch, 1, 1), jnp.float32)
    params = {
        "w1": jnp.transpose(w1_oikk, (2, 3, 1, 0)).reshape(K * K * in_ch, out_ch),
        "w2": jnp.transpose(w2_oikk, (2, 3, 1, 0)).reshape(K * K * out_ch, out_ch),
        "ws": jnp.transpose(ws_oi11, (2, 3, 1, 0)).reshape(in_ch, out_ch),
        # b1/b2 exist in the module but cancel exactly under training-mode BN;
        # they are only consumed by the pure-JAX reference below.
        "b1": (0.1 * jax.random.normal(ks[3], (out_ch,))).reshape(1, out_ch),
        "b2": (0.1 * jax.random.normal(ks[4], (out_ch,))).reshape(1, out_ch),
        "bs": (0.1 * jax.random.normal(ks[5], (out_ch,))).reshape(1, out_ch),
        "g1": (1.0 + 0.1 * jax.random.normal(ks[6], (out_ch,))).reshape(1, out_ch),
        "beta1": (0.1 * jax.random.normal(ks[7], (out_ch,))).reshape(1, out_ch),
        "g2": (1.0 + 0.1 * jax.random.normal(ks[8], (out_ch,))).reshape(1, out_ch),
        "beta2": (0.1 * jax.random.normal(ks[9], (out_ch,))).reshape(1, out_ch),
        # PyTorch-layout weights for the pure-JAX reference
        "_ref_w1": w1_oikk, "_ref_w2": w2_oikk, "_ref_ws": ws_oi11,
    }
    return params


# ---------------------------------------------------------------------------
# Pure-JAX reference (lax.conv) for the correctness check
# ---------------------------------------------------------------------------
def ref_forward(x_nchw, params, K):
    pad = (K - 1) // 2
    x = jnp.transpose(x_nchw, (0, 2, 3, 1)).astype(jnp.float32)

    def conv(xv, w_oikk, b, do_pad):
        if do_pad:
            xv = jnp.pad(xv, ((0, 0), (pad, pad), (pad, pad), (0, 0)), mode="edge")
        w_hwio = jnp.transpose(w_oikk, (2, 3, 1, 0))
        y = jax.lax.conv_general_dilated(
            xv, w_hwio, (1, 1), "VALID",
            dimension_numbers=("NHWC", "HWIO", "NHWC"),
            precision=jax.lax.Precision.HIGHEST)
        return y + b.reshape(1, 1, 1, -1)

    def bn(y, g, b):
        m = jnp.mean(y, axis=(0, 1, 2), keepdims=True)
        v = jnp.mean((y - m) ** 2, axis=(0, 1, 2), keepdims=True)
        return (y - m) * jax.lax.rsqrt(v + EPS) * g.reshape(1, 1, 1, -1) \
            + b.reshape(1, 1, 1, -1)

    def leaky(y):
        return jnp.where(y >= 0, y, NEG_SLOPE * y)

    h = conv(x, params["_ref_w1"], params["b1"].reshape(-1), True)
    h = leaky(bn(h, params["g1"], params["beta1"]))
    h = conv(h, params["_ref_w2"], params["b2"].reshape(-1), True)
    h = bn(h, params["g2"], params["beta2"])
    skip = conv(x, params["_ref_ws"], params["bs"].reshape(-1), False)
    out = leaky(h + skip)
    return jnp.transpose(out, (0, 3, 1, 2))


if __name__ == "__main__":
    N, IN_CH, OUT_CH, HW, K = 2, 4, 8, 16, 3
    key = jax.random.PRNGKey(0)
    kx, kp = jax.random.split(key)
    x = jax.random.normal(kx, (N, IN_CH, HW, HW), jnp.float32)  # NCHW (PyTorch)
    params = init_params(kp, IN_CH, OUT_CH, K)

    ref = jax.block_until_ready(ref_forward(x, params, K))

    # tile_rows=128 -> 2 halo'd row-tiles per image for each conv pass and 4
    # M-tiles for the BN2+skip epilogue, exercising the pipelined tiling, the
    # manual halo DMA and the cross-tile BN stats accumulation.
    fwd32 = jax.jit(functools.partial(res_block_forward, kernel_size=K,
                                      tile_rows=128, compute_dtype=jnp.float32))
    out32 = jax.block_until_ready(fwd32(x, params))
    assert out32.shape == (N, OUT_CH, HW, HW), out32.shape
    d32 = float(jnp.max(jnp.abs(out32 - ref)))
    assert d32 < 2.5e-2, f"f32 mismatch vs reference: max|diff|={d32}"

    # bf16 streamed operands / intermediates (f32 accumulation + f32 BN and
    # LeakyReLU epilogues) — halves the dominant HBM streams.
    fwd16 = jax.jit(functools.partial(res_block_forward, kernel_size=K,
                                      tile_rows=128, compute_dtype=jnp.bfloat16))
    out16 = jax.block_until_ready(fwd16(x, params))
    d16 = float(jnp.max(jnp.abs(out16 - ref)))
    assert d16 < 3e-1, f"bf16 mismatch vs reference: max|diff|={d16}"

    print("KERNEL_OK")
</pallas_src>

<mosaic_0001>
module attributes {stable_mosaic.version = 11 : i64} {
  func.func @_conv_stats_kernel(%arg0: i32, %arg1: i32, %arg2: memref<2x18x18x128xf32, #tpu.memory_space<any>>, %arg3: memref<1152x128xf32, #tpu.memory_space<vmem>>, %arg4: memref<128x128xf32, #tpu.memory_space<vmem>>, %arg5: memref<1x8x128xf32, #tpu.memory_space<vmem>>, %arg6: memref<1x8x128xf32, #tpu.memory_space<vmem>>, %arg7: memref<10x18x128xf32, #tpu.memory_space<vmem>>, %arg8: memref<!tpu.dma_semaphore, #tpu.memory_space<semaphore_mem>>) attributes {dimension_semantics = [#tpu.dimension_semantics<parallel>, #tpu.dimension_semantics<arbitrary>], iteration_bounds = array<i64: 2, 2>, scalar_prefetch = 0 : i64, scratch_operands = 2 : i64, tpu.core_type = #tpu.core_type<tc>, window_params = [{}, {pipeline_mode = #tpu.pipeline_mode<synchronous>, transform_indices = @transform_1, window_bounds = array<i64: 1152, 128>}, {transform_indices = @transform_2, window_bounds = array<i64: 128, 128>}, {transform_indices = @transform_3, window_bounds = array<i64: 1, 8, 128>}, {transform_indices = @transform_4, window_bounds = array<i64: 1, 8, 128>}]} {
    %c8_i32 = arith.constant 8 : i32
    %0 = arith.muli %arg1, %c8_i32 : i32
    %c0_i32 = arith.constant 0 : i32
    %c0_i32_0 = arith.constant 0 : i32
    %1 = tpu.memref_slice %arg2[%arg0, %0, %c0_i32, %c0_i32_0] : memref<2x18x18x128xf32, #tpu.memory_space<any>> -> memref<1x10x18x128xf32, #tpu.memory_space<any>>
    %2 = tpu.memref_squeeze %1 : memref<1x10x18x128xf32, #tpu.memory_space<any>> -> memref<10x18x128xf32, #tpu.memory_space<any>>
    tpu.enqueue_dma source(%2 : memref<10x18x128xf32, #tpu.memory_space<any>>) target(%arg7 : memref<10x18x128xf32, #tpu.memory_space<vmem>>) target_semaphore(%arg8 : memref<!tpu.dma_semaphore, #tpu.memory_space<semaphore_mem>>)
    %c0_i32_1 = arith.constant 0 : i32
    %3 = arith.cmpi eq, %arg1, %c0_i32_1 : i32
    %4 = arith.extui %3 : i1 to i32
    %c0_i32_2 = arith.constant 0 : i32
    %5 = arith.cmpi ne, %4, %c0_i32_2 : i32
    scf.if %5 {
      %cst_25 = arith.constant 0.000000e+00 : f32
      %44 = vector.broadcast %cst_25 : f32 to vector<1x8x128xf32>
      %c0_26 = arith.constant 0 : index
      %c0_27 = arith.constant 0 : index
      %c0_28 = arith.constant 0 : index
      %45 = vector.load %arg5[%c0_26, %c0_27, %c0_28] : memref<1x8x128xf32, #tpu.memory_space<vmem>>, vector<1x8x128xf32>
      tpu.vector_store %arg5[%c0_26, %c0_27, %c0_28], %44 {strides = array<i32>} : memref<1x8x128xf32, #tpu.memory_space<vmem>>, vector<1x8x128xf32>,
      %cst_29 = arith.constant 0.000000e+00 : f32
      %46 = vector.broadcast %cst_29 : f32 to vector<1x8x128xf32>
      %c0_30 = arith.constant 0 : index
      %c0_31 = arith.constant 0 : index
      %c0_32 = arith.constant 0 : index
      %47 = vector.load %arg6[%c0_30, %c0_31, %c0_32] : memref<1x8x128xf32, #tpu.memory_space<vmem>>, vector<1x8x128xf32>
      tpu.vector_store %arg6[%c0_30, %c0_31, %c0_32], %46 {strides = array<i32>} : memref<1x8x128xf32, #tpu.memory_space<vmem>>, vector<1x8x128xf32>,
    } else {
    }
    %c0_i32_3 = arith.constant 0 : i32
    %c0_i32_4 = arith.constant 0 : i32
    %6 = tpu.memref_slice %arg2[%arg0, %0, %c0_i32_3, %c0_i32_4] : memref<2x18x18x128xf32, #tpu.memory_space<any>> -> memref<1x10x18x128xf32, #tpu.memory_space<any>>
    %7 = tpu.memref_squeeze %6 : memref<1x10x18x128xf32, #tpu.memory_space<any>> -> memref<10x18x128xf32, #tpu.memory_space<any>>
    tpu.wait_dma2 semaphore(%arg8 : memref<!tpu.dma_semaphore, #tpu.memory_space<semaphore_mem>>) src(%7 : memref<10x18x128xf32, #tpu.memory_space<any>>) dst(%arg7 : memref<10x18x128xf32, #tpu.memory_space<vmem>>)
    %c0 = arith.constant 0 : index
    %c0_5 = arith.constant 0 : index
    %c0_6 = arith.constant 0 : index
    %8 = vector.load %arg7[%c0, %c0_5, %c0_6] : memref<10x18x128xf32, #tpu.memory_space<vmem>>, vector<10x18x128xf32>
    %c0_7 = arith.constant 0 : index
    %c0_8 = arith.constant 0 : index
    %9 = vector.load %arg3[%c0_7, %c0_8] : memref<1152x128xf32, #tpu.memory_space<vmem>>, vector<1152x128xf32>
    %10 = vector.extract_strided_slice %8 {offsets = [0, 0, 0], sizes = [8, 16, 128], strides = [1, 1, 1]} : vector<10x18x128xf32> to vector<8x16x128xf32>
    %11 = vector.shape_cast %10 : vector<8x16x128xf32> to vector<128x128xf32>
    %12 = vector.extract_strided_slice %8 {offsets = [0, 1, 0], sizes = [8, 16, 128], strides = [1, 1, 1]} : vector<10x18x128xf32> to vector<8x16x128xf32>
    %13 = vector.shape_cast %12 : vector<8x16x128xf32> to vector<128x128xf32>
    %14 = vector.extract_strided_slice %8 {offsets = [0, 2, 0], sizes = [8, 16, 128], strides = [1, 1, 1]} : vector<10x18x128xf32> to vector<8x16x128xf32>
    %15 = vector.shape_cast %14 : vector<8x16x128xf32> to vector<128x128xf32>
    %16 = vector.extract_strided_slice %8 {offsets = [1, 0, 0], sizes = [8, 16, 128], strides = [1, 1, 1]} : vector<10x18x128xf32> to vector<8x16x128xf32>
    %17 = vector.shape_cast %16 : vector<8x16x128xf32> to vector<128x128xf32>
    %18 = vector.extract_strided_slice %8 {offsets = [1, 1, 0], sizes = [8, 16, 128], strides = [1, 1, 1]} : vector<10x18x128xf32> to vector<8x16x128xf32>
    %19 = vector.shape_cast %18 : vector<8x16x128xf32> to vector<128x128xf32>
    %20 = vector.extract_strided_slice %8 {offsets = [1, 2, 0], sizes = [8, 16, 128], strides = [1, 1, 1]} : vector<10x18x128xf32> to vector<8x16x128xf32>
    %21 = vector.shape_cast %20 : vector<8x16x128xf32> to vector<128x128xf32>
    %22 = vector.extract_strided_slice %8 {offsets = [2, 0, 0], sizes = [8, 16, 128], strides = [1, 1, 1]} : vector<10x18x128xf32> to vector<8x16x128xf32>
    %23 = vector.shape_cast %22 : vector<8x16x128xf32> to vector<128x128xf32>
    %24 = vector.extract_strided_slice %8 {offsets = [2, 1, 0], sizes = [8, 16, 128], strides = [1, 1, 1]} : vector<10x18x128xf32> to vector<8x16x128xf32>
    %25 = vector.shape_cast %24 : vector<8x16x128xf32> to vector<128x128xf32>
    %26 = vector.extract_strided_slice %8 {offsets = [2, 2, 0], sizes = [8, 16, 128], strides = [1, 1, 1]} : vector<10x18x128xf32> to vector<8x16x128xf32>
    %27 = vector.shape_cast %26 : vector<8x16x128xf32> to vector<128x128xf32>
    %28 = tpu.concatenate %11, %13, %15, %17, %19, %21, %23, %25, %27 in 1 : vector<128x128xf32>, vector<128x128xf32>, vector<128x128xf32>, vector<128x128xf32>, vector<128x128xf32>, vector<128x128xf32>, vector<128x128xf32>, vector<128x128xf32>, vector<128x128xf32> -> vector<128x1152xf32>
    %cst = arith.constant dense<0.000000e+00> : vector<128x128xf32>
    %29 = tpu.matmul %28, %9, %cst {dimension_numbers = #tpu.dot_dimension_numbers<[1], [0], [0], [1], [0, 0, 1, 1], [], []>} : vector<128x1152xf32>, vector<1152x128xf32>, vector<128x128xf32> -> vector<128x128xf32>
    %c0_9 = arith.constant 0 : index
    %c0_10 = arith.constant 0 : index
    %30 = vector.load %arg4[%c0_9, %c0_10] : memref<128x128xf32, #tpu.memory_space<vmem>>, vector<128x128xf32>
    tpu.vector_store %arg4[%c0_9, %c0_10], %29 {strides = array<i32>} : memref<128x128xf32, #tpu.memory_space<vmem>>, vector<128x128xf32>,
    %31 = vector.shape_cast %29 : vector<128x128xf32> to vector<16x8x128xf32>
    %cst_11 = arith.constant dense<0.000000e+00> : vector<8x128xf32>
    %32 = vector.multi_reduction <add>, %31, %cst_11 [0] : vector<16x8x128xf32> to vector<8x128xf32>
    %33 = arith.mulf %29, %29 : vector<128x128xf32>
    %34 = vector.shape_cast %33 : vector<128x128xf32> to vector<16x8x128xf32>
    %cst_12 = arith.constant dense<0.000000e+00> : vector<8x128xf32>
    %35 = vector.multi_reduction <add>, %34, %cst_12 [0] : vector<16x8x128xf32> to vector<8x128xf32>
    %c0_13 = arith.constant 0 : index
    %c0_14 = arith.constant 0 : index
    %c0_15 = arith.constant 0 : index
    %36 = vector.load %arg5[%c0_13, %c0_14, %c0_15] : memref<1x8x128xf32, #tpu.memory_space<vmem>>, vector<1x8x128xf32>
    %37 = vector.shape_cast %32 : vector<8x128xf32> to vector<1x8x128xf32>
    %38 = arith.addf %36, %37 : vector<1x8x128xf32>
    %c0_16 = arith.constant 0 : index
    %c0_17 = arith.constant 0 : index
    %c0_18 = arith.constant 0 : index
    %39 = vector.load %arg5[%c0_16, %c0_17, %c0_18] : memref<1x8x128xf32, #tpu.memory_space<vmem>>, vector<1x8x128xf32>
    tpu.vector_store %arg5[%c0_16, %c0_17, %c0_18], %38 {strides = array<i32>} : memref<1x8x128xf32, #tpu.memory_space<vmem>>, vector<1x8x128xf32>,
    %c0_19 = arith.constant 0 : index
    %c0_20 = arith.constant 0 : index
    %c0_21 = arith.constant 0 : index
    %40 = vector.load %arg6[%c0_19, %c0_20, %c0_21] : memref<1x8x128xf32, #tpu.memory_space<vmem>>, vector<1x8x128xf32>
    %41 = vector.shape_cast %35 : vector<8x128xf32> to vector<1x8x128xf32>
    %42 = arith.addf %40, %41 : vector<1x8x128xf32>
    %c0_22 = arith.constant 0 : index
    %c0_23 = arith.constant 0 : index
    %c0_24 = arith.constant 0 : index
    %43 = vector.load %arg6[%c0_22, %c0_23, %c0_24] : memref<1x8x128xf32, #tpu.memory_space<vmem>>, vector<1x8x128xf32>
    tpu.vector_store %arg6[%c0_22, %c0_23, %c0_24], %42 {strides = array<i32>} : memref<1x8x128xf32, #tpu.memory_space<vmem>>, vector<1x8x128xf32>,
    return
  }
  func.func @transform_1(%arg0: i32, %arg1: i32) -> (i32, i32) {
    %c0_i32 = arith.constant 0 : i32
    %c0_i32_0 = arith.constant 0 : i32
    %c0_i32_1 = arith.constant 0 : i32
    return %c0_i32, %c0_i32_0 : i32, i32
  }
  func.func @transform_2(%arg0: i32, %arg1: i32) -> (i32, i32) {
    %c2_i32 = arith.constant 2 : i32
    %0 = arith.muli %arg0, %c2_i32 : i32
    %1 = arith.addi %0, %arg1 : i32
    %c0_i32 = arith.constant 0 : i32
    %c0_i32_0 = arith.constant 0 : i32
    return %1, %c0_i32 : i32, i32
  }
  func.func @transform_3(%arg0: i32, %arg1: i32) -> (i32, i32, i32) {
    %c0_i32 = arith.constant 0 : i32
    %c0_i32_0 = arith.constant 0 : i32
    %c0_i32_1 = arith.constant 0 : i32
    return %arg0, %c0_i32, %c0_i32_0 : i32, i32, i32
  }
  func.func @transform_4(%arg0: i32, %arg1: i32) -> (i32, i32, i32) {
    %c0_i32 = arith.constant 0 : i32
    %c0_i32_0 = arith.constant 0 : i32
    %c0_i32_1 = arith.constant 0 : i32
    return %arg0, %c0_i32, %c0_i32_0 : i32, i32, i32
  }
}

module attributes {stable_mosaic.version = 11 : i64} {
  func.func @_bnact_conv_stats_kernel(%arg0: i32, %arg1: i32, %arg2: memref<2x18x18x128xf32, #tpu.memory_space<any>>, %arg3: memref<1x128xf32, #tpu.memory_space<vmem>>, %arg4: memref<1x128xf32, #tpu.memory_space<vmem>>, %arg5: memref<1152x128xf32, #tpu.memory_space<vmem>>, %arg6: memref<128x128xf32, #tpu.memory_space<vmem>>, %arg7: memref<1x8x128xf32, #tpu.memory_space<vmem>>, %arg8: memref<1x8x128xf32, #tpu.memory_space<vmem>>, %arg9: memref<10x18x128xf32, #tpu.memory_space<vmem>>, %arg10: memref<!tpu.dma_semaphore, #tpu.memory_space<semaphore_mem>>) attributes {dimension_semantics = [#tpu.dimension_semantics<parallel>, #tpu.dimension_semantics<arbitrary>], iteration_bounds = array<i64: 2, 2>, scalar_prefetch = 0 : i64, scratch_operands = 2 : i64, tpu.core_type = #tpu.core_type<tc>, window_params = [{}, {pipeline_mode = #tpu.pipeline_mode<synchronous>, transform_indices = @transform_1, window_bounds = array<i64: 1, 128>}, {pipeline_mode = #tpu.pipeline_mode<synchronous>, transform_indices = @transform_2, window_bounds = array<i64: 1, 128>}, {pipeline_mode = #tpu.pipeline_mode<synchronous>, transform_indices = @transform_3, window_bounds = array<i64: 1152, 128>}, {transform_indices = @transform_4, window_bounds = array<i64: 128, 128>}, {transform_indices = @transform_5, window_bounds = array<i64: 1, 8, 128>}, {transform_indices = @transform_6, window_bounds = array<i64: 1, 8, 128>}]} {
    %c8_i32 = arith.constant 8 : i32
    %0 = arith.muli %arg1, %c8_i32 : i32
    %c0_i32 = arith.constant 0 : i32
    %c0_i32_0 = arith.constant 0 : i32
    %1 = tpu.memref_slice %arg2[%arg0, %0, %c0_i32, %c0_i32_0] : memref<2x18x18x128xf32, #tpu.memory_space<any>> -> memref<1x10x18x128xf32, #tpu.memory_space<any>>
    %2 = tpu.memref_squeeze %1 : memref<1x10x18x128xf32, #tpu.memory_space<any>> -> memref<10x18x128xf32, #tpu.memory_space<any>>
    tpu.enqueue_dma source(%2 : memref<10x18x128xf32, #tpu.memory_space<any>>) target(%arg9 : memref<10x18x128xf32, #tpu.memory_space<vmem>>) target_semaphore(%arg10 : memref<!tpu.dma_semaphore, #tpu.memory_space<semaphore_mem>>)
    %c0_i32_1 = arith.constant 0 : i32
    %3 = arith.cmpi eq, %arg1, %c0_i32_1 : i32
    %4 = arith.extui %3 : i1 to i32
    %c0_i32_2 = arith.constant 0 : i32
    %5 = arith.cmpi ne, %4, %c0_i32_2 : i32
    scf.if %5 {
      %cst_31 = arith.constant 0.000000e+00 : f32
      %57 = vector.broadcast %cst_31 : f32 to vector<1x8x128xf32>
      %c0_32 = arith.constant 0 : index
      %c0_33 = arith.constant 0 : index
      %c0_34 = arith.constant 0 : index
      %58 = vector.load %arg7[%c0_32, %c0_33, %c0_34] : memref<1x8x128xf32, #tpu.memory_space<vmem>>, vector<1x8x128xf32>
      tpu.vector_store %arg7[%c0_32, %c0_33, %c0_34], %57 {strides = array<i32>} : memref<1x8x128xf32, #tpu.memory_space<vmem>>, vector<1x8x128xf32>,
      %cst_35 = arith.constant 0.000000e+00 : f32
      %59 = vector.broadcast %cst_35 : f32 to vector<1x8x128xf32>
      %c0_36 = arith.constant 0 : index
      %c0_37 = arith.constant 0 : index
      %c0_38 = arith.constant 0 : index
      %60 = vector.load %arg8[%c0_36, %c0_37, %c0_38] : memref<1x8x128xf32, #tpu.memory_space<vmem>>, vector<1x8x128xf32>
      tpu.vector_store %arg8[%c0_36, %c0_37, %c0_38], %59 {strides = array<i32>} : memref<1x8x128xf32, #tpu.memory_space<vmem>>, vector<1x8x128xf32>,
    } else {
    }
    %c0_i32_3 = arith.constant 0 : i32
    %c0_i32_4 = arith.constant 0 : i32
    %6 = tpu.memref_slice %arg2[%arg0, %0, %c0_i32_3, %c0_i32_4] : memref<2x18x18x128xf32, #tpu.memory_space<any>> -> memref<1x10x18x128xf32, #tpu.memory_space<any>>
    %7 = tpu.memref_squeeze %6 : memref<1x10x18x128xf32, #tpu.memory_space<any>> -> memref<10x18x128xf32, #tpu.memory_space<any>>
    tpu.wait_dma2 semaphore(%arg10 : memref<!tpu.dma_semaphore, #tpu.memory_space<semaphore_mem>>) src(%7 : memref<10x18x128xf32, #tpu.memory_space<any>>) dst(%arg9 : memref<10x18x128xf32, #tpu.memory_space<vmem>>)
    %c0 = arith.constant 0 : index
    %c0_5 = arith.constant 0 : index
    %8 = vector.load %arg3[%c0, %c0_5] : memref<1x128xf32, #tpu.memory_space<vmem>>, vector<1x128xf32>
    %9 = vector.shape_cast %8 : vector<1x128xf32> to vector<1x1x128xf32>
    %c0_6 = arith.constant 0 : index
    %c0_7 = arith.constant 0 : index
    %10 = vector.load %arg4[%c0_6, %c0_7] : memref<1x128xf32, #tpu.memory_space<vmem>>, vector<1x128xf32>
    %11 = vector.shape_cast %10 : vector<1x128xf32> to vector<1x1x128xf32>
    %c0_8 = arith.constant 0 : index
    %c0_9 = arith.constant 0 : index
    %c0_10 = arith.constant 0 : index
    %12 = vector.load %arg9[%c0_8, %c0_9, %c0_10] : memref<10x18x128xf32, #tpu.memory_space<vmem>>, vector<10x18x128xf32>
    %13 = vector.broadcast %9 : vector<1x1x128xf32> to vector<10x18x128xf32>
    %14 = arith.mulf %12, %13 : vector<10x18x128xf32>
    %15 = vector.broadcast %11 : vector<1x1x128xf32> to vector<10x18x128xf32>
    %16 = arith.addf %14, %15 : vector<10x18x128xf32>
    %cst = arith.constant 0.000000e+00 : f32
    %17 = vector.broadcast %cst : f32 to vector<10x18x128xf32>
    %18 = arith.cmpf oge, %16, %17 : vector<10x18x128xf32>
    %cst_11 = arith.constant 2.000000e-01 : f32
    %19 = vector.broadcast %cst_11 : f32 to vector<10x18x128xf32>
    %20 = arith.mulf %19, %16 : vector<10x18x128xf32>
    %21 = arith.select %18, %16, %20 : vector<10x18x128xi1>, vector<10x18x128xf32>
    %c0_12 = arith.constant 0 : index
    %c0_13 = arith.constant 0 : index
    %22 = vector.load %arg5[%c0_12, %c0_13] : memref<1152x128xf32, #tpu.memory_space<vmem>>, vector<1152x128xf32>
    %23 = vector.extract_strided_slice %21 {offsets = [0, 0, 0], sizes = [8, 16, 128], strides = [1, 1, 1]} : vector<10x18x128xf32> to vector<8x16x128xf32>
    %24 = vector.shape_cast %23 : vector<8x16x128xf32> to vector<128x128xf32>
    %25 = vector.extract_strided_slice %21 {offsets = [0, 1, 0], sizes = [8, 16, 128], strides = [1, 1, 1]} : vector<10x18x128xf32> to vector<8x16x128xf32>
    %26 = vector.shape_cast %25 : vector<8x16x128xf32> to vector<128x128xf32>
    %27 = vector.extract_strided_slice %21 {offsets = [0, 2, 0], sizes = [8, 16, 128], strides = [1, 1, 1]} : vector<10x18x128xf32> to vector<8x16x128xf32>
    %28 = vector.shape_cast %27 : vector<8x16x128xf32> to vector<128x128xf32>
    %29 = vector.extract_strided_slice %21 {offsets = [1, 0, 0], sizes = [8, 16, 128], strides = [1, 1, 1]} : vector<10x18x128xf32> to vector<8x16x128xf32>
    %30 = vector.shape_cast %29 : vector<8x16x128xf32> to vector<128x128xf32>
    %31 = vector.extract_strided_slice %21 {offsets = [1, 1, 0], sizes = [8, 16, 128], strides = [1, 1, 1]} : vector<10x18x128xf32> to vector<8x16x128xf32>
    %32 = vector.shape_cast %31 : vector<8x16x128xf32> to vector<128x128xf32>
    %33 = vector.extract_strided_slice %21 {offsets = [1, 2, 0], sizes = [8, 16, 128], strides = [1, 1, 1]} : vector<10x18x128xf32> to vector<8x16x128xf32>
    %34 = vector.shape_cast %33 : vector<8x16x128xf32> to vector<128x128xf32>
    %35 = vector.extract_strided_slice %21 {offsets = [2, 0, 0], sizes = [8, 16, 128], strides = [1, 1, 1]} : vector<10x18x128xf32> to vector<8x16x128xf32>
    %36 = vector.shape_cast %35 : vector<8x16x128xf32> to vector<128x128xf32>
    %37 = vector.extract_strided_slice %21 {offsets = [2, 1, 0], sizes = [8, 16, 128], strides = [1, 1, 1]} : vector<10x18x128xf32> to vector<8x16x128xf32>
    %38 = vector.shape_cast %37 : vector<8x16x128xf32> to vector<128x128xf32>
    %39 = vector.extract_strided_slice %21 {offsets = [2, 2, 0], sizes = [8, 16, 128], strides = [1, 1, 1]} : vector<10x18x128xf32> to vector<8x16x128xf32>
    %40 = vector.shape_cast %39 : vector<8x16x128xf32> to vector<128x128xf32>
    %41 = tpu.concatenate %24, %26, %28, %30, %32, %34, %36, %38, %40 in 1 : vector<128x128xf32>, vector<128x128xf32>, vector<128x128xf32>, vector<128x128xf32>, vector<128x128xf32>, vector<128x128xf32>, vector<128x128xf32>, vector<128x128xf32>, vector<128x128xf32> -> vector<128x1152xf32>
    %cst_14 = arith.constant dense<0.000000e+00> : vector<128x128xf32>
    %42 = tpu.matmul %41, %22, %cst_14 {dimension_numbers = #tpu.dot_dimension_numbers<[1], [0], [0], [1], [0, 0, 1, 1], [], []>} : vector<128x1152xf32>, vector<1152x128xf32>, vector<128x128xf32> -> vector<128x128xf32>
    %c0_15 = arith.constant 0 : index
    %c0_16 = arith.constant 0 : index
    %43 = vector.load %arg6[%c0_15, %c0_16] : memref<128x128xf32, #tpu.memory_space<vmem>>, vector<128x128xf32>
    tpu.vector_store %arg6[%c0_15, %c0_16], %42 {strides = array<i32>} : memref<128x128xf32, #tpu.memory_space<vmem>>, vector<128x128xf32>,
    %44 = vector.shape_cast %42 : vector<128x128xf32> to vector<16x8x128xf32>
    %cst_17 = arith.constant dense<0.000000e+00> : vector<8x128xf32>
    %45 = vector.multi_reduction <add>, %44, %cst_17 [0] : vector<16x8x128xf32> to vector<8x128xf32>
    %46 = arith.mulf %42, %42 : vector<128x128xf32>
    %47 = vector.shape_cast %46 : vector<128x128xf32> to vector<16x8x128xf32>
    %cst_18 = arith.constant dense<0.000000e+00> : vector<8x128xf32>
    %48 = vector.multi_reduction <add>, %47, %cst_18 [0] : vector<16x8x128xf32> to vector<8x128xf32>
    %c0_19 = arith.constant 0 : index
    %c0_20 = arith.constant 0 : index
    %c0_21 = arith.constant 0 : index
    %49 = vector.load %arg7[%c0_19, %c0_20, %c0_21] : memref<1x8x128xf32, #tpu.memory_space<vmem>>, vector<1x8x128xf32>
    %50 = vector.shape_cast %45 : vector<8x128xf32> to vector<1x8x128xf32>
    %51 = arith.addf %49, %50 : vector<1x8x128xf32>
    %c0_22 = arith.constant 0 : index
    %c0_23 = arith.constant 0 : index
    %c0_24 = arith.constant 0 : index
    %52 = vector.load %arg7[%c0_22, %c0_23, %c0_24] : memref<1x8x128xf32, #tpu.memory_space<vmem>>, vector<1x8x128xf32>
    tpu.vector_store %arg7[%c0_22, %c0_23, %c0_24], %51 {strides = array<i32>} : memref<1x8x128xf32, #tpu.memory_space<vmem>>, vector<1x8x128xf32>,
    %c0_25 = arith.constant 0 : index
    %c0_26 = arith.constant 0 : index
    %c0_27 = arith.constant 0 : index
    %53 = vector.load %arg8[%c0_25, %c0_26, %c0_27] : memref<1x8x128xf32, #tpu.memory_space<vmem>>, vector<1x8x128xf32>
    %54 = vector.shape_cast %48 : vector<8x128xf32> to vector<1x8x128xf32>
    %55 = arith.addf %53, %54 : vector<1x8x128xf32>
    %c0_28 = arith.constant 0 : index
    %c0_29 = arith.constant 0 : index
    %c0_30 = arith.constant 0 : index
    %56 = vector.load %arg8[%c0_28, %c0_29, %c0_30] : memref<1x8x128xf32, #tpu.memory_space<vmem>>, vector<1x8x128xf32>
    tpu.vector_store %arg8[%c0_28, %c0_29, %c0_30], %55 {strides = array<i32>} : memref<1x8x128xf32, #tpu.memory_space<vmem>>, vector<1x8x128xf32>,
    return
  }
  func.func @transform_1(%arg0: i32, %arg1: i32) -> (i32, i32) {
    %c0_i32 = arith.constant 0 : i32
    %c0_i32_0 = arith.constant 0 : i32
    %c0_i32_1 = arith.constant 0 : i32
    return %c0_i32, %c0_i32_0 : i32, i32
  }
  func.func @transform_2(%arg0: i32, %arg1: i32) -> (i32, i32) {
    %c0_i32 = arith.constant 0 : i32
    %c0_i32_0 = arith.constant 0 : i32
    %c0_i32_1 = arith.constant 0 : i32
    return %c0_i32, %c0_i32_0 : i32, i32
  }
  func.func @transform_3(%arg0: i32, %arg1: i32) -> (i32, i32) {
    %c0_i32 = arith.constant 0 : i32
    %c0_i32_0 = arith.constant 0 : i32
    %c0_i32_1 = arith.constant 0 : i32
    return %c0_i32, %c0_i32_0 : i32, i32
  }
  func.func @transform_4(%arg0: i32, %arg1: i32) -> (i32, i32) {
    %c2_i32 = arith.constant 2 : i32
    %0 = arith.muli %arg0, %c2_i32 : i32
    %1 = arith.addi %0, %arg1 : i32
    %c0_i32 = arith.constant 0 : i32
    %c0_i32_0 = arith.constant 0 : i32
    return %1, %c0_i32 : i32, i32
  }
  func.func @transform_5(%arg0: i32, %arg1: i32) -> (i32, i32, i32) {
    %c0_i32 = arith.constant 0 : i32
    %c0_i32_0 = arith.constant 0 : i32
    %c0_i32_1 = arith.constant 0 : i32
    return %arg0, %c0_i32, %c0_i32_0 : i32, i32, i32
  }
  func.func @transform_6(%arg0: i32, %arg1: i32) -> (i32, i32, i32) {
    %c0_i32 = arith.constant 0 : i32
    %c0_i32_0 = arith.constant 0 : i32
    %c0_i32_1 = arith.constant 0 : i32
    return %arg0, %c0_i32, %c0_i32_0 : i32, i32, i32
  }
}

module attributes {stable_mosaic.version = 11 : i64} {
  func.func @_bn_skip_act_kernel(%arg0: i32, %arg1: memref<128x128xf32, #tpu.memory_space<vmem>>, %arg2: memref<128x128xf32, #tpu.memory_space<vmem>>, %arg3: memref<128x128xf32, #tpu.memory_space<vmem>>, %arg4: memref<1x128xf32, #tpu.memory_space<vmem>>, %arg5: memref<1x128xf32, #tpu.memory_space<vmem>>, %arg6: memref<1x128xf32, #tpu.memory_space<vmem>>, %arg7: memref<128x128xf32, #tpu.memory_space<vmem>>) attributes {dimension_semantics = [#tpu.dimension_semantics<parallel>], iteration_bounds = array<i64: 4>, scalar_prefetch = 0 : i64, scratch_operands = 0 : i64, tpu.core_type = #tpu.core_type<tc>, window_params = [{transform_indices = @transform_0, window_bounds = array<i64: 128, 128>}, {transform_indices = @transform_1, window_bounds = array<i64: 128, 128>}, {pipeline_mode = #tpu.pipeline_mode<synchronous>, transform_indices = @transform_2, window_bounds = array<i64: 128, 128>}, {pipeline_mode = #tpu.pipeline_mode<synchronous>, transform_indices = @transform_3, window_bounds = array<i64: 1, 128>}, {pipeline_mode = #tpu.pipeline_mode<synchronous>, transform_indices = @transform_4, window_bounds = array<i64: 1, 128>}, {pipeline_mode = #tpu.pipeline_mode<synchronous>, transform_indices = @transform_5, window_bounds = array<i64: 1, 128>}, {transform_indices = @transform_6, window_bounds = array<i64: 128, 128>}]} {
    %c0 = arith.constant 0 : index
    %c0_0 = arith.constant 0 : index
    %0 = vector.load %arg2[%c0, %c0_0] : memref<128x128xf32, #tpu.memory_space<vmem>>, vector<128x128xf32>
    %c0_1 = arith.constant 0 : index
    %c0_2 = arith.constant 0 : index
    %1 = vector.load %arg3[%c0_1, %c0_2] : memref<128x128xf32, #tpu.memory_space<vmem>>, vector<128x128xf32>
    %cst = arith.constant dense<0.000000e+00> : vector<128x128xf32>
    %2 = tpu.matmul %0, %1, %cst {dimension_numbers = #tpu.dot_dimension_numbers<[1], [0], [0], [1], [0, 0, 1, 1], [], []>} : vector<128x128xf32>, vector<128x128xf32>, vector<128x128xf32> -> vector<128x128xf32>
    %c0_3 = arith.constant 0 : index
    %c0_4 = arith.constant 0 : index
    %3 = vector.load %arg4[%c0_3, %c0_4] : memref<1x128xf32, #tpu.memory_space<vmem>>, vector<1x128xf32>
    %4 = vector.broadcast %3 : vector<1x128xf32> to vector<128x128xf32>
    %5 = arith.addf %2, %4 : vector<128x128xf32>
    %c0_5 = arith.constant 0 : index
    %c0_6 = arith.constant 0 : index
    %6 = vector.load %arg1[%c0_5, %c0_6] : memref<128x128xf32, #tpu.memory_space<vmem>>, vector<128x128xf32>
    %c0_7 = arith.constant 0 : index
    %c0_8 = arith.constant 0 : index
    %7 = vector.load %arg5[%c0_7, %c0_8] : memref<1x128xf32, #tpu.memory_space<vmem>>, vector<1x128xf32>
    %8 = vector.broadcast %7 : vector<1x128xf32> to vector<128x128xf32>
    %9 = arith.mulf %6, %8 : vector<128x128xf32>
    %c0_9 = arith.constant 0 : index
    %c0_10 = arith.constant 0 : index
    %10 = vector.load %arg6[%c0_9, %c0_10] : memref<1x128xf32, #tpu.memory_space<vmem>>, vector<1x128xf32>
    %11 = vector.broadcast %10 : vector<1x128xf32> to vector<128x128xf32>
    %12 = arith.addf %9, %11 : vector<128x128xf32>
    %13 = arith.addf %12, %5 : vector<128x128xf32>
    %cst_11 = arith.constant 0.000000e+00 : f32
    %14 = vector.broadcast %cst_11 : f32 to vector<128x128xf32>
    %15 = arith.cmpf oge, %13, %14 : vector<128x128xf32>
    %cst_12 = arith.constant 2.000000e-01 : f32
    %16 = vector.broadcast %cst_12 : f32 to vector<128x128xf32>
    %17 = arith.mulf %16, %13 : vector<128x128xf32>
    %18 = arith.select %15, %13, %17 : vector<128x128xi1>, vector<128x128xf32>
    %c0_13 = arith.constant 0 : index
    %c0_14 = arith.constant 0 : index
    %19 = vector.load %arg7[%c0_13, %c0_14] : memref<128x128xf32, #tpu.memory_space<vmem>>, vector<128x128xf32>
    tpu.vector_store %arg7[%c0_13, %c0_14], %18 {strides = array<i32>} : memref<128x128xf32, #tpu.memory_space<vmem>>, vector<128x128xf32>,
    return
  }
  func.func @transform_0(%arg0: i32) -> (i32, i32) {
    %c0_i32 = arith.constant 0 : i32
    %c0_i32_0 = arith.constant 0 : i32
    return %arg0, %c0_i32 : i32, i32
  }
  func.func @transform_1(%arg0: i32) -> (i32, i32) {
    %c0_i32 = arith.constant 0 : i32
    %c0_i32_0 = arith.constant 0 : i32
    return %arg0, %c0_i32 : i32, i32
  }
  func.func @transform_2(%arg0: i32) -> (i32, i32) {
    %c0_i32 = arith.constant 0 : i32
    %c0_i32_0 = arith.constant 0 : i32
    %c0_i32_1 = arith.constant 0 : i32
    return %c0_i32, %c0_i32_0 : i32, i32
  }
  func.func @transform_3(%arg0: i32) -> (i32, i32) {
    %c0_i32 = arith.constant 0 : i32
    %c0_i32_0 = arith.constant 0 : i32
    %c0_i32_1 = arith.constant 0 : i32
    return %c0_i32, %c0_i32_0 : i32, i32
  }
  func.func @transform_4(%arg0: i32) -> (i32, i32) {
    %c0_i32 = arith.constant 0 : i32
    %c0_i32_0 = arith.constant 0 : i32
    %c0_i32_1 = arith.constant 0 : i32
    return %c0_i32, %c0_i32_0 : i32, i32
  }
  func.func @transform_5(%arg0: i32) -> (i32, i32) {
    %c0_i32 = arith.constant 0 : i32
    %c0_i32_0 = arith.constant 0 : i32
    %c0_i32_1 = arith.constant 0 : i32
    return %c0_i32, %c0_i32_0 : i32, i32
  }
  func.func @transform_6(%arg0: i32) -> (i32, i32) {
    %c0_i32 = arith.constant 0 : i32
    %c0_i32_0 = arith.constant 0 : i32
    return %arg0, %c0_i32 : i32, i32
  }
}

</mosaic_0001>

<bundles_post_ra>
// kernel: res_block_forward.5
= control target key start
LH: loop header
LB: loop body
LE: loop exit
PB: predicated region body
PF: predicated region fallthrough
CT: control target
= control target key end

     0   :  { %s874_s21 = smov 0   ;;  %s1028_s0 = inlined_call_operand.vmem [shape: f32[512,128], index: 0, kind: input, shape index: {}]   ;;  %s1029_s1 = inlined_call_operand.vmem [shape: f32[512,128], index: 1, kind: input, shape index: {}]   ;;  %s1030_s2 = inlined_call_operand.vmem [shape: f32[128,128], index: 2, kind: input, shape index: {}]   ;;  %s1031_s3 = inlined_call_operand.vmem [shape: f32[1,128], index: 3, kind: input, shape index: {}]   ;;  %s1032_s4 = inlined_call_operand.vmem [shape: f32[1,128], index: 4, kind: input, shape index: {}]   ;;  %s1033_s5 = inlined_call_operand.vmem [shape: f32[1,128], index: 5, kind: input, shape index: {}]   ;;  %s1034_s6 = inlined_call_operand.vmem [shape: f32[512,128], index: 6, kind: output, shape index: {}]  }
   0x1 LB: > { %s671_s22 = sadd.s32 4294967295, %s837_s21   ;;  %p675_p0 = scmp.ge.s32.totalorder %s837_s21, 1  ;;  %s837_s21 = sphi %s874_s21, %s16_s21  }
   0x2   : > { %p224_p1 = scmp.lt.s32.totalorder %s837_s21, 5 }
   0x4   : > { %p225_p2 = pnand %p675_p0, %p224_p1 }
   0x5   : > { %v293_v0 = vld [vmem:[%s1030_s2] sm:$0xff] (!%p225_p2)  ;;  %v294_v1 = vld [vmem:[%s1030_s2 + $0x8] sm:$0xff] (!%p225_p2)  ;;  %v295_v2 = vld [vmem:[%s1030_s2 + $0x10] sm:$0xff] (!%p225_p2)  ;;  %s676_s29 = sshll.u32 (!%p225_p2), %s671_s22, 4 }
   0x6   : > { %228 = sbr.rel (%p225_p2) target bundleno = 278 (0x116), region = 44  ;;  %v775_v3 = vpack.c.bf16 (!%p225_p2), %v294_v1, %v293_v0  ;;  %v296_v4 = vld [vmem:[%s1030_s2 + $0x18] sm:$0xff] (!%p225_p2)  ;;  %p260_p3 = scmp.lt.s32.totalorder (!%p225_p2), %s676_s29, 63  ;;  %v297_v6 = vld [vmem:[%s1030_s2 + $0x20] sm:$0xff] (!%p225_p2)  ;;  %v298_v7 = vld [vmem:[%s1030_s2 + $0x28] sm:$0xff] (!%p225_p2) }
   0x7   : > { %v779_v5 = vpack.c.bf16 (!%p225_p2), %v296_v4, %v295_v2  ;;  %v783_v8 = vpack.c.bf16 (!%p225_p2), %v298_v7, %v297_v6  ;;  %v299_v9 = vld [vmem:[%s1030_s2 + $0x30] sm:$0xff] (!%p225_p2)  ;;  %v300_v10 = vld [vmem:[%s1030_s2 + $0x38] sm:$0xff] (!%p225_p2)  ;;  %v301_v14 = vld [vmem:[%s1030_s2 + $0x40] sm:$0xff] (!%p225_p2) }
   0x8   : > { %776 = vmatprep.subr.bf16.mxu0 (!%p225_p2), %v775_v3  ;;  %807 = vmatprep.subr.bf16.mxu1 (!%p225_p2), %v775_v3  ;;  %v787_v13 = vpack.c.bf16 (!%p225_p2), %v300_v10, %v299_v9  ;;  %v302_v15 = vld [vmem:[%s1030_s2 + $0x48] sm:$0xff] (!%p225_p2)  ;;  %v303_v17 = vld [vmem:[%s1030_s2 + $0x50] sm:$0xff] (!%p225_p2)  ;;  %v304_v18 = vld [vmem:[%s1030_s2 + $0x58] sm:$0xff] (!%p225_p2) }
   0x9   : > { %778 = vmatpush3.bf16.msra.mxu0 (!%p225_p2), %v775_v3  ;;  %815 = vmatpush3.bf16.msra.mxu1 (!%p225_p2), %v775_v3  ;;  %v791_v16 = vpack.c.bf16 (!%p225_p2), %v302_v15, %v301_v14  ;;  %v795_v19 = vpack.c.bf16 (!%p225_p2), %v304_v18, %v303_v17  ;;  %v305_v20 = vld [vmem:[%s1030_s2 + $0x60] sm:$0xff] (!%p225_p2)  ;;  %v306_v21 = vld [vmem:[%s1030_s2 + $0x68] sm:$0xff] (!%p225_p2)  ;;  %v307_v23 = vld [vmem:[%s1030_s2 + $0x70] sm:$0xff] (!%p225_p2) }
   0xa   : > { %780 = vmatprep.subr.bf16.mxu0 (!%p225_p2), %v779_v5  ;;  %808 = vmatprep.subr.bf16.mxu1 (!%p225_p2), %v779_v5  ;;  %v799_v22 = vpack.c.bf16 (!%p225_p2), %v306_v21, %v305_v20  ;;  %v308_v24 = vld [vmem:[%s1030_s2 + $0x78] sm:$0xff] (!%p225_p2)  ;;  %v683_v41 = vld [vmem:[%s1032_s4] ss:$0 sm:$0xff] (!%p225_p2) }
   0xb   : > { %v803_v25 = vpack.c.bf16 (!%p225_p2), %v308_v24, %v307_v23  ;;  %v684_v51 = vld [vmem:[%s1033_s5] ss:$0 sm:$0xff] (!%p225_p2) }
   0xc   : > { %v967_v6 = vld [vmem:[%s1031_s3] ss:$0 sm:$0xff] (!%p225_p2) }
   0xd   : > { %s1036_s29 = smov (!%p260_p3, %s676_s29), 63  ;;  %782 = vmatpush3.bf16.msra.mxu0 %v779_v5  ;;  %816 = vmatpush3.bf16.msra.mxu1 %v779_v5 }
   0xe   : > { %s900_s12 = sshll.u32 %s1036_s29, 3  ;;  %784 = vmatprep.subr.bf16.mxu0 %v783_v8  ;;  %809 = vmatprep.subr.bf16.mxu1 %v783_v8 }
   0xf   : > { %s912_s19 = scalar_lea.vmem %s1029_s1, %s900_s12  ;;  %s263_s16 = scalar_lea.vmem %s1028_s0, %s900_s12 }
  0x10   : > { %v277_v11 = vld [vmem:[%s912_s19] sm:$0xff]  ;;  %v278_v26 = vld [vmem:[%s912_s19 + $0x8] sm:$0xff]  ;;  %v279_v28 = vld [vmem:[%s912_s19 + $0x10] sm:$0xff]  ;;  %s989_s26 = scalar_lea.vmem %s1034_s6, %s900_s12 }
  0x11   : > { %v285_v12 = vld [vmem:[%s912_s19 + $0x40] sm:$0xff]  ;;  %751 = vmatprep.mubr.f32.mxu0 %v277_v11  ;;  %786 = vmatpush3.bf16.msra.mxu0 %v783_v8  ;;  %v286_v27 = vld [vmem:[%s912_s19 + $0x48] sm:$0xff]  ;;  %v287_v29 = vld [vmem:[%s912_s19 + $0x50] sm:$0xff] }
  0x12   : > { %763 = vmatprep.mubr.f32.mxu1 %v285_v12  ;;  %817 = vmatpush3.bf16.msra.mxu1 %v783_v8  ;;  %v280_v30 = vld [vmem:[%s912_s19 + $0x18] sm:$0xff]  ;;  %v281_v32 = vld [vmem:[%s912_s19 + $0x20] sm:$0xff]  ;;  %v282_v34 = vld [vmem:[%s912_s19 + $0x28] sm:$0xff] }
  0x13   : > { %788 = vmatprep.subr.bf16.mxu0 %v787_v13  ;;  %810 = vmatprep.subr.bf16.mxu1 %v787_v13  ;;  %v288_v31 = vld [vmem:[%s912_s19 + $0x58] sm:$0xff]  ;;  %v289_v33 = vld [vmem:[%s912_s19 + $0x60] sm:$0xff]  ;;  %v290_v35 = vld [vmem:[%s912_s19 + $0x68] sm:$0xff] }
  0x14   : > { %v283_v36 = vld [vmem:[%s912_s19 + $0x30] sm:$0xff]  ;;  %v284_v38 = vld [vmem:[%s912_s19 + $0x38] sm:$0xff]  ;;  %v462_v40 = vld [vmem:[%s263_s16 + $0x8] sm:$0xff] }
  0x15   : > { %790 = vmatpush3.bf16.msra.mxu0 %v787_v13  ;;  %v291_v37 = vld [vmem:[%s912_s19 + $0x70] sm:$0xff]  ;;  %v292_v39 = vld [vmem:[%s912_s19 + $0x78] sm:$0xff]  ;;  %v470_v42 = vld [vmem:[%s263_s16 + $0x48] sm:$0xff]  ;;  %v485_v47 = vmul.f32 %v683_v41, %v462_v40 }
  0x16   : > { %818 = vmatpush3.bf16.msra.mxu1 %v787_v13  ;;  %792 = vmatprep.subr.bf16.mxu0 %v791_v16  ;;  %v461_v43 = vld [vmem:[%s263_s16] sm:$0xff]  ;;  %v464_v45 = vld [vmem:[%s263_s16 + $0x18] sm:$0xff]  ;;  %v493_v48 = vmul.f32 %v683_v41, %v470_v42  ;;  %v463_v49 = vld [vmem:[%s263_s16 + $0x10] sm:$0xff] }
  0x17   : > { %811 = vmatprep.subr.bf16.mxu1 %v791_v16  ;;  %v469_v44 = vld [vmem:[%s263_s16 + $0x40] sm:$0xff]  ;;  %v472_v46 = vld [vmem:[%s263_s16 + $0x58] sm:$0xff]  ;;  %v471_v50 = vld [vmem:[%s263_s16 + $0x50] sm:$0xff]  ;;  %v484_v52 = vmul.f32 %v683_v41, %v461_v43  ;;  %v487_v56 = vmul.f32 %v683_v41, %v464_v45  ;;  %v486_v60 = vmul.f32 %v683_v41, %v463_v49  ;;  %v508_v0 = vadd.f32 %v684_v51, %v485_v47 }
  0x18   : > { %v492_v53 = vmul.f32 %v683_v41, %v469_v44  ;;  %v466_v54 = vld [vmem:[%s263_s16 + $0x28] sm:$0xff]  ;;  %v495_v57 = vmul.f32 %v683_v41, %v472_v46  ;;  %v465_v58 = vld [vmem:[%s263_s16 + $0x20] sm:$0xff]  ;;  %v494_v61 = vmul.f32 %v683_v41, %v471_v50  ;;  %v468_v62 = vld [vmem:[%s263_s16 + $0x38] sm:$0xff]  ;;  %v516_v1 = vadd.f32 %v684_v51, %v493_v48 }
  0x19   : > { %794 = vmatpush3.bf16.msra.mxu0 %v791_v16  ;;  %v474_v55 = vld [vmem:[%s263_s16 + $0x68] sm:$0xff]  ;;  %v473_v59 = vld [vmem:[%s263_s16 + $0x60] sm:$0xff]  ;;  %v476_v63 = vld [vmem:[%s263_s16 + $0x78] sm:$0xff]  ;;  %v489_v2 = vmul.f32 %v683_v41, %v466_v54  ;;  %v507_v7 = vadd.f32 %v684_v51, %v484_v52  ;;  %v488_v9 = vmul.f32 %v683_v41, %v465_v58  ;;  %v510_v11 = vadd.f32 %v684_v51, %v487_v56 }
  0x1a   : > { %819 = vmatpush3.bf16.msra.mxu1 %v791_v16  ;;  %796 = vmatprep.subr.bf16.mxu0 %v795_v19  ;;  %v497_v3 = vmul.f32 %v683_v41, %v474_v55  ;;  %v467_v4 = vld [vmem:[%s263_s16 + $0x30] sm:$0xff]  ;;  %v515_v8 = vadd.f32 %v684_v51, %v492_v53  ;;  %v496_v10 = vmul.f32 %v683_v41, %v473_v59 }
  0x1b   : > { %812 = vmatprep.subr.bf16.mxu1 %v795_v19  ;;  %v475_v5 = vld [vmem:[%s263_s16 + $0x70] sm:$0xff]  ;;  %v518_v12 = vadd.f32 %v684_v51, %v495_v57  ;;  %v491_v13 = vmul.f32 %v683_v41, %v468_v62  ;;  %v499_v14 = vmul.f32 %v683_v41, %v476_v63  ;;  %v509_v17 = vadd.f32 %v684_v51, %v486_v60 }
  0x1c   : > { %v517_v18 = vadd.f32 %v684_v51, %v494_v61  ;;  %v498_v20 = vmul.f32 %v683_v41, %v475_v5 }
  0x1d   : > { %798 = vmatpush3.bf16.msra.mxu0 %v795_v19 }
  0x1e   : > { %820 = vmatpush3.bf16.msra.mxu1 %v795_v19  ;;  %800 = vmatprep.subr.bf16.mxu0 %v799_v22  ;;  %v490_v19 = vmul.f32 %v683_v41, %v467_v4  ;;  %v983_v40 = vadd.f32 %v684_v51, %v498_v20 }
  0x1f   : > { %813 = vmatprep.subr.bf16.mxu1 %v799_v22 }
  0x21   : > { %802 = vmatpush3.bf16.msra.mxu0 %v799_v22 }
  0x22   : > { %821 = vmatpush3.bf16.msra.mxu1 %v799_v22  ;;  %804 = vmatprep.subr.bf16.mxu0 %v803_v25 }
  0x23   : > { %814 = vmatprep.subr.bf16.mxu1 %v803_v25 }
  0x25   : > { %806 = vmatpush3.bf16.msra.mxu0 %v803_v25 }
  0x26   : > { %822 = vmatpush3.bf16.msra.mxu1 %v803_v25  ;;  %v512_v25 = vadd.f32 %v684_v51, %v489_v2 }
  0x28   : > { %752 = vmatmul.mubr.f32.vlgmr.msra.gmra.mrb[0].mxu0 %v278_v26  ;;  %v520_v26 = vadd.f32 %v684_v51, %v497_v3 }
  0x29   : > { %764 = vmatmul.mubr.f32.vlgmr.msra.gmra.mrb[0].mxu1 %v286_v27  ;;  %754 = vmatprep.mubr.f32.mxu0 %v279_v28 }
  0x2a   : > { %766 = vmatprep.mubr.f32.mxu1 %v287_v29  ;;  %v973_v29 = vadd.f32 %v684_v51, %v488_v9 }
  0x2c   : > { %755 = vmatmul.mubr.f32.gmra.mrb[2].mxu0 %v280_v30  ;;  %v975_v30 = vadd.f32 %v684_v51, %v496_v10 }
  0x2d   : > { %767 = vmatmul.mubr.f32.gmra.mrb[2].mxu1 %v288_v31  ;;  %757 = vmatprep.mubr.f32.mxu0 %v281_v32 }
  0x2e   : > { %769 = vmatprep.mubr.f32.mxu1 %v289_v33  ;;  %v977_v33 = vadd.f32 %v684_v51, %v491_v13 }
  0x30   : > { %758 = vmatmul.mubr.f32.gmra.mrb[4].mxu0 %v282_v34  ;;  %v979_v34 = vadd.f32 %v684_v51, %v499_v14 }
  0x31   : > { %770 = vmatmul.mubr.f32.gmra.mrb[4].mxu1 %v290_v35  ;;  %760 = vmatprep.mubr.f32.mxu0 %v283_v36 }
  0x32   : > { %772 = vmatprep.mubr.f32.mxu1 %v291_v37 }
  0x34   : > { %761 = vmatmul.mubr.f32.gmra.mrb[6].mxu0 %v284_v38 }
  0x35   : > { %773 = vmatmul.mubr.f32.gmra.mrb[6].mxu1 %v292_v39  ;;  %v981_v39 = vadd.f32 %v684_v51, %v490_v19 }
  0xfb   : > { %v753_v15 = vpop.f32.mrb[0].mxu0 }
  0xfc   : > { %v765_v16 = vpop.f32.mrb[0].mxu1  ;;  %v388_v21 = vadd.f32 %v753_v15, %v967_v6  ;;  %v382_v23 = vpop.f32.mrb[1].mxu0 }
  0xfd   : > { %v428_v22 = vadd.f32 %v765_v16, %v967_v6  ;;  %v422_v24 = vpop.f32.mrb[1].mxu1  ;;  %v383_v27 = vadd.f32 %v967_v6, %v382_v23 }
  0xfe   : > { %v423_v28 = vadd.f32 %v967_v6, %v422_v24  ;;  %v524_v31 = vadd.f32 %v508_v0, %v388_v21 }
  0xff   : > { %v532_v32 = vadd.f32 %v516_v1, %v428_v22  ;;  %v523_v35 = vadd.f32 %v507_v7, %v383_v27  ;;  %v756_v37 = vpop.f32.mrb[2].mxu0 }
 0x100   : > { %v531_v36 = vadd.f32 %v515_v8, %v423_v28  ;;  %v768_v38 = vpop.f32.mrb[2].mxu1  ;;  %vm540_vm0 = vcmp.ge.f32.partialorder %v524_v31, 0.0  ;;  %v556_v41 = vmul.f32 0.2, %v524_v31  ;;  %v398_v47 = vadd.f32 %v756_v37, %v967_v6  ;;  %v392_v49 = vpop.f32.mrb[3].mxu0 }
 0x101   : > { %vm548_vm1 = vcmp.ge.f32.partialorder %v532_v32, 0.0  ;;  %v564_v42 = vmul.f32 0.2, %v532_v32  ;;  %vm539_vm2 = vcmp.ge.f32.partialorder %v523_v35, 0.0  ;;  %v555_v43 = vmul.f32 0.2, %v523_v35 }
 0x102   : > { %vm547_vm3 = vcmp.ge.f32.partialorder %v531_v36, 0.0  ;;  %v563_v44 = vmul.f32 0.2, %v531_v36  ;;  %v572_v45 = vsel %vm540_vm0, %v524_v31, %v556_v41  ;;  %v438_v48 = vadd.f32 %v768_v38, %v967_v6  ;;  %v432_v50 = vpop.f32.mrb[3].mxu1 }
 0x103   : > { %v580_v46 = vsel %vm548_vm1, %v532_v32, %v564_v42  ;;  %588 = vst [vmem:[%s989_s26 + $0x8] sm:$0xff] %v572_v45  ;;  %v571_v51 = vsel %vm539_vm2, %v523_v35, %v555_v43  ;;  %v393_v53 = vadd.f32 %v967_v6, %v392_v49  ;;  %v433_v54 = vadd.f32 %v967_v6, %v432_v50  ;;  %v759_v55 = vpop.f32.mrb[4].mxu0 }
 0x104   : > { %596 = vst [vmem:[%s989_s26 + $0x48] sm:$0xff] %v580_v46  ;;  %v579_v52 = vsel %vm547_vm3, %v531_v36, %v563_v44  ;;  %v771_v56 = vpop.f32.mrb[4].mxu1  ;;  %587 = vst [vmem:[%s989_s26] sm:$0xff] %v571_v51  ;;  %v526_v57 = vadd.f32 %v510_v11, %v398_v47  ;;  %v534_v58 = vadd.f32 %v518_v12, %v438_v48  ;;  %v402_v61 = vpop.f32.mrb[5].mxu0 }
 0x105   : > { %595 = vst [vmem:[%s989_s26 + $0x40] sm:$0xff] %v579_v52  ;;  %v408_v59 = vadd.f32 %v759_v55, %v967_v6  ;;  %v448_v60 = vadd.f32 %v771_v56, %v967_v6  ;;  %v442_v62 = vpop.f32.mrb[5].mxu1  ;;  %v525_v63 = vadd.f32 %v509_v17, %v393_v53  ;;  %v533_v0 = vadd.f32 %v517_v18, %v433_v54 }
 0x106   : > { %v403_v1 = vadd.f32 %v967_v6, %v402_v61  ;;  %v443_v2 = vadd.f32 %v967_v6, %v442_v62  ;;  %vm542_vm4 = vcmp.ge.f32.partialorder %v526_v57, 0.0  ;;  %v558_v3 = vmul.f32 0.2, %v526_v57 }
 0x107   : > { %vm550_vm5 = vcmp.ge.f32.partialorder %v534_v58, 0.0  ;;  %v566_v4 = vmul.f32 0.2, %v534_v58  ;;  %vm541_vm6 = vcmp.ge.f32.partialorder %v525_v63, 0.0  ;;  %v557_v5 = vmul.f32 0.2, %v525_v63 }
 0x108   : > { %vm549_vm7 = vcmp.ge.f32.partialorder %v533_v0, 0.0  ;;  %v565_v7 = vmul.f32 0.2, %v533_v0  ;;  %v574_v8 = vsel %vm542_vm4, %v526_v57, %v558_v3  ;;  %v528_v10 = vadd.f32 %v512_v25, %v408_v59  ;;  %v762_v12 = vpop.f32.mrb[6].mxu0  ;;  %v774_v13 = vpop.f32.mrb[6].mxu1 }
 0x109   : > { %v582_v9 = vsel %vm550_vm5, %v534_v58, %v566_v4  ;;  %v536_v11 = vadd.f32 %v520_v26, %v448_v60  ;;  %590 = vst [vmem:[%s989_s26 + $0x18] sm:$0xff] %v574_v8  ;;  %v573_v14 = vsel %vm541_vm6, %v525_v63, %v557_v5  ;;  %v527_v16 = vadd.f32 %v973_v29, %v403_v1  ;;  %v412_v18 = vpop.f32.mrb[7].mxu0  ;;  %v452_v19 = vpop.f32.mrb[7].mxu1 }
 0x10a   : > { %598 = vst [vmem:[%s989_s26 + $0x58] sm:$0xff] %v582_v9  ;;  %v581_v15 = vsel %vm549_vm7, %v533_v0, %v565_v7  ;;  %v535_v17 = vadd.f32 %v975_v30, %v443_v2  ;;  %589 = vst [vmem:[%s989_s26 + $0x10] sm:$0xff] %v573_v14  ;;  %vm544_vm8 = vcmp.ge.f32.partialorder %v528_v10, 0.0  ;;  %v560_v20 = vmul.f32 0.2, %v528_v10 }
 0x10b   : > { %597 = vst [vmem:[%s989_s26 + $0x50] sm:$0xff] %v581_v15  ;;  %vm552_vm9 = vcmp.ge.f32.partialorder %v536_v11, 0.0  ;;  %v568_v21 = vmul.f32 0.2, %v536_v11  ;;  %vm543_vm10 = vcmp.ge.f32.partialorder %v527_v16, 0.0  ;;  %v418_v26 = vadd.f32 %v762_v12, %v967_v6 }
 0x10c   : > { %v559_v22 = vmul.f32 0.2, %v527_v16  ;;  %vm551_vm11 = vcmp.ge.f32.partialorder %v535_v17, 0.0  ;;  %v567_v23 = vmul.f32 0.2, %v535_v17  ;;  %v576_v24 = vsel %vm544_vm8, %v528_v10, %v560_v20 }
 0x10d   : > { %v584_v25 = vsel %vm552_vm9, %v536_v11, %v568_v21  ;;  %v458_v27 = vadd.f32 %v774_v13, %v967_v6  ;;  %592 = vst [vmem:[%s989_s26 + $0x28] sm:$0xff] %v576_v24  ;;  %v413_v30 = vadd.f32 %v967_v6, %v412_v18  ;;  %v453_v31 = vadd.f32 %v967_v6, %v452_v19 }
 0x10e   : > { %600 = vst [vmem:[%s989_s26 + $0x68] sm:$0xff] %v584_v25  ;;  %v575_v28 = vsel %vm543_vm10, %v527_v16, %v559_v22  ;;  %v583_v29 = vsel %vm551_vm11, %v535_v17, %v567_v23  ;;  %v530_v32 = vadd.f32 %v977_v33, %v418_v26 }
 0x10f   : > { %591 = vst [vmem:[%s989_s26 + $0x20] sm:$0xff] %v575_v28  ;;  %599 = vst [vmem:[%s989_s26 + $0x60] sm:$0xff] %v583_v29  ;;  %v538_v35 = vadd.f32 %v979_v34, %v458_v27  ;;  %v529_v36 = vadd.f32 %v981_v39, %v413_v30  ;;  %v537_v37 = vadd.f32 %v983_v40, %v453_v31 }
 0x110   : > { %vm546_vm12 = vcmp.ge.f32.partialorder %v530_v32, 0.0  ;;  %v562_v38 = vmul.f32 0.2, %v530_v32 }
 0x111   : > { %vm554_vm13 = vcmp.ge.f32.partialorder %v538_v35, 0.0  ;;  %v570_v41 = vmul.f32 0.2, %v538_v35  ;;  %vm545_vm14 = vcmp.ge.f32.partialorder %v529_v36, 0.0  ;;  %v561_v6 = vmul.f32 0.2, %v529_v36 }
 0x112   : > { %vm553_vm15 = vcmp.ge.f32.partialorder %v537_v37, 0.0  ;;  %v569_v42 = vmul.f32 0.2, %v537_v37  ;;  %v578_v43 = vsel %vm546_vm12, %v530_v32, %v562_v38 }
 0x113   : > { %v586_v44 = vsel %vm554_vm13, %v538_v35, %v570_v41  ;;  %594 = vst [vmem:[%s989_s26 + $0x38] sm:$0xff] %v578_v43  ;;  %v577_v33 = vsel %vm545_vm14, %v529_v36, %v561_v6 }
 0x114   : > { %602 = vst [vmem:[%s989_s26 + $0x78] sm:$0xff] %v586_v44  ;;  %v585_v34 = vsel %vm553_vm15, %v537_v37, %v569_v42  ;;  %593 = vst [vmem:[%s989_s26 + $0x30] sm:$0xff] %v577_v33 }
 0x115   : > { %601 = vst [vmem:[%s989_s26 + $0x70] sm:$0xff] %v585_v34 }
 0x116 PF: > { %s16_s21 = sadd.s32 1, %s837_s21  }
 0x117   : > { %p13_p4 = scmp.ge.s32.totalorder %s16_s21, 6  }
 0x119   :  { %15 = sbr.rel (!%p13_p4) target bundleno = 1 (0x1), region = 77 }

// kernel: res_block_forward.3
= control target key start
LH: loop header
LB: loop body
LE: loop exit
PB: predicated region body
PF: predicated region fallthrough
CT: control target
= control target key end

     0   :  { %s2346_s15 = smov 0   ;;  %s2348_s16 = smov 0   ;;  %s3293_s0 = inlined_call_operand.vmem [shape: f32[2,18,18,128], index: 0, kind: input, shape index: {}]   ;;  %s3294_s1 = inlined_call_operand.vmem [shape: f32[1152,128], index: 1, kind: input, shape index: {}]   ;;  %s3295_s2 = inlined_call_operand.vmem [shape: f32[512,128], index: 2, kind: output, shape index: {0}]   ;;  %s3296_s3 = inlined_call_operand.vmem [shape: f32[2,8,128], index: 3, kind: output, shape index: {1}]   ;;  %s3297_s4 = inlined_call_operand.vmem [shape: f32[2,8,128], index: 4, kind: output, shape index: {2}]  }
   0x1   :  { %s2350_s17 = smov 0   ;;  %s2352_s18 = smov 0  }
   0x2   :  { %s2354_s19 = smov 0  }
   0x3 LB: > { %s24_s20 = sadd.s32 1, %s2310_s17  ;;  %s27_s21 = sadd.s32 1, %s2314_s18  ;;  %s2318_s19 = sphi %s2354_s19, %s15_s19   ;;  %s2314_s18 = sphi %s2352_s18, %s3301_s18   ;;  %s2310_s17 = sphi %s2350_s17, %s3300_s17   ;;  %s2306_s16 = sphi %s2348_s16, %s3299_s16   ;;  %s2302_s15 = sphi %s2346_s15, %s3298_s15  }
   0x4   : > { %p25_p0 = scmp.ge.s32.totalorder %s24_s20, 2  ;;  %p1631_p1 = scmp.ge.s32.totalorder %s2318_s19, 1 }
   0x5   : > { %p149_p2 = scmp.lt.s32.totalorder %s2318_s19, 5 }
   0x6   : > { %s3303_s20 = smov (%p25_p0, %s24_s20), 0  ;;  %s3305_s21 = smov (!%p25_p0, %s27_s21), %s2314_s18 }
   0x7   : > { %p150_p3 = pnand %p1631_p1, %p149_p2  ;;  %p29_p4 = scmp.ge.s32.totalorder %s3305_s21, 2 }
   0x8   : > { %s1632_s22 = sshll.u32 (!%p150_p3), %s2306_s16, 1  ;;  %p188_p5 = scmp.lt.s32.totalorder (!%p150_p3), %s2306_s16, 1 }
   0x9   : > { %s3307_s21 = smov (%p29_p4, %s3305_s21), 0  ;;  %153 = sbr.rel (%p150_p3) target bundleno = 463 (0x1cf), region = 24 }
   0xa   : > { %s179_s23 = sadd.s32 (!%p150_p3), %s2302_s15, %s1632_s22  ;;  %s1638_s24 = smul.u32 (!%p150_p3), 192, %s2302_s15 }
   0xb   : > { %s1633_s25 = sshll.u32 (!%p150_p3), %s179_s23, 4  ;;  %s198_s26 = smul.u32 (!%p150_p3), 432, %s2306_s16 }
   0xc   : > { %p181_p6 = scmp.lt.s32.totalorder (!%p150_p3), %s1633_s25, 63 }
   0xd   : > { %s199_s28 = sadd.s32 (!%p150_p3), %s1638_s24, %s198_s26 }
  0x10   : > { %s3309_s16 = smov (!%p188_p5, %s2306_s16), 1  ;;  %s3311_s25 = smov (!%p181_p6, %s1633_s25), 63 }
  0x11   : > { %s1635_s27 = sshll.u32 %s3309_s16, 3  ;;  %s1634_s29 = sshll.u32 %s3311_s25, 3 }
  0x12   : > { %s2383_s6 = scalar_lea.vmem %s3296_s3, %s1635_s27  ;;  %s2388_s9 = scalar_lea.vmem %s3295_s2, %s1634_s29 }
  0x13   : > { %s2393_s12 = scalar_lea.vmem %s3297_s4, %s1635_s27  ;;  %s2398_s16 = scalar_lea.vmem %s3293_s0, %s199_s28 }
  0x14   : > { %v256_v0 = vld [vmem:[%s2398_s16] sm:$0xff]  ;;  %v258_v1 = vld [vmem:[%s2398_s16 + $0x8] sm:$0xff]  ;;  %v260_v2 = vld [vmem:[%s2398_s16 + $0x18] sm:$0xff] }
  0x15   : > { %257 = vst [vmem:[#allocation2] sm:$0xff] %v256_v0  ;;  %259 = vst [vmem:[#allocation2 + $0x8] sm:$0xff] %v258_v1  ;;  %v262_v3 = vld [vmem:[%s2398_s16 + $0x20] sm:$0xff]  ;;  %v264_v4 = vld [vmem:[%s2398_s16 + $0x30] sm:$0xff] }
  0x16   : > { %261 = vst [vmem:[#allocation2 + $0x18] sm:$0xff] %v260_v2  ;;  %v266_v5 = vld [vmem:[%s2398_s16 + $0x38] sm:$0xff]  ;;  %263 = vst [vmem:[#allocation2 + $0x20] sm:$0xff] %v262_v3  ;;  %v268_v6 = vld [vmem:[%s2398_s16 + $0x48] sm:$0xff] }
  0x17   : > { %265 = vst [vmem:[#allocation2 + $0x30] sm:$0xff] %v264_v4  ;;  %267 = vst [vmem:[#allocation2 + $0x38] sm:$0xff] %v266_v5  ;;  %v270_v7 = vld [vmem:[%s2398_s16 + $0x50] sm:$0xff]  ;;  %v272_v8 = vld [vmem:[%s2398_s16 + $0x60] sm:$0xff] }
  0x18   : > { %269 = vst [vmem:[#allocation2 + $0x48] sm:$0xff] %v268_v6  ;;  %271 = vst [vmem:[#allocation2 + $0x50] sm:$0xff] %v270_v7  ;;  %v274_v9 = vld [vmem:[%s2398_s16 + $0x68] sm:$0xff]  ;;  %v276_v10 = vld [vmem:[%s2398_s16 + $0x78] sm:$0xff] }
  0x19   : > { %273 = vst [vmem:[#allocation2 + $0x60] sm:$0xff] %v272_v8  ;;  %v278_v11 = vld [vmem:[%s2398_s16 + $0x80] sm:$0xff]  ;;  %275 = vst [vmem:[#allocation2 + $0x68] sm:$0xff] %v274_v9  ;;  %v280_v12 = vld [vmem:[%s2398_s16 + $0x90] sm:$0xff] }
  0x1a   : > { %277 = vst [vmem:[#allocation2 + $0x78] sm:$0xff] %v276_v10  ;;  %279 = vst [vmem:[#allocation2 + $0x80] sm:$0xff] %v278_v11  ;;  %v282_v13 = vld [vmem:[%s2398_s16 + $0x98] sm:$0xff]  ;;  %v284_v14 = vld [vmem:[%s2398_s16 + $0xa8] sm:$0xff] }
  0x1b   : > { %281 = vst [vmem:[#allocation2 + $0x90] sm:$0xff] %v280_v12  ;;  %283 = vst [vmem:[#allocation2 + $0x98] sm:$0xff] %v282_v13  ;;  %v286_v15 = vld [vmem:[%s2398_s16 + $0xb0] sm:$0xff]  ;;  %v288_v16 = vld [vmem:[%s2398_s16 + $0xc0] sm:$0xff] }
  0x1c   : > { %285 = vst [vmem:[#allocation2 + $0xa8] sm:$0xff] %v284_v14  ;;  %v290_v17 = vld [vmem:[%s2398_s16 + $0xc8] sm:$0xff]  ;;  %287 = vst [vmem:[#allocation2 + $0xb0] sm:$0xff] %v286_v15  ;;  %v292_v18 = vld [vmem:[%s2398_s16 + $0xd8] sm:$0xff] }
  0x1d   : > { %289 = vst [vmem:[#allocation2 + $0xc0] sm:$0xff] %v288_v16  ;;  %291 = vst [vmem:[#allocation2 + $0xc8] sm:$0xff] %v290_v17  ;;  %v294_v19 = vld [vmem:[%s2398_s16 + $0xe0] sm:$0xff]  ;;  %v1639_v20 = vld [vmem:[%s2398_s16 + $0x10] sm:$0x3] }
  0x1e   : > { %293 = vst [vmem:[#allocation2 + $0xd8] sm:$0xff] %v292_v18  ;;  %295 = vst [vmem:[#allocation2 + $0xe0] sm:$0xff] %v294_v19  ;;  %v1640_v21 = vld [vmem:[%s2398_s16 + $0x28] sm:$0x3]  ;;  %v1641_v22 = vld [vmem:[%s2398_s16 + $0x40] sm:$0x3] }
  0x1f   : > { %306 = vst [vmem:[#allocation2 + $0x10] sm:$0x3] %v1639_v20  ;;  %v1642_v23 = vld [vmem:[%s2398_s16 + $0x58] sm:$0x3]  ;;  %308 = vst [vmem:[#allocation2 + $0x28] sm:$0x3] %v1640_v21 }
  0x20   : > { %310 = vst [vmem:[#allocation2 + $0x40] sm:$0x3] %v1641_v22  ;;  %312 = vst [vmem:[#allocation2 + $0x58] sm:$0x3] %v1642_v23  ;;  %v1643_v24 = vld [vmem:[%s2398_s16 + $0x70] sm:$0x3] }
  0x21   : > { %v1644_v25 = vld [vmem:[%s2398_s16 + $0x88] sm:$0x3]  ;;  %v1645_v26 = vld [vmem:[%s2398_s16 + $0xa0] sm:$0x3]  ;;  %314 = vst [vmem:[#allocation2 + $0x70] sm:$0x3] %v1643_v24 }
  0x22   : > { %316 = vst [vmem:[#allocation2 + $0x88] sm:$0x3] %v1644_v25  ;;  %318 = vst [vmem:[#allocation2 + $0xa0] sm:$0x3] %v1645_v26  ;;  %v1646_v27 = vld [vmem:[%s2398_s16 + $0xb8] sm:$0x3] }
  0x23   : > { %v1647_v28 = vld [vmem:[%s2398_s16 + $0xd0] sm:$0x3]  ;;  %v1648_v29 = vld [vmem:[%s2398_s16 + $0xe8] sm:$0x3]  ;;  %320 = vst [vmem:[#allocation2 + $0xb8] sm:$0x3] %v1646_v27 }
  0x24   : > { %322 = vst [vmem:[#allocation2 + $0xd0] sm:$0x3] %v1647_v28  ;;  %324 = vst [vmem:[#allocation2 + $0xe8] sm:$0x3] %v1648_v29 }
  0x25   : > { %328 = vsyncadd [#allocation3], 2880  ;;  %p1649_p7 = scmp.ne.s32.totalorder %s2302_s15, 0 }
  0x26   : > { %v2320_v30 = vmov (!%p1649_p7), 0.0  }
  0x27   : > { %332 = sbr.rel (%p1649_p7) target bundleno = 46 (0x2e), region = 65  ;;  %333 = vst [vmem:[%s2383_s6] sm:$0xff] (!%p1649_p7), %v2320_v30  ;;  %334 = vst [vmem:[%s2393_s12] sm:$0xff] (!%p1649_p7), %v2320_v30 }
  0x2e PF: > { %2298 = dma.done.wait [#allocation3], 2880 }
  0x2f   : > { %2299 = vsyncadd [#allocation3], 4294964416  ;;  %v385_v31 = vld [vmem:[%s3294_s1 + $0x80] sm:$0xff]  ;;  %v386_v32 = vld [vmem:[%s3294_s1 + $0x88] sm:$0xff]  ;;  %vm537_vm0 = vcmask 1046528   ;;  %vm594_vm1 = vcmask 1045504  }
  0x30   : > { %v417_v33 = vld [vmem:[%s3294_s1 + $0x180] sm:$0xff]  ;;  %v2061_v34 = vpack.c.bf16 %v386_v32, %v385_v31  ;;  %v418_v35 = vld [vmem:[%s3294_s1 + $0x188] sm:$0xff]  ;;  %v387_v42 = vld [vmem:[%s3294_s1 + $0x90] sm:$0xff] }
  0x31   : > { %v369_v36 = vld [vmem:[%s3294_s1] sm:$0xff]  ;;  %v370_v37 = vld [vmem:[%s3294_s1 + $0x8] sm:$0xff]  ;;  %v2093_v38 = vpack.c.bf16 %v418_v35, %v417_v33  ;;  %v388_v44 = vld [vmem:[%s3294_s1 + $0x98] sm:$0xff] }
  0x32   : > { %v2063_v39 = vpack.c.bf16 %v370_v37, %v369_v36  ;;  %v401_v40 = vld [vmem:[%s3294_s1 + $0x100] sm:$0xff]  ;;  %v402_v41 = vld [vmem:[%s3294_s1 + $0x108] sm:$0xff]  ;;  %2062 = vmatprep.subr.bf16.mxu0 %v2061_v34  ;;  %v419_v45 = vld [vmem:[%s3294_s1 + $0x190] sm:$0xff]  ;;  %v2065_v47 = vpack.c.bf16 %v388_v44, %v387_v42 }
  0x33   : > { %v2095_v43 = vpack.c.bf16 %v402_v41, %v401_v40  ;;  %v420_v46 = vld [vmem:[%s3294_s1 + $0x198] sm:$0xff]  ;;  %2094 = vmatprep.subr.bf16.mxu1 %v2093_v38  ;;  %v371_v49 = vld [vmem:[%s3294_s1 + $0x10] sm:$0xff]  ;;  %v389_v54 = vld [vmem:[%s3294_s1 + $0xa0] sm:$0xff] }
  0x34   : > { %2064 = vmatpush3.bf16.msra.mxu0 %v2063_v39  ;;  %v2097_v48 = vpack.c.bf16 %v420_v46, %v419_v45  ;;  %v372_v50 = vld [vmem:[%s3294_s1 + $0x18] sm:$0xff]  ;;  %v403_v51 = vld [vmem:[%s3294_s1 + $0x110] sm:$0xff]  ;;  %v390_v55 = vld [vmem:[%s3294_s1 + $0xa8] sm:$0xff] }
  0x35   : > { %2096 = vmatpush3.bf16.msra.mxu1 %v2095_v43  ;;  %v2067_v52 = vpack.c.bf16 %v372_v50, %v371_v49  ;;  %v404_v53 = vld [vmem:[%s3294_s1 + $0x118] sm:$0xff]  ;;  %2066 = vmatprep.subr.bf16.mxu0 %v2065_v47  ;;  %v2069_v57 = vpack.c.bf16 %v390_v55, %v389_v54  ;;  %v421_v58 = vld [vmem:[%s3294_s1 + $0x1a0] sm:$0xff]  ;;  %v422_v59 = vld [vmem:[%s3294_s1 + $0x1a8] sm:$0xff] }
  0x36   : > { %2098 = vmatprep.subr.bf16.mxu1 %v2097_v48  ;;  %v2099_v56 = vpack.c.bf16 %v404_v53, %v403_v51  ;;  %v373_v60 = vld [vmem:[%s3294_s1 + $0x20] sm:$0xff]  ;;  %v2101_v61 = vpack.c.bf16 %v422_v59, %v421_v58  ;;  %v374_v62 = vld [vmem:[%s3294_s1 + $0x28] sm:$0xff]  ;;  %v391_v2 = vld [vmem:[%s3294_s1 + $0xb0] sm:$0xff] }
  0x37   : > { %v405_v63 = vld [vmem:[%s3294_s1 + $0x120] sm:$0xff]  ;;  %v406_v0 = vld [vmem:[%s3294_s1 + $0x128] sm:$0xff]  ;;  %v2071_v1 = vpack.c.bf16 %v374_v62, %v373_v60  ;;  %v392_v3 = vld [vmem:[%s3294_s1 + $0xb8] sm:$0xff] }
  0x38   : > { %2068 = vmatpush3.bf16.msra.mxu0 %v2067_v52  ;;  %v423_v4 = vld [vmem:[%s3294_s1 + $0x1b0] sm:$0xff]  ;;  %v2103_v5 = vpack.c.bf16 %v406_v0, %v405_v63  ;;  %v2073_v6 = vpack.c.bf16 %v392_v3, %v391_v2  ;;  %v424_v7 = vld [vmem:[%s3294_s1 + $0x1b8] sm:$0xff]  ;;  %v393_v13 = vld [vmem:[%s3294_s1 + $0xc0] sm:$0xff] }
  0x39   : > { %2100 = vmatpush3.bf16.msra.mxu1 %v2099_v56  ;;  %2070 = vmatprep.subr.bf16.mxu0 %v2069_v57  ;;  %v375_v8 = vld [vmem:[%s3294_s1 + $0x30] sm:$0xff]  ;;  %v376_v9 = vld [vmem:[%s3294_s1 + $0x38] sm:$0xff]  ;;  %v2105_v10 = vpack.c.bf16 %v424_v7, %v423_v4  ;;  %v394_v14 = vld [vmem:[%s3294_s1 + $0xc8] sm:$0xff] }
  0x3a   : > { %2102 = vmatprep.subr.bf16.mxu1 %v2101_v61  ;;  %v407_v11 = vld [vmem:[%s3294_s1 + $0x130] sm:$0xff]  ;;  %v408_v12 = vld [vmem:[%s3294_s1 + $0x138] sm:$0xff]  ;;  %v425_v15 = vld [vmem:[%s3294_s1 + $0x1c0] sm:$0xff]  ;;  %v2075_v17 = vpack.c.bf16 %v376_v9, %v375_v8  ;;  %v2077_v19 = vpack.c.bf16 %v394_v14, %v393_v13 }
  0x3b   : > { %v426_v16 = vld [vmem:[%s3294_s1 + $0x1c8] sm:$0xff]  ;;  %v2107_v18 = vpack.c.bf16 %v408_v12, %v407_v11  ;;  %v377_v20 = vld [vmem:[%s3294_s1 + $0x40] sm:$0xff]  ;;  %v395_v25 = vld [vmem:[%s3294_s1 + $0xd0] sm:$0xff] }
  0x3c   : > { %2072 = vmatpush3.bf16.msra.mxu0 %v2071_v1  ;;  %v378_v21 = vld [vmem:[%s3294_s1 + $0x48] sm:$0xff]  ;;  %v409_v22 = vld [vmem:[%s3294_s1 + $0x140] sm:$0xff]  ;;  %v2109_v23 = vpack.c.bf16 %v426_v16, %v425_v15  ;;  %v396_v26 = vld [vmem:[%s3294_s1 + $0xd8] sm:$0xff] }
  0x3d   : > { %2104 = vmatpush3.bf16.msra.mxu1 %v2103_v5  ;;  %2074 = vmatprep.subr.bf16.mxu0 %v2073_v6  ;;  %v410_v24 = vld [vmem:[%s3294_s1 + $0x148] sm:$0xff]  ;;  %v427_v27 = vld [vmem:[%s3294_s1 + $0x1d0] sm:$0xff]  ;;  %v428_v28 = vld [vmem:[%s3294_s1 + $0x1d8] sm:$0xff]  ;;  %v2079_v29 = vpack.c.bf16 %v378_v21, %v377_v20  ;;  %v2081_v31 = vpack.c.bf16 %v396_v26, %v395_v25 }
  0x3e   : > { %2106 = vmatprep.subr.bf16.mxu1 %v2105_v10  ;;  %v2111_v30 = vpack.c.bf16 %v410_v24, %v409_v22  ;;  %v379_v32 = vld [vmem:[%s3294_s1 + $0x50] sm:$0xff]  ;;  %v380_v33 = vld [vmem:[%s3294_s1 + $0x58] sm:$0xff]  ;;  %v2113_v35 = vpack.c.bf16 %v428_v28, %v427_v27  ;;  %v397_v37 = vld [vmem:[%s3294_s1 + $0xe0] sm:$0xff] }
  0x3f   : > { %v411_v34 = vld [vmem:[%s3294_s1 + $0x150] sm:$0xff]  ;;  %v412_v36 = vld [vmem:[%s3294_s1 + $0x158] sm:$0xff]  ;;  %v398_v38 = vld [vmem:[%s3294_s1 + $0xe8] sm:$0xff]  ;;  %v2083_v41 = vpack.c.bf16 %v380_v33, %v379_v32 }
  0x40   : > { %2076 = vmatpush3.bf16.msra.mxu0 %v2075_v17  ;;  %v429_v39 = vld [vmem:[%s3294_s1 + $0x1e0] sm:$0xff]  ;;  %v430_v40 = vld [vmem:[%s3294_s1 + $0x1e8] sm:$0xff]  ;;  %v2115_v45 = vpack.c.bf16 %v412_v36, %v411_v34  ;;  %v2085_v46 = vpack.c.bf16 %v398_v38, %v397_v37  ;;  %v399_v51 = vld [vmem:[%s3294_s1 + $0xf0] sm:$0xff] }
  0x41   : > { %2108 = vmatpush3.bf16.msra.mxu1 %v2107_v18  ;;  %2078 = vmatprep.subr.bf16.mxu0 %v2077_v19  ;;  %v381_v42 = vld [vmem:[%s3294_s1 + $0x60] sm:$0xff]  ;;  %v382_v43 = vld [vmem:[%s3294_s1 + $0x68] sm:$0xff]  ;;  %v2117_v50 = vpack.c.bf16 %v430_v40, %v429_v39  ;;  %v400_v52 = vld [vmem:[%s3294_s1 + $0xf8] sm:$0xff] }
  0x42   : > { %2110 = vmatprep.subr.bf16.mxu1 %v2109_v23  ;;  %v413_v44 = vld [vmem:[%s3294_s1 + $0x160] sm:$0xff]  ;;  %v414_v47 = vld [vmem:[%s3294_s1 + $0x168] sm:$0xff]  ;;  %v2613_v55 = vld [vmem:[#allocation2 + $0x18] sm:$0xff]  ;;  %v2087_v58 = vpack.c.bf16 %v382_v43, %v381_v42  ;;  %v2089_v61 = vpack.c.bf16 %v400_v52, %v399_v51 }
  0x43   : > { %v2601_v48 = vld [vmem:[#allocation2] sm:$0xff]  ;;  %v2603_v49 = vld [vmem:[#allocation2 + $0x8] sm:$0xff]  ;;  %v431_v56 = vld [vmem:[%s3294_s1 + $0x1f0] sm:$0xff]  ;;  %894 = vmatprep.mubr.f32.mxu1 %v2613_v55  ;;  %v2119_v60 = vpack.c.bf16 %v414_v47, %v413_v44  ;;  %v543_v27 = vrot.slane %v2613_v55, 1  ;;  %v600_v40 = vrot.slane %v2613_v55, 2 }
  0x44   : > { %2080 = vmatpush3.bf16.msra.mxu0 %v2079_v29  ;;  %v538_v53 = vrot.slane %v2601_v48, 1  ;;  %v539_v54 = vrot.slane %v2603_v49, 1  ;;  %v432_v57 = vld [vmem:[%s3294_s1 + $0x1f8] sm:$0xff]  ;;  %v383_v62 = vld [vmem:[%s3294_s1 + $0x70] sm:$0xff]  ;;  %v449_v3 = vld [vmem:[%s3294_s1 + $0x280] sm:$0xff]  ;;  %v595_v10 = vrot.slane %v2601_v48, 2 }
  0x45   : > { %2112 = vmatpush3.bf16.msra.mxu1 %v2111_v30  ;;  %2082 = vmatprep.subr.bf16.mxu0 %v2081_v31  ;;  %v384_v63 = vld [vmem:[%s3294_s1 + $0x78] sm:$0xff]  ;;  %v415_v0 = vld [vmem:[%s3294_s1 + $0x170] sm:$0xff]  ;;  %v2121_v1 = vpack.c.bf16 %v432_v57, %v431_v56  ;;  %v450_v4 = vld [vmem:[%s3294_s1 + $0x288] sm:$0xff]  ;;  %v596_v11 = vrot.slane %v2603_v49, 2 }
  0x46   : > { %2114 = vmatprep.subr.bf16.mxu1 %v2113_v35  ;;  %v540_v59 = vsel %vm537_vm0, %v538_v53, %v539_v54  ;;  %v416_v2 = vld [vmem:[%s3294_s1 + $0x178] sm:$0xff]  ;;  %v341_v5 = vld [vmem:[#allocation2 + $0x10] sm:$0x3]  ;;  %v481_v6 = vld [vmem:[%s3294_s1 + $0x380] sm:$0xff]  ;;  %v2091_v7 = vpack.c.bf16 %v384_v63, %v383_v62  ;;  %v2125_v12 = vpack.c.bf16 %v450_v4, %v449_v3 }
  0x47   : > { %749 = vmatprep.mubr.f32.mxu0 %v540_v59  ;;  %v482_v8 = vld [vmem:[%s3294_s1 + $0x388] sm:$0xff]  ;;  %v2123_v9 = vpack.c.bf16 %v416_v2, %v415_v0  ;;  %v433_v13 = vld [vmem:[%s3294_s1 + $0x200] sm:$0xff]  ;;  %v541_v15 = vrot.slane %v341_v5, 1  ;;  %v451_v17 = vld [vmem:[%s3294_s1 + $0x290] sm:$0xff]  ;;  %v597_v25 = vsel %vm594_vm1, %v595_v10, %v596_v11  ;;  %v598_v26 = vrot.slane %v341_v5, 2 }
  0x48   : > { %2084 = vmatpush3.bf16.msra.mxu0 %v2083_v41  ;;  %v434_v14 = vld [vmem:[%s3294_s1 + $0x208] sm:$0xff]  ;;  %v2655_v16 = vld [vmem:[#allocation2 + $0x20] sm:$0xff]  ;;  %v2157_v18 = vpack.c.bf16 %v482_v8, %v481_v6  ;;  %v452_v19 = vld [vmem:[%s3294_s1 + $0x298] sm:$0xff] }
  0x49   : > { %2116 = vmatpush3.bf16.msra.mxu1 %v2115_v45  ;;  %2086 = vmatprep.subr.bf16.mxu0 %v2085_v46  ;;  %v465_v20 = vld [vmem:[%s3294_s1 + $0x300] sm:$0xff]  ;;  %v466_v21 = vld [vmem:[%s3294_s1 + $0x308] sm:$0xff]  ;;  %v2127_v22 = vpack.c.bf16 %v434_v14, %v433_v13  ;;  %v483_v23 = vld [vmem:[%s3294_s1 + $0x390] sm:$0xff]  ;;  %v544_v28 = vrot.slane %v2655_v16, 1  ;;  %v542_v30 = vsel %vm537_vm0, %v539_v54, %v541_v15  ;;  %v2129_v31 = vpack.c.bf16 %v452_v19, %v451_v17 }
  0x4a   : > { %2118 = vmatprep.subr.bf16.mxu1 %v2117_v50  ;;  %v484_v24 = vld [vmem:[%s3294_s1 + $0x398] sm:$0xff]  ;;  %v435_v29 = vld [vmem:[%s3294_s1 + $0x210] sm:$0xff]  ;;  %v2685_v33 = vld [vmem:[#allocation2 + $0x28] sm:$0x3]  ;;  %v2159_v35 = vpack.c.bf16 %v466_v21, %v465_v20  ;;  %v601_v41 = vrot.slane %v2655_v16, 2  ;;  %v599_v44 = vsel %vm594_vm1, %v596_v11, %v598_v26 }
  0x4b   : > { %v436_v32 = vld [vmem:[%s3294_s1 + $0x218] sm:$0xff]  ;;  %v453_v34 = vld [vmem:[%s3294_s1 + $0x2a0] sm:$0xff]  ;;  %v454_v36 = vld [vmem:[%s3294_s1 + $0x2a8] sm:$0xff]  ;;  %v2161_v37 = vpack.c.bf16 %v484_v24, %v483_v23  ;;  %v2711_v45 = vsel %vm537_vm0, %v543_v27, %v544_v28 }
  0x4c   : > { %2088 = vmatpush3.bf16.msra.mxu0 %v2087_v58  ;;  %v467_v38 = vld [vmem:[%s3294_s1 + $0x310] sm:$0xff]  ;;  %v468_v39 = vld [vmem:[%s3294_s1 + $0x318] sm:$0xff]  ;;  %v485_v42 = vld [vmem:[%s3294_s1 + $0x3a0] sm:$0xff]  ;;  %v2131_v47 = vpack.c.bf16 %v436_v32, %v435_v29  ;;  %v2133_v51 = vpack.c.bf16 %v454_v36, %v453_v34 }
  0x4d   : > { %2120 = vmatpush3.bf16.msra.mxu1 %v2119_v60  ;;  %2090 = vmatprep.subr.bf16.mxu0 %v2089_v61  ;;  %v486_v43 = vld [vmem:[%s3294_s1 + $0x3a8] sm:$0xff]  ;;  %v2713_v46 = vld [vmem:[#allocation2 + $0x30] sm:$0xff]  ;;  %v2716_v50 = vld [vmem:[#allocation2 + $0x38] sm:$0xff]  ;;  %v2163_v56 = vpack.c.bf16 %v468_v39, %v467_v38  ;;  %v2739_v61 = vsel %vm594_vm1, %v600_v40, %v601_v41 }
  0x4e   : > { %2122 = vmatprep.subr.bf16.mxu1 %v2121_v1  ;;  %v437_v52 = vld [vmem:[%s3294_s1 + $0x220] sm:$0xff]  ;;  %v438_v53 = vld [vmem:[%s3294_s1 + $0x228] sm:$0xff]  ;;  %v455_v54 = vld [vmem:[%s3294_s1 + $0x2b0] sm:$0xff]  ;;  %v2165_v58 = vpack.c.bf16 %v486_v43, %v485_v42  ;;  %v603_v1 = vrot.slane %v2685_v33, 2  ;;  %v549_v2 = vrot.slane %v2716_v50, 1  ;;  %v606_v14 = vrot.slane %v2716_v50, 2 }
  0x4f   : > { %v456_v57 = vld [vmem:[%s3294_s1 + $0x2b8] sm:$0xff]  ;;  %v469_v59 = vld [vmem:[%s3294_s1 + $0x320] sm:$0xff]  ;;  %v470_v60 = vld [vmem:[%s3294_s1 + $0x328] sm:$0xff]  ;;  %v2135_v3 = vpack.c.bf16 %v438_v53, %v437_v52 }
  0x50   : > { %2092 = vmatpush3.bf16.msra.mxu0 %v2091_v7  ;;  %v487_v62 = vld [vmem:[%s3294_s1 + $0x3b0] sm:$0xff]  ;;  %v488_v63 = vld [vmem:[%s3294_s1 + $0x3b8] sm:$0xff]  ;;  %v2754_v4 = vld [vmem:[#allocation2 + $0x40] sm:$0x3]  ;;  %v2137_v5 = vpack.c.bf16 %v456_v57, %v455_v54 }
  0x51   : > { %2124 = vmatpush3.bf16.msra.mxu1 %v2123_v9  ;;  %2126 = vmatprep.subr.bf16.mxu0 %v2125_v12  ;;  %v439_v6 = vld [vmem:[%s3294_s1 + $0x230] sm:$0xff]  ;;  %v440_v7 = vld [vmem:[%s3294_s1 + $0x238] sm:$0xff]  ;;  %v457_v8 = vld [vmem:[%s3294_s1 + $0x2c0] sm:$0xff]  ;;  %v2167_v9 = vpack.c.bf16 %v470_v60, %v469_v59  ;;  %v2169_v11 = vpack.c.bf16 %v488_v63, %v487_v62  ;;  %v551_v21 = vrot.slane %v2754_v4, 1 }
  0x52   : > { %2158 = vmatprep.subr.bf16.mxu1 %v2157_v18  ;;  %v458_v10 = vld [vmem:[%s3294_s1 + $0x2c8] sm:$0xff]  ;;  %v471_v12 = vld [vmem:[%s3294_s1 + $0x330] sm:$0xff]  ;;  %v472_v13 = vld [vmem:[%s3294_s1 + $0x338] sm:$0xff]  ;;  %v2787_v18 = vsel %vm594_vm1, %v601_v41, %v603_v1  ;;  %v2139_v23 = vpack.c.bf16 %v440_v7, %v439_v6 }
  0x53   : > { %750 = vmatmul.mubr.f32.vlgmr.msra.gmra.mrb[0].mxu0 %v2601_v48  ;;  %v546_v48 = vrot.slane %v2685_v33, 1  ;;  %v489_v15 = vld [vmem:[%s3294_s1 + $0x3c0] sm:$0xff]  ;;  %v490_v17 = vld [vmem:[%s3294_s1 + $0x3c8] sm:$0xff]  ;;  %v2141_v24 = vpack.c.bf16 %v458_v10, %v457_v8  ;;  %v459_v27 = vld [vmem:[%s3294_s1 + $0x2d0] sm:$0xff]  ;;  %v2830_v36 = vsel %vm537_vm0, %v549_v2, %v551_v21 }
  0x54   : > { %895 = vmatmul.mubr.f32.vlgmr.msra.gmra.mrb[0].mxu1 %v597_v25  ;;  %2128 = vmatpush3.bf16.msra.mxu0 %v2127_v22  ;;  %v2792_v20 = vld [vmem:[#allocation2 + $0x48] sm:$0xff]  ;;  %v2795_v22 = vld [vmem:[#allocation2 + $0x50] sm:$0xff]  ;;  %v441_v25 = vld [vmem:[%s3294_s1 + $0x240] sm:$0xff] }
  0x55   : > { %754 = vmatprep.mubr.f32.mxu0 %v542_v30  ;;  %899 = vmatprep.mubr.f32.mxu1 %v2655_v16  ;;  %v2750_v0 = vsel %vm537_vm0, %v544_v28, %v546_v48  ;;  %v442_v26 = vld [vmem:[%s3294_s1 + $0x248] sm:$0xff]  ;;  %v2171_v28 = vpack.c.bf16 %v472_v13, %v471_v12  ;;  %v460_v29 = vld [vmem:[%s3294_s1 + $0x2d8] sm:$0xff]  ;;  %v2173_v30 = vpack.c.bf16 %v490_v17, %v489_v15  ;;  %v553_v33 = vrot.slane %v2792_v20, 1  ;;  %v491_v34 = vld [vmem:[%s3294_s1 + $0x3d0] sm:$0xff] }
  0x56   : > { %2130 = vmatprep.subr.bf16.mxu0 %v2129_v31  ;;  %2160 = vmatpush3.bf16.msra.mxu1 %v2159_v35  ;;  %v473_v31 = vld [vmem:[%s3294_s1 + $0x340] sm:$0xff]  ;;  %v474_v32 = vld [vmem:[%s3294_s1 + $0x348] sm:$0xff]  ;;  %v492_v35 = vld [vmem:[%s3294_s1 + $0x3d8] sm:$0xff]  ;;  %v554_v38 = vrot.slane %v2795_v22, 1  ;;  %v2143_v40 = vpack.c.bf16 %v442_v26, %v441_v25  ;;  %v2145_v41 = vpack.c.bf16 %v460_v29, %v459_v27  ;;  %v610_v54 = vrot.slane %v2792_v20, 2 }
  0x57   : > { %755 = vmatmul.mubr.f32.gmra.mrb[2].mxu0 %v2603_v49  ;;  %2162 = vmatprep.subr.bf16.mxu1 %v2161_v37  ;;  %v548_v49 = vrot.slane %v2713_v46, 1  ;;  %v608_v37 = vrot.slane %v2754_v4, 2  ;;  %v2834_v39 = vld [vmem:[#allocation2 + $0x58] sm:$0x3]  ;;  %v443_v42 = vld [vmem:[%s3294_s1 + $0x250] sm:$0xff]  ;;  %v462_v48 = vld [vmem:[%s3294_s1 + $0x2e8] sm:$0xff] }
  0x58   : > { %900 = vmatmul.mubr.f32.gmra.mrb[2].mxu1 %v599_v44  ;;  %759 = vmatprep.mubr.f32.mxu0 %v2711_v45  ;;  %v444_v43 = vld [vmem:[%s3294_s1 + $0x258] sm:$0xff]  ;;  %v461_v44 = vld [vmem:[%s3294_s1 + $0x2e0] sm:$0xff]  ;;  %v475_v52 = vld [vmem:[%s3294_s1 + $0x350] sm:$0xff]  ;;  %v2870_v60 = vsel %vm537_vm0, %v553_v33, %v554_v38  ;;  %v556_v62 = vrot.slane %v2834_v39, 1  ;;  %v613_v15 = vrot.slane %v2834_v39, 2 }
  0x59   : > { %904 = vmatprep.mubr.f32.mxu1 %v2713_v46  ;;  %2132 = vmatpush3.bf16.msra.mxu0 %v2131_v47  ;;  %v2790_v19 = vsel %vm537_vm0, %v548_v49, %v549_v2  ;;  %v2175_v47 = vpack.c.bf16 %v474_v32, %v473_v31  ;;  %v476_v53 = vld [vmem:[%s3294_s1 + $0x358] sm:$0xff]  ;;  %v493_v57 = vld [vmem:[%s3294_s1 + $0x3e0] sm:$0xff]  ;;  %v2867_v59 = vsel %vm594_vm1, %v606_v14, %v608_v37  ;;  %v2875_v63 = vld [vmem:[#allocation2 + $0x68] sm:$0xff] }
  0x5a   : > { %2134 = vmatprep.subr.bf16.mxu0 %v2133_v51  ;;  %2164 = vmatpush3.bf16.msra.mxu1 %v2163_v56  ;;  %v2177_v51 = vpack.c.bf16 %v492_v35, %v491_v34  ;;  %v611_v56 = vrot.slane %v2795_v22, 2  ;;  %v2872_v49 = vld [vmem:[#allocation2 + $0x60] sm:$0xff]  ;;  %v2147_v1 = vpack.c.bf16 %v444_v43, %v443_v42  ;;  %v2149_v2 = vpack.c.bf16 %v462_v48, %v461_v44  ;;  %v446_v4 = vld [vmem:[%s3294_s1 + $0x268] sm:$0xff]  ;;  %v463_v6 = vld [vmem:[%s3294_s1 + $0x2f0] sm:$0xff] }
  0x5b   : > { %760 = vmatmul.mubr.f32.gmra.mrb[4].mxu0 %v2613_v55  ;;  %2166 = vmatprep.subr.bf16.mxu1 %v2165_v58  ;;  %v605_v55 = vrot.slane %v2713_v46, 2  ;;  %v494_v58 = vld [vmem:[%s3294_s1 + $0x3e8] sm:$0xff]  ;;  %v464_v7 = vld [vmem:[%s3294_s1 + $0x2f8] sm:$0xff]  ;;  %v558_v12 = vrot.slane %v2872_v49, 1  ;;  %v495_v13 = vld [vmem:[%s3294_s1 + $0x3f0] sm:$0xff]  ;;  %v559_v17 = vrot.slane %v2875_v63, 1 }
  0x5c   : > { %905 = vmatmul.mubr.f32.gmra.mrb[4].mxu1 %v2739_v61  ;;  %764 = vmatprep.mubr.f32.mxu0 %v2750_v0  ;;  %v2181_v8 = vpack.c.bf16 %v494_v58, %v493_v57  ;;  %v478_v10 = vld [vmem:[%s3294_s1 + $0x368] sm:$0xff]  ;;  %v353_v21 = vld [vmem:[#allocation2 + $0x70] sm:$0x3]  ;;  %v448_v26 = vld [vmem:[%s3294_s1 + $0x278] sm:$0xff]  ;;  %v615_v33 = vrot.slane %v2872_v49, 2  ;;  %v616_v34 = vrot.slane %v2875_v63, 2  ;;  %v2939_v35 = vsel %vm594_vm1, %v611_v56, %v613_v15 }
  0x5d   : > { %909 = vmatprep.mubr.f32.mxu1 %v2716_v50  ;;  %2136 = vmatpush3.bf16.msra.mxu0 %v2135_v3  ;;  %v445_v3 = vld [vmem:[%s3294_s1 + $0x260] sm:$0xff]  ;;  %v447_v25 = vld [vmem:[%s3294_s1 + $0x270] sm:$0xff]  ;;  %v498_v32 = vld [vmem:[%s3294_s1 + $0x408] sm:$0xff]  ;;  %v2942_v37 = vsel %vm537_vm0, %v558_v12, %v559_v17 }
  0x5e   : > { %2138 = vmatprep.subr.bf16.mxu0 %v2137_v5  ;;  %2168 = vmatpush3.bf16.msra.mxu1 %v2167_v9  ;;  %v2179_v5 = vpack.c.bf16 %v476_v53, %v475_v52  ;;  %v477_v9 = vld [vmem:[%s3294_s1 + $0x360] sm:$0xff]  ;;  %v2155_v39 = vpack.c.bf16 %v448_v26, %v447_v25  ;;  %v356_v53 = vld [vmem:[#allocation2 + $0x88] sm:$0x3] }
  0x5f   : > { %765 = vmatmul.mubr.f32.gmra.mrb[6].mxu0 %v2655_v16  ;;  %2170 = vmatprep.subr.bf16.mxu1 %v2169_v11  ;;  %v2819_v16 = vsel %vm594_vm1, %v605_v55, %v606_v14  ;;  %v2899_v11 = vsel %vm594_vm1, %v610_v54, %v611_v56  ;;  %v496_v55 = vld [vmem:[%s3294_s1 + $0x3f8] sm:$0xff]  ;;  %v2910_v14 = vsel %vm537_vm0, %v554_v38, %v556_v62  ;;  %v497_v31 = vld [vmem:[%s3294_s1 + $0x400] sm:$0xff]  ;;  %v561_v38 = vrot.slane %v353_v21, 1  ;;  %v3004_v15 = vld [vmem:[#allocation2 + $0xa8] sm:$0xff] }
  0x60   : > { %910 = vmatmul.mubr.f32.gmra.mrb[6].mxu1 %v2787_v18  ;;  %769 = vmatprep.mubr.f32.mxu0 %v2790_v19  ;;  %v2183_v27 = vpack.c.bf16 %v478_v10, %v477_v9  ;;  %v2185_v29 = vpack.c.bf16 %v496_v55, %v495_v13  ;;  %v2948_v43 = vpack.c.bf16 %v498_v32, %v497_v31  ;;  %v566_v62 = vrot.slane %v356_v53, 1 }
  0x61   : > { %914 = vmatprep.mubr.f32.mxu1 %v2792_v20  ;;  %2140 = vmatpush3.bf16.msra.mxu0 %v2139_v23  ;;  %v2151_v23 = vpack.c.bf16 %v446_v4, %v445_v3  ;;  %v2959_v48 = vsel %vm537_vm0, %v559_v17, %v561_v38  ;;  %v3006_v17 = vld [vmem:[#allocation2 + $0xb0] sm:$0xff] }
  0x62   : > { %2142 = vmatprep.subr.bf16.mxu0 %v2141_v24  ;;  %2172 = vmatpush3.bf16.msra.mxu1 %v2171_v28  ;;  %v2153_v24 = vpack.c.bf16 %v464_v7, %v463_v6  ;;  %v479_v28 = vld [vmem:[%s3294_s1 + $0x370] sm:$0xff]  ;;  %v623_v6 = vrot.slane %v356_v53, 2  ;;  %v574_v26 = vrot.slane %v3006_v17, 1  ;;  %v631_v31 = vrot.slane %v3006_v17, 2 }
  0x63   : > { %770 = vmatmul.mubr.f32.gmra.mrb[8].mxu0 %v2713_v46  ;;  %2174 = vmatprep.subr.bf16.mxu1 %v2173_v30  ;;  %v480_v30 = vld [vmem:[%s3294_s1 + $0x378] sm:$0xff] }
  0x64   : > { %915 = vmatmul.mubr.f32.gmra.mrb[8].mxu1 %v2819_v16  ;;  %774 = vmatprep.mubr.f32.mxu0 %v2830_v36  ;;  %v2187_v42 = vpack.c.bf16 %v480_v30, %v479_v28  ;;  %v630_v28 = vrot.slane %v3004_v15, 2 }
  0x65   : > { %919 = vmatprep.mubr.f32.mxu1 %v2795_v22  ;;  %2144 = vmatpush3.bf16.msra.mxu0 %v2143_v40  ;;  %v2944_v40 = vld [vmem:[#allocation2 + $0x78] sm:$0xff] }
  0x66   : > { %2146 = vmatprep.subr.bf16.mxu0 %v2145_v41  ;;  %2176 = vmatpush3.bf16.msra.mxu1 %v2175_v47  ;;  %v2946_v41 = vld [vmem:[#allocation2 + $0x80] sm:$0xff]  ;;  %v563_v44 = vrot.slane %v2944_v40, 1  ;;  %v2956_v47 = vsel %vm594_vm1, %v615_v33, %v616_v34  ;;  %v620_v54 = vrot.slane %v2944_v40, 2 }
  0x67   : > { %775 = vmatmul.mubr.f32.gmra.mrb[10].mxu0 %v2716_v50  ;;  %2178 = vmatprep.subr.bf16.mxu1 %v2177_v51  ;;  %v618_v51 = vrot.slane %v353_v21, 2  ;;  %v564_v52 = vrot.slane %v2946_v41, 1  ;;  %v621_v58 = vrot.slane %v2946_v41, 2  ;;  %v573_v21 = vrot.slane %v3004_v15, 1  ;;  %v3032_v33 = vld [vmem:[#allocation2 + $0xc0] sm:$0xff] }
  0x68   : > { %920 = vmatmul.mubr.f32.gmra.mrb[10].mxu1 %v2867_v59  ;;  %779 = vmatprep.mubr.f32.mxu0 %v2870_v60 }
  0x69   : > { %924 = vmatprep.mubr.f32.mxu1 %v2872_v49  ;;  %2148 = vmatpush3.bf16.msra.mxu0 %v2147_v1  ;;  %v2970_v56 = vsel %vm594_vm1, %v616_v34, %v618_v51  ;;  %v2973_v57 = vsel %vm537_vm0, %v563_v44, %v564_v52  ;;  %v2976_v1 = vld [vmem:[#allocation2 + $0x90] sm:$0xff]  ;;  %v2986_v4 = vsel %vm594_vm1, %v620_v54, %v621_v58  ;;  %v501_v54 = vld [vmem:[%s3294_s1 + $0x420] sm:$0xff] }
  0x6a   : > { %2150 = vmatprep.subr.bf16.mxu0 %v2149_v2  ;;  %2180 = vmatpush3.bf16.msra.mxu1 %v2179_v5  ;;  %v2978_v2 = vld [vmem:[#allocation2 + $0x98] sm:$0xff]  ;;  %v568_v3 = vrot.slane %v2976_v1, 1  ;;  %v2989_v5 = vsel %vm537_vm0, %v564_v52, %v566_v62  ;;  %v625_v9 = vrot.slane %v2976_v1, 2  ;;  %v2998_v10 = vsel %vm594_vm1, %v621_v58, %v623_v6  ;;  %v499_v51 = vld [vmem:[%s3294_s1 + $0x410] sm:$0xff]  ;;  %v502_v58 = vld [vmem:[%s3294_s1 + $0x428] sm:$0xff] }
  0x6b   : > { %780 = vmatmul.mubr.f32.gmra.mrb[12].mxu0 %v2792_v20  ;;  %2182 = vmatprep.subr.bf16.mxu1 %v2181_v8  ;;  %v569_v7 = vrot.slane %v2978_v2, 1  ;;  %v359_v8 = vld [vmem:[#allocation2 + $0xa0] sm:$0x3]  ;;  %v626_v13 = vrot.slane %v2978_v2, 2  ;;  %v3029_v30 = vsel %vm537_vm0, %v573_v21, %v574_v26  ;;  %v3039_v34 = vsel %vm594_vm1, %v630_v28, %v631_v31  ;;  %v500_v52 = vld [vmem:[%s3294_s1 + $0x418] sm:$0xff] }
  0x6c   : > { %925 = vmatmul.mubr.f32.gmra.mrb[12].mxu1 %v2899_v11  ;;  %784 = vmatprep.mubr.f32.mxu0 %v2910_v14  ;;  %v571_v55 = vrot.slane %v359_v8, 1  ;;  %v628_v25 = vrot.slane %v359_v8, 2  ;;  %v2193_v53 = vpack.c.bf16 %v500_v52, %v499_v51  ;;  %v508_v62 = vld [vmem:[%s3294_s1 + $0x458] sm:$0xff] }
  0x6d   : > { %929 = vmatprep.mubr.f32.mxu1 %v2875_v63  ;;  %2152 = vmatpush3.bf16.msra.mxu0 %v2151_v23  ;;  %v3001_v12 = vsel %vm537_vm0, %v568_v3, %v569_v7  ;;  %v3014_v23 = vsel %vm594_vm1, %v625_v9, %v626_v13  ;;  %v510_v3 = vld [vmem:[%s3294_s1 + $0x468] sm:$0xff]  ;;  %v512_v6 = vld [vmem:[%s3294_s1 + $0x478] sm:$0xff] }
  0x6e   : > { %2154 = vmatprep.subr.bf16.mxu0 %v2153_v24  ;;  %2184 = vmatpush3.bf16.msra.mxu1 %v2183_v27  ;;  %v3017_v24 = vsel %vm537_vm0, %v569_v7, %v571_v55  ;;  %v362_v27 = vld [vmem:[#allocation2 + $0xb8] sm:$0x3]  ;;  %v368_v9 = vld [vmem:[#allocation2 + $0xe8] sm:$0x3] }
  0x6f   : > { %785 = vmatmul.mubr.f32.gmra.mrb[14].mxu0 %v2795_v22  ;;  %2186 = vmatprep.subr.bf16.mxu1 %v2185_v29  ;;  %v3026_v29 = vsel %vm594_vm1, %v626_v13, %v628_v25  ;;  %v576_v32 = vrot.slane %v362_v27, 1 }
  0x70   : > { %930 = vmatmul.mubr.f32.gmra.mrb[14].mxu1 %v2939_v35  ;;  %789 = vmatprep.mubr.f32.mxu0 %v2942_v37 }
  0x71   : > { %934 = vmatprep.mubr.f32.mxu1 %v2944_v40  ;;  %2156 = vmatpush3.bf16.msra.mxu0 %v2155_v39  ;;  %v3042_v38 = vsel %vm537_vm0, %v574_v26, %v576_v32  ;;  %v633_v39 = vrot.slane %v362_v27, 2 }
  0x72   : > { %2188 = vmatpush3.bf16.msra.mxu1 %v2187_v42  ;;  %2190 = vmatprep.subr.bf16.mxu0 %v2948_v43  ;;  %v3044_v42 = vld [vmem:[#allocation2 + $0xc8] sm:$0xff] }
  0x73   : > { %790 = vmatmul.mubr.f32.gmra.mrb[16].mxu0 %v2872_v49  ;;  %2221 = vmatprep.subr.bf16.mxu1 %v2948_v43  ;;  %v3051_v44 = vsel %vm594_vm1, %v631_v31, %v633_v39 }
  0x74   : > { %935 = vmatmul.mubr.f32.gmra.mrb[16].mxu1 %v2956_v47  ;;  %794 = vmatprep.mubr.f32.mxu0 %v2959_v48 }
  0x75   : > { %939 = vmatprep.mubr.f32.mxu1 %v2946_v41 }
  0x77   : > { %795 = vmatmul.mubr.f32.gmra.mrb[18].mxu0 %v2875_v63 }
  0x78   : > { %940 = vmatmul.mubr.f32.gmra.mrb[18].mxu1 %v2970_v56  ;;  %799 = vmatprep.mubr.f32.mxu0 %v2973_v57 }
  0x79   : > { %944 = vmatprep.mubr.f32.mxu1 %v2976_v1 }
  0x7b   : > { %800 = vmatmul.mubr.f32.gmra.mrb[20].mxu0 %v2944_v40 }
  0x7c   : > { %945 = vmatmul.mubr.f32.gmra.mrb[20].mxu1 %v2986_v4  ;;  %804 = vmatprep.mubr.f32.mxu0 %v2989_v5 }
  0x7d   : > { %949 = vmatprep.mubr.f32.mxu1 %v2978_v2 }
  0x7f   : > { %805 = vmatmul.mubr.f32.gmra.mrb[22].mxu0 %v2946_v41 }
  0x80   : > { %950 = vmatmul.mubr.f32.gmra.mrb[22].mxu1 %v2998_v10  ;;  %809 = vmatprep.mubr.f32.mxu0 %v3001_v12 }
  0x81   : > { %954 = vmatprep.mubr.f32.mxu1 %v3004_v15 }
  0x83   : > { %810 = vmatmul.mubr.f32.gmra.mrb[24].mxu0 %v2976_v1 }
  0x84   : > { %955 = vmatmul.mubr.f32.gmra.mrb[24].mxu1 %v3014_v23  ;;  %814 = vmatprep.mubr.f32.mxu0 %v3017_v24 }
  0x85   : > { %959 = vmatprep.mubr.f32.mxu1 %v3006_v17 }
  0x87   : > { %815 = vmatmul.mubr.f32.gmra.mrb[26].mxu0 %v2978_v2 }
  0x88   : > { %960 = vmatmul.mubr.f32.gmra.mrb[26].mxu1 %v3026_v29  ;;  %819 = vmatprep.mubr.f32.mxu0 %v3029_v30 }
  0x89   : > { %964 = vmatprep.mubr.f32.mxu1 %v3032_v33 }
  0x8b   : > { %820 = vmatmul.mubr.f32.gmra.mrb[28].mxu0 %v3004_v15 }
  0x8c   : > { %965 = vmatmul.mubr.f32.gmra.mrb[28].mxu1 %v3039_v34  ;;  %824 = vmatprep.mubr.f32.mxu0 %v3042_v38 }
  0x8d   : > { %969 = vmatprep.mubr.f32.mxu1 %v3044_v42 }
  0x8f   : > { %825 = vmatmul.mubr.f32.gmra.mrb[30].mxu0 %v3006_v17 }
  0x90   : > { %970 = vmatmul.mubr.f32.gmra.mrb[30].mxu1 %v3051_v44  ;;  %1039 = vmatprep.mubr.f32.mxu0 %v2739_v61  ;;  %v2197_v61 = vpack.c.bf16 %v502_v58, %v501_v54 }
  0x91   : > { %1184 = vmatprep.mubr.f32.mxu1 %v2790_v19 }
  0x93   : > { %1040 = vmatmul.mubr.f32.vlgmr.msra.gmra.mrb[32].mxu0 %v2711_v45  ;;  %v503_v45 = vld [vmem:[%s3294_s1 + $0x430] sm:$0xff] }
  0x94   : > { %1185 = vmatmul.mubr.f32.vlgmr.msra.gmra.mrb[32].mxu1 %v2713_v46  ;;  %2192 = vmatpush3.bf16.msra.mxu0 %v2948_v43  ;;  %v504_v46 = vld [vmem:[%s3294_s1 + $0x438] sm:$0xff] }
  0x95   : > { %1044 = vmatprep.mubr.f32.mxu0 %v2787_v18  ;;  %1189 = vmatprep.mubr.f32.mxu1 %v2830_v36  ;;  %v2201_v18 = vpack.c.bf16 %v504_v46, %v503_v45 }
  0x96   : > { %2194 = vmatprep.subr.bf16.mxu0 %v2193_v53  ;;  %2229 = vmatpush3.bf16.msra.mxu1 %v2948_v43  ;;  %v506_v43 = vld [vmem:[%s3294_s1 + $0x448] sm:$0xff] }
  0x97   : > { %1045 = vmatmul.mubr.f32.gmra.mrb[34].mxu0 %v2750_v0  ;;  %2222 = vmatprep.subr.bf16.mxu1 %v2193_v53  ;;  %v505_v0 = vld [vmem:[%s3294_s1 + $0x440] sm:$0xff] }
  0x98   : > { %1190 = vmatmul.mubr.f32.gmra.mrb[34].mxu1 %v2716_v50  ;;  %1049 = vmatprep.mubr.f32.mxu0 %v2819_v16  ;;  %v2205_v50 = vpack.c.bf16 %v506_v43, %v505_v0 }
  0x99   : > { %1194 = vmatprep.mubr.f32.mxu1 %v2870_v60  ;;  %2196 = vmatpush3.bf16.msra.mxu0 %v2193_v53 }
  0x9a   : > { %2198 = vmatprep.subr.bf16.mxu0 %v2197_v61  ;;  %2230 = vmatpush3.bf16.msra.mxu1 %v2193_v53 }
  0x9b   : > { %1050 = vmatmul.mubr.f32.gmra.mrb[36].mxu0 %v2790_v19  ;;  %2223 = vmatprep.subr.bf16.mxu1 %v2197_v61  ;;  %v507_v19 = vld [vmem:[%s3294_s1 + $0x450] sm:$0xff] }
  0x9c   : > { %1195 = vmatmul.mubr.f32.gmra.mrb[36].mxu1 %v2792_v20  ;;  %1054 = vmatprep.mubr.f32.mxu0 %v2867_v59  ;;  %v2209_v20 = vpack.c.bf16 %v508_v62, %v507_v19 }
  0x9d   : > { %1199 = vmatprep.mubr.f32.mxu1 %v2910_v14  ;;  %2200 = vmatpush3.bf16.msra.mxu0 %v2197_v61 }
  0x9e   : > { %2202 = vmatprep.subr.bf16.mxu0 %v2201_v18  ;;  %2231 = vmatpush3.bf16.msra.mxu1 %v2197_v61 }
  0x9f   : > { %1055 = vmatmul.mubr.f32.gmra.mrb[38].mxu0 %v2830_v36  ;;  %2224 = vmatprep.subr.bf16.mxu1 %v2201_v18  ;;  %v509_v36 = vld [vmem:[%s3294_s1 + $0x460] sm:$0xff] }
  0xa0   : > { %1200 = vmatmul.mubr.f32.gmra.mrb[38].mxu1 %v2795_v22  ;;  %1059 = vmatprep.mubr.f32.mxu0 %v2899_v11  ;;  %v2213_v22 = vpack.c.bf16 %v510_v3, %v509_v36 }
  0xa1   : > { %1204 = vmatprep.mubr.f32.mxu1 %v2942_v37  ;;  %2204 = vmatpush3.bf16.msra.mxu0 %v2201_v18 }
  0xa2   : > { %2206 = vmatprep.subr.bf16.mxu0 %v2205_v50  ;;  %2232 = vmatpush3.bf16.msra.mxu1 %v2201_v18 }
  0xa3   : > { %1060 = vmatmul.mubr.f32.gmra.mrb[40].mxu0 %v2870_v60  ;;  %2225 = vmatprep.subr.bf16.mxu1 %v2205_v50  ;;  %v511_v60 = vld [vmem:[%s3294_s1 + $0x470] sm:$0xff] }
  0xa4   : > { %1205 = vmatmul.mubr.f32.gmra.mrb[40].mxu1 %v2872_v49  ;;  %1064 = vmatprep.mubr.f32.mxu0 %v2939_v35  ;;  %v2217_v49 = vpack.c.bf16 %v512_v6, %v511_v60 }
  0xa5   : > { %1209 = vmatprep.mubr.f32.mxu1 %v2959_v48  ;;  %2208 = vmatpush3.bf16.msra.mxu0 %v2205_v50 }
  0xa6   : > { %2210 = vmatprep.subr.bf16.mxu0 %v2209_v20  ;;  %2233 = vmatpush3.bf16.msra.mxu1 %v2205_v50 }
  0xa7   : > { %1065 = vmatmul.mubr.f32.gmra.mrb[42].mxu0 %v2910_v14  ;;  %2226 = vmatprep.subr.bf16.mxu1 %v2209_v20  ;;  %v655_v14 = vrot.slane %v3044_v42, 1 }
  0xa8   : > { %1210 = vmatmul.mubr.f32.gmra.mrb[42].mxu1 %v2875_v63  ;;  %1069 = vmatprep.mubr.f32.mxu0 %v2956_v47  ;;  %v654_v63 = vrot.slane %v3032_v33, 1 }
  0xa9   : > { %1214 = vmatprep.mubr.f32.mxu1 %v2973_v57  ;;  %2212 = vmatpush3.bf16.msra.mxu0 %v2209_v20 }
  0xaa   : > { %2214 = vmatprep.subr.bf16.mxu0 %v2213_v22  ;;  %2234 = vmatpush3.bf16.msra.mxu1 %v2209_v20 }
  0xab   : > { %1070 = vmatmul.mubr.f32.gmra.mrb[44].mxu0 %v2942_v37  ;;  %2227 = vmatprep.subr.bf16.mxu1 %v2213_v22  ;;  %v365_v37 = vld [vmem:[#allocation2 + $0xd0] sm:$0x3] }
  0xac   : > { %1215 = vmatmul.mubr.f32.gmra.mrb[44].mxu1 %v2944_v40  ;;  %1074 = vmatprep.mubr.f32.mxu0 %v2970_v56  ;;  %v656_v40 = vsel %vm537_vm0, %v654_v63, %v655_v14  ;;  %v664_v13 = vrot.slane %v365_v37, 2 }
  0xad   : > { %1219 = vmatprep.mubr.f32.mxu1 %v2989_v5  ;;  %2216 = vmatpush3.bf16.msra.mxu0 %v2213_v22 }
  0xae   : > { %2218 = vmatprep.subr.bf16.mxu0 %v2217_v49  ;;  %2235 = vmatpush3.bf16.msra.mxu1 %v2213_v22 }
  0xaf   : > { %1075 = vmatmul.mubr.f32.gmra.mrb[46].mxu0 %v2959_v48  ;;  %2228 = vmatprep.subr.bf16.mxu1 %v2217_v49  ;;  %v366_v48 = vld [vmem:[#allocation2 + $0xd8] sm:$0xff] }
  0xb0   : > { %1220 = vmatmul.mubr.f32.gmra.mrb[46].mxu1 %v2946_v41  ;;  %1079 = vmatprep.mubr.f32.mxu0 %v2986_v4  ;;  %v657_v41 = vrot.slane %v365_v37, 1  ;;  %v671_v7 = vrot.slane %v366_v48, 1 }
  0xb1   : > { %1224 = vmatprep.mubr.f32.mxu1 %v3001_v12  ;;  %2220 = vmatpush3.bf16.msra.mxu0 %v2217_v49 }
  0xb2   : > { %2236 = vmatpush3.bf16.msra.mxu1 %v2217_v49 }
  0xb3   : > { %1080 = vmatmul.mubr.f32.gmra.mrb[48].mxu0 %v2973_v57  ;;  %v367_v57 = vld [vmem:[#allocation2 + $0xe0] sm:$0xff] }
  0xb4   : > { %1225 = vmatmul.mubr.f32.gmra.mrb[48].mxu1 %v2976_v1  ;;  %1084 = vmatprep.mubr.f32.mxu0 %v2998_v10  ;;  %v661_v1 = vrot.slane %v3032_v33, 2  ;;  %v672_v8 = vrot.slane %v367_v57, 1  ;;  %v679_v25 = vrot.slane %v367_v57, 2 }
  0xb5   : > { %1229 = vmatprep.mubr.f32.mxu1 %v3017_v24 }
  0xb6   : > { %v673_v55 = vsel %vm537_vm0, %v671_v7, %v672_v8 }
  0xb7   : > { %1085 = vmatmul.mubr.f32.gmra.mrb[50].mxu0 %v2989_v5  ;;  %v658_v5 = vsel %vm537_vm0, %v655_v14, %v657_v41 }
  0xb8   : > { %1230 = vmatmul.mubr.f32.gmra.mrb[50].mxu1 %v2978_v2  ;;  %1089 = vmatprep.mubr.f32.mxu0 %v3014_v23  ;;  %v662_v2 = vrot.slane %v3044_v42, 2 }
  0xb9   : > { %1234 = vmatprep.mubr.f32.mxu1 %v3029_v30 }
  0xbb   : > { %1090 = vmatmul.mubr.f32.gmra.mrb[52].mxu0 %v3001_v12  ;;  %v663_v12 = vsel %vm594_vm1, %v661_v1, %v662_v2 }
  0xbc   : > { %1235 = vmatmul.mubr.f32.gmra.mrb[52].mxu1 %v3004_v15  ;;  %1094 = vmatprep.mubr.f32.mxu0 %v3026_v29  ;;  %v674_v15 = vrot.slane %v368_v9, 1 }
  0xbd   : > { %1239 = vmatprep.mubr.f32.mxu1 %v3042_v38 }
  0xbe   : > { %v675_v21 = vsel %vm537_vm0, %v672_v8, %v674_v15 }
  0xbf   : > { %1095 = vmatmul.mubr.f32.gmra.mrb[54].mxu0 %v3017_v24  ;;  %v678_v24 = vrot.slane %v366_v48, 2 }
  0xc0   : > { %1240 = vmatmul.mubr.f32.gmra.mrb[54].mxu1 %v3006_v17  ;;  %1099 = vmatprep.mubr.f32.mxu0 %v3039_v34  ;;  %v665_v17 = vsel %vm594_vm1, %v662_v2, %v664_v13 }
  0xc1   : > { %1244 = vmatprep.mubr.f32.mxu1 %v656_v40 }
  0xc3   : > { %1100 = vmatmul.mubr.f32.gmra.mrb[56].mxu0 %v3029_v30 }
  0xc4   : > { %1245 = vmatmul.mubr.f32.gmra.mrb[56].mxu1 %v3032_v33  ;;  %1104 = vmatprep.mubr.f32.mxu0 %v3051_v44 }
  0xc5   : > { %1249 = vmatprep.mubr.f32.mxu1 %v658_v5 }
  0xc7   : > { %1105 = vmatmul.mubr.f32.gmra.mrb[58].mxu0 %v3042_v38 }
  0xc8   : > { %1250 = vmatmul.mubr.f32.gmra.mrb[58].mxu1 %v3044_v42  ;;  %1109 = vmatprep.mubr.f32.mxu0 %v663_v12 }
  0xc9   : > { %1254 = vmatprep.mubr.f32.mxu1 %v673_v55 }
  0xcb   : > { %1110 = vmatmul.mubr.f32.gmra.mrb[60].mxu0 %v656_v40 }
  0xcc   : > { %1255 = vmatmul.mubr.f32.gmra.mrb[60].mxu1 %v366_v48  ;;  %1114 = vmatprep.mubr.f32.mxu0 %v665_v17 }
  0xcd   : > { %1259 = vmatprep.mubr.f32.mxu1 %v675_v21 }
  0xcf   : > { %1115 = vmatmul.mubr.f32.gmra.mrb[62].mxu0 %v658_v5 }
  0xd0   : > { %1260 = vmatmul.mubr.f32.gmra.mrb[62].mxu1 %v367_v57  ;;  %2037 = vmatprep.mubr.f32.mxu0 %v2819_v16  ;;  %v681_v16 = vrot.slane %v368_v9, 2 }
  0xd1   : > { %2049 = vmatprep.mubr.f32.mxu1 %v3014_v23  ;;  %v680_v23 = vsel %vm594_vm1, %v678_v24, %v679_v25 }
  0xd3   : > { %2038 = vmatmul.mubr.f32.vlgmr.msra.gmra.mrb[64].mxu0 %v2867_v59  ;;  %v682_v59 = vsel %vm594_vm1, %v679_v25, %v681_v16 }
  0xd4   : > { %2050 = vmatmul.mubr.f32.vlgmr.msra.gmra.mrb[64].mxu1 %v3026_v29  ;;  %2040 = vmatprep.mubr.f32.mxu0 %v2899_v11 }
  0xd5   : > { %2052 = vmatprep.mubr.f32.mxu1 %v3039_v34 }
  0xd7   : > { %2041 = vmatmul.mubr.f32.gmra.mrb[66].mxu0 %v2939_v35 }
  0xd8   : > { %2053 = vmatmul.mubr.f32.gmra.mrb[66].mxu1 %v3051_v44  ;;  %2043 = vmatprep.mubr.f32.mxu0 %v2956_v47 }
  0xd9   : > { %2055 = vmatprep.mubr.f32.mxu1 %v663_v12 }
  0xdb   : > { %2044 = vmatmul.mubr.f32.gmra.mrb[68].mxu0 %v2970_v56 }
  0xdc   : > { %2056 = vmatmul.mubr.f32.gmra.mrb[68].mxu1 %v665_v17  ;;  %2046 = vmatprep.mubr.f32.mxu0 %v2986_v4 }
  0xdd   : > { %2058 = vmatprep.mubr.f32.mxu1 %v680_v23 }
  0xdf   : > { %2047 = vmatmul.mubr.f32.gmra.mrb[70].mxu0 %v2998_v10 }
  0xe0   : > { %2059 = vmatmul.mubr.f32.gmra.mrb[70].mxu1 %v682_v59 }
 0x126   : > { %v1685_v11 = vpop.f32.mrb[0].mxu0 }
 0x127   : > { %v1765_v35 = vpop.f32.mrb[0].mxu1  ;;  %v1686_v26 = vpop.f32.mrb[1].mxu0 }
 0x128   : > { %v1687_v27 = vadd.f32 %v1686_v26, %v1685_v11  ;;  %v1766_v47 = vpop.f32.mrb[1].mxu1 }
 0x129   : > { %v1767_v28 = vadd.f32 %v1766_v47, %v1765_v35 }
 0x12a   : > { %v1688_v29 = vpop.f32.mrb[2].mxu0 }
 0x12b   : > { %v3177_v30 = vadd.f32 %v1767_v28, %v1687_v27  ;;  %v1768_v31 = vpop.f32.mrb[2].mxu1  ;;  %v1689_v56 = vpop.f32.mrb[3].mxu0 }
 0x12c   : > { %v1690_v32 = vadd.f32 %v1689_v56, %v1688_v29  ;;  %v1769_v33 = vpop.f32.mrb[3].mxu1 }
 0x12d   : > { %v1770_v4 = vadd.f32 %v1769_v33, %v1768_v31 }
 0x12e   : > { %v1691_v34 = vpop.f32.mrb[4].mxu0 }
 0x12f   : > { %v3179_v38 = vadd.f32 %v1770_v4, %v1690_v32  ;;  %v1771_v39 = vpop.f32.mrb[4].mxu1  ;;  %v1692_v10 = vpop.f32.mrb[5].mxu0 }
 0x130   : > { %v1693_v42 = vadd.f32 %v1692_v10, %v1691_v34  ;;  %v1772_v44 = vpop.f32.mrb[5].mxu1 }
 0x131   : > { %v1773_v51 = vadd.f32 %v1772_v44, %v1771_v39 }
 0x132   : > { %v1694_v52 = vpop.f32.mrb[6].mxu0 }
 0x133   : > { %v3181_v53 = vadd.f32 %v1773_v51, %v1693_v42  ;;  %v1774_v54 = vpop.f32.mrb[6].mxu1  ;;  %v1695_v58 = vpop.f32.mrb[7].mxu0 }
 0x134   : > { %v1696_v61 = vadd.f32 %v1695_v58, %v1694_v52  ;;  %v1775_v45 = vpop.f32.mrb[7].mxu1 }
 0x135   : > { %v1776_v46 = vadd.f32 %v1775_v45, %v1774_v54 }
 0x136   : > { %v1697_v18 = vpop.f32.mrb[8].mxu0 }
 0x137   : > { %v3183_v0 = vadd.f32 %v1776_v46, %v1696_v61  ;;  %v1777_v43 = vpop.f32.mrb[8].mxu1  ;;  %v1698_v50 = vpop.f32.mrb[9].mxu0 }
 0x138   : > { %v1699_v19 = vadd.f32 %v1698_v50, %v1697_v18  ;;  %v1778_v62 = vpop.f32.mrb[9].mxu1 }
 0x139   : > { %v1779_v20 = vadd.f32 %v1778_v62, %v1777_v43 }
 0x13a   : > { %v1700_v36 = vpop.f32.mrb[10].mxu0 }
 0x13b   : > { %v3185_v3 = vadd.f32 %v1779_v20, %v1699_v19  ;;  %v1780_v22 = vpop.f32.mrb[10].mxu1  ;;  %v1701_v60 = vpop.f32.mrb[11].mxu0 }
 0x13c   : > { %v1702_v6 = vadd.f32 %v1701_v60, %v1700_v36  ;;  %v1781_v49 = vpop.f32.mrb[11].mxu1 }
 0x13d   : > { %v1782_v63 = vadd.f32 %v1781_v49, %v1780_v22 }
 0x13e   : > { %v1703_v14 = vpop.f32.mrb[12].mxu0 }
 0x13f   : > { %v3187_v37 = vadd.f32 %v1782_v63, %v1702_v6  ;;  %v1783_v40 = vpop.f32.mrb[12].mxu1  ;;  %v1704_v41 = vpop.f32.mrb[13].mxu0 }
 0x140   : > { %v1705_v48 = vadd.f32 %v1704_v41, %v1703_v14  ;;  %v1784_v57 = vpop.f32.mrb[13].mxu1 }
 0x141   : > { %v1785_v1 = vadd.f32 %v1784_v57, %v1783_v40 }
 0x142   : > { %v1706_v2 = vpop.f32.mrb[14].mxu0 }
 0x143   : > { %v3189_v5 = vadd.f32 %v1785_v1, %v1705_v48  ;;  %v1786_v7 = vpop.f32.mrb[14].mxu1  ;;  %v1707_v8 = vpop.f32.mrb[15].mxu0 }
 0x144   : > { %v1708_v9 = vadd.f32 %v1707_v8, %v1706_v2  ;;  %v1787_v12 = vpop.f32.mrb[15].mxu1 }
 0x145   : > { %v1788_v13 = vadd.f32 %v1787_v12, %v1786_v7 }
 0x146   : > { %v1709_v55 = vpop.f32.mrb[16].mxu0 }
 0x147   : > { %v3191_v15 = vadd.f32 %v1788_v13, %v1708_v9  ;;  %v1789_v17 = vpop.f32.mrb[16].mxu1  ;;  %v1710_v21 = vpop.f32.mrb[17].mxu0 }
 0x148   : > { %v1711_v24 = vadd.f32 %v1710_v21, %v1709_v55  ;;  %v1790_v25 = vpop.f32.mrb[17].mxu1 }
 0x149   : > { %v1791_v16 = vadd.f32 %v1790_v25, %v1789_v17 }
 0x14a   : > { %v1712_v23 = vpop.f32.mrb[18].mxu0 }
 0x14b   : > { %v3193_v59 = vadd.f32 %v1791_v16, %v1711_v24  ;;  %v1792_v11 = vpop.f32.mrb[18].mxu1  ;;  %v1713_v35 = vpop.f32.mrb[19].mxu0 }
 0x14c   : > { %v1714_v26 = vadd.f32 %v1713_v35, %v1712_v23  ;;  %v1793_v27 = vpop.f32.mrb[19].mxu1 }
 0x14d   : > { %v1794_v47 = vadd.f32 %v1793_v27, %v1792_v11 }
 0x14e   : > { %v1715_v28 = vpop.f32.mrb[20].mxu0 }
 0x14f   : > { %v3195_v29 = vadd.f32 %v1794_v47, %v1714_v26  ;;  %v1795_v31 = vpop.f32.mrb[20].mxu1  ;;  %v1716_v56 = vpop.f32.mrb[21].mxu0 }
 0x150   : > { %v1717_v32 = vadd.f32 %v1716_v56, %v1715_v28  ;;  %v1796_v33 = vpop.f32.mrb[21].mxu1 }
 0x151   : > { %v1797_v4 = vadd.f32 %v1796_v33, %v1795_v31 }
 0x152   : > { %v1718_v34 = vpop.f32.mrb[22].mxu0 }
 0x153   : > { %v3197_v39 = vadd.f32 %v1797_v4, %v1717_v32  ;;  %v1798_v10 = vpop.f32.mrb[22].mxu1  ;;  %v1719_v42 = vpop.f32.mrb[23].mxu0 }
 0x154   : > { %v1720_v44 = vadd.f32 %v1719_v42, %v1718_v34  ;;  %v1799_v51 = vpop.f32.mrb[23].mxu1 }
 0x155   : > { %v1800_v52 = vadd.f32 %v1799_v51, %v1798_v10 }
 0x156   : > { %v1721_v54 = vpop.f32.mrb[24].mxu0 }
 0x157   : > { %v3199_v58 = vadd.f32 %v1800_v52, %v1720_v44  ;;  %v1801_v61 = vpop.f32.mrb[24].mxu1  ;;  %v1722_v45 = vpop.f32.mrb[25].mxu0 }
 0x158   : > { %v1723_v46 = vadd.f32 %v1722_v45, %v1721_v54  ;;  %v1802_v18 = vpop.f32.mrb[25].mxu1 }
 0x159   : > { %v1803_v43 = vadd.f32 %v1802_v18, %v1801_v61 }
 0x15a   : > { %v1724_v50 = vpop.f32.mrb[26].mxu0 }
 0x15b   : > { %v3201_v19 = vadd.f32 %v1803_v43, %v1723_v46  ;;  %v1804_v62 = vpop.f32.mrb[26].mxu1  ;;  %v1725_v20 = vpop.f32.mrb[27].mxu0 }
 0x15c   : > { %v1726_v36 = vadd.f32 %v1725_v20, %v1724_v50  ;;  %v1805_v22 = vpop.f32.mrb[27].mxu1 }
 0x15d   : > { %v1806_v60 = vadd.f32 %v1805_v22, %v1804_v62 }
 0x15e   : > { %v1727_v6 = vpop.f32.mrb[28].mxu0 }
 0x15f   : > { %v3203_v49 = vadd.f32 %v1806_v60, %v1726_v36  ;;  %v1807_v63 = vpop.f32.mrb[28].mxu1  ;;  %v1728_v14 = vpop.f32.mrb[29].mxu0 }
 0x160   : > { %v1729_v40 = vadd.f32 %v1728_v14, %v1727_v6  ;;  %v1808_v41 = vpop.f32.mrb[29].mxu1 }
 0x161   : > { %v1809_v48 = vadd.f32 %v1808_v41, %v1807_v63 }
 0x162   : > { %v1730_v57 = vpop.f32.mrb[30].mxu0 }
 0x163   : > { %v3205_v1 = vadd.f32 %v1809_v48, %v1729_v40  ;;  %v1810_v2 = vpop.f32.mrb[30].mxu1  ;;  %v1731_v7 = vpop.f32.mrb[31].mxu0 }
 0x164   : > { %v1732_v8 = vadd.f32 %v1731_v7, %v1730_v57  ;;  %v1811_v9 = vpop.f32.mrb[31].mxu1 }
 0x165   : > { %v1812_v12 = vadd.f32 %v1811_v9, %v1810_v2 }
 0x166   : > { %v1845_v13 = vpop.f32.mrb[32].mxu0 }
 0x167   : > { %v3207_v55 = vadd.f32 %v1812_v12, %v1732_v8  ;;  %v1846_v17 = vpop.f32.mrb[33].mxu0  ;;  %v1925_v21 = vpop.f32.mrb[32].mxu1 }
 0x168   : > { %v1847_v24 = vadd.f32 %v1846_v17, %v1845_v13  ;;  %v1926_v25 = vpop.f32.mrb[33].mxu1 }
 0x169   : > { %v1927_v16 = vadd.f32 %v1926_v25, %v1925_v21 }
 0x16a   : > { %v1042_v23 = vadd.f32 %v1847_v24, %v3177_v30  ;;  %v1848_v11 = vpop.f32.mrb[34].mxu0 }
 0x16b   : > { %v1849_v35 = vpop.f32.mrb[35].mxu0  ;;  %v1928_v26 = vpop.f32.mrb[34].mxu1 }
 0x16c   : > { %v1850_v27 = vadd.f32 %v1849_v35, %v1848_v11  ;;  %v1929_v47 = vpop.f32.mrb[35].mxu1  ;;  %v3210_v28 = vadd.f32 %v1927_v16, %v1042_v23 }
 0x16d   : > { %v1930_v31 = vadd.f32 %v1929_v47, %v1928_v26 }
 0x16e   : > { %v1047_v56 = vadd.f32 %v1850_v27, %v3179_v38  ;;  %v1851_v32 = vpop.f32.mrb[36].mxu0 }
 0x16f   : > { %v1852_v33 = vpop.f32.mrb[37].mxu0  ;;  %v1931_v4 = vpop.f32.mrb[36].mxu1 }
 0x170   : > { %v1853_v34 = vadd.f32 %v1852_v33, %v1851_v32  ;;  %v1932_v10 = vpop.f32.mrb[37].mxu1  ;;  %v3213_v42 = vadd.f32 %v1930_v31, %v1047_v56 }
 0x171   : > { %v1933_v44 = vadd.f32 %v1932_v10, %v1931_v4 }
 0x172   : > { %v1052_v30 = vadd.f32 %v1853_v34, %v3181_v53  ;;  %v1854_v51 = vpop.f32.mrb[38].mxu0 }
 0x173   : > { %v1855_v52 = vpop.f32.mrb[39].mxu0  ;;  %v1934_v54 = vpop.f32.mrb[38].mxu1 }
 0x174   : > { %v1856_v61 = vadd.f32 %v1855_v52, %v1854_v51  ;;  %v1935_v45 = vpop.f32.mrb[39].mxu1  ;;  %v3216_v46 = vadd.f32 %v1933_v44, %v1052_v30 }
 0x175   : > { %v1936_v18 = vadd.f32 %v1935_v45, %v1934_v54 }
 0x176   : > { %v1057_v38 = vadd.f32 %v1856_v61, %v3183_v0  ;;  %v1857_v43 = vpop.f32.mrb[40].mxu0 }
 0x177   : > { %v1858_v50 = vpop.f32.mrb[41].mxu0  ;;  %v1937_v62 = vpop.f32.mrb[40].mxu1 }
 0x178   : > { %v1859_v20 = vadd.f32 %v1858_v50, %v1857_v43  ;;  %v1938_v36 = vpop.f32.mrb[41].mxu1  ;;  %v3219_v22 = vadd.f32 %v1936_v18, %v1057_v38 }
 0x179   : > { %v1939_v60 = vadd.f32 %v1938_v36, %v1937_v62 }
 0x17a   : > { %v1062_v53 = vadd.f32 %v1859_v20, %v3185_v3  ;;  %v1860_v6 = vpop.f32.mrb[42].mxu0 }
 0x17b   : > { %v1861_v63 = vpop.f32.mrb[43].mxu0  ;;  %v1940_v14 = vpop.f32.mrb[42].mxu1 }
 0x17c   : > { %v1862_v40 = vadd.f32 %v1861_v63, %v1860_v6  ;;  %v1941_v41 = vpop.f32.mrb[43].mxu1  ;;  %v3222_v48 = vadd.f32 %v1939_v60, %v1062_v53 }
 0x17d   : > { %v1942_v57 = vadd.f32 %v1941_v41, %v1940_v14 }
 0x17e   : > { %v1067_v0 = vadd.f32 %v1862_v40, %v3187_v37  ;;  %v1863_v2 = vpop.f32.mrb[44].mxu0 }
 0x17f   : > { %v1864_v7 = vpop.f32.mrb[45].mxu0  ;;  %v1943_v8 = vpop.f32.mrb[44].mxu1 }
 0x180   : > { %v1865_v9 = vadd.f32 %v1864_v7, %v1863_v2  ;;  %v1944_v12 = vpop.f32.mrb[45].mxu1  ;;  %v3225_v13 = vadd.f32 %v1942_v57, %v1067_v0 }
 0x181   : > { %v1945_v17 = vadd.f32 %v1944_v12, %v1943_v8 }
 0x182   : > { %v1072_v3 = vadd.f32 %v1865_v9, %v3189_v5  ;;  %v1866_v21 = vpop.f32.mrb[46].mxu0 }
 0x183   : > { %v1867_v24 = vpop.f32.mrb[47].mxu0  ;;  %v1946_v25 = vpop.f32.mrb[46].mxu1 }
 0x184   : > { %v1868_v16 = vadd.f32 %v1867_v24, %v1866_v21  ;;  %v1947_v23 = vpop.f32.mrb[47].mxu1  ;;  %v3228_v11 = vadd.f32 %v1945_v17, %v1072_v3 }
 0x185   : > { %v1948_v35 = vadd.f32 %v1947_v23, %v1946_v25 }
 0x186   : > { %v1077_v37 = vadd.f32 %v1868_v16, %v3191_v15  ;;  %v1869_v26 = vpop.f32.mrb[48].mxu0 }
 0x187   : > { %v1870_v27 = vpop.f32.mrb[49].mxu0  ;;  %v1949_v47 = vpop.f32.mrb[48].mxu1 }
 0x188   : > { %v1871_v31 = vadd.f32 %v1870_v27, %v1869_v26  ;;  %v1950_v56 = vpop.f32.mrb[49].mxu1  ;;  %v3231_v32 = vadd.f32 %v1948_v35, %v1077_v37 }
 0x189   : > { %v1951_v33 = vadd.f32 %v1950_v56, %v1949_v47 }
 0x18a   : > { %v1082_v5 = vadd.f32 %v1871_v31, %v3193_v59  ;;  %v1872_v4 = vpop.f32.mrb[50].mxu0 }
 0x18b   : > { %v1873_v34 = vpop.f32.mrb[51].mxu0  ;;  %v1952_v10 = vpop.f32.mrb[50].mxu1 }
 0x18c   : > { %v1874_v44 = vadd.f32 %v1873_v34, %v1872_v4  ;;  %v1953_v30 = vpop.f32.mrb[51].mxu1  ;;  %v1227_v51 = vadd.f32 %v1951_v33, %v1082_v5 }
 0x18d   : > { %v1954_v52 = vadd.f32 %v1953_v30, %v1952_v10 }
 0x18e   : > { %v1087_v54 = vadd.f32 %v1874_v44, %v3195_v29  ;;  %v1875_v15 = vpop.f32.mrb[52].mxu0 }
 0x18f   : > { %v1876_v61 = vpop.f32.mrb[53].mxu0  ;;  %v1955_v45 = vpop.f32.mrb[52].mxu1 }
 0x190   : > { %v1877_v18 = vadd.f32 %v1876_v61, %v1875_v15  ;;  %v1956_v38 = vpop.f32.mrb[53].mxu1  ;;  %v1232_v43 = vadd.f32 %v1954_v52, %v1087_v54 }
 0x191   : > { %v1957_v50 = vadd.f32 %v1956_v38, %v1955_v45 }
 0x192   : > { %v1092_v62 = vadd.f32 %v1877_v18, %v3197_v39  ;;  %v1878_v20 = vpop.f32.mrb[54].mxu0 }
 0x193   : > { %v1879_v59 = vpop.f32.mrb[55].mxu0  ;;  %v1958_v36 = vpop.f32.mrb[54].mxu1 }
 0x194   : > { %v1880_v60 = vadd.f32 %v1879_v59, %v1878_v20  ;;  %v1959_v53 = vpop.f32.mrb[55].mxu1  ;;  %v1237_v6 = vadd.f32 %v1957_v50, %v1092_v62 }
 0x195   : > { %v1960_v63 = vadd.f32 %v1959_v53, %v1958_v36 }
 0x196   : > { %v1097_v14 = vadd.f32 %v1880_v60, %v3199_v58  ;;  %v1881_v40 = vpop.f32.mrb[56].mxu0 }
 0x197   : > { %v1882_v29 = vpop.f32.mrb[57].mxu0  ;;  %v1961_v41 = vpop.f32.mrb[56].mxu1 }
 0x198   : > { %v1883_v57 = vadd.f32 %v1882_v29, %v1881_v40  ;;  %v1962_v0 = vpop.f32.mrb[57].mxu1  ;;  %v1242_v2 = vadd.f32 %v1960_v63, %v1097_v14 }
 0x199   : > { %v1963_v7 = vadd.f32 %v1962_v0, %v1961_v41 }
 0x19a   : > { %v1102_v8 = vadd.f32 %v1883_v57, %v3201_v19  ;;  %v1884_v9 = vpop.f32.mrb[58].mxu0 }
 0x19b   : > { %v1885_v39 = vpop.f32.mrb[59].mxu0  ;;  %v1964_v12 = vpop.f32.mrb[58].mxu1 }
 0x19c   : > { %v1886_v17 = vadd.f32 %v1885_v39, %v1884_v9  ;;  %v1965_v3 = vpop.f32.mrb[59].mxu1  ;;  %v1247_v21 = vadd.f32 %v1963_v7, %v1102_v8 }
 0x19d   : > { %v1966_v24 = vadd.f32 %v1965_v3, %v1964_v12 }
 0x19e   : > { %v1107_v25 = vadd.f32 %v1886_v17, %v3203_v49  ;;  %v1887_v16 = vpop.f32.mrb[60].mxu0 }
 0x19f   : > { %v1888_v58 = vpop.f32.mrb[61].mxu0  ;;  %v1967_v23 = vpop.f32.mrb[60].mxu1 }
 0x1a0   : > { %v1889_v35 = vadd.f32 %v1888_v58, %v1887_v16  ;;  %v1968_v37 = vpop.f32.mrb[61].mxu1  ;;  %v1252_v26 = vadd.f32 %v1966_v24, %v1107_v25 }
 0x1a1   : > { %v1969_v27 = vadd.f32 %v1968_v37, %v1967_v23 }
 0x1a2   : > { %v1112_v47 = vadd.f32 %v1889_v35, %v3205_v1  ;;  %v1890_v31 = vpop.f32.mrb[62].mxu0 }
 0x1a3   : > { %v1891_v19 = vpop.f32.mrb[63].mxu0  ;;  %v1970_v56 = vpop.f32.mrb[62].mxu1 }
 0x1a4   : > { %v1892_v33 = vadd.f32 %v1891_v19, %v1890_v31  ;;  %v1971_v5 = vpop.f32.mrb[63].mxu1  ;;  %v3240_v4 = vadd.f32 %v1969_v27, %v1112_v47 }
 0x1a5   : > { %v1972_v49 = vadd.f32 %v1971_v5, %v1970_v56 }
 0x1a6   : > { %v1117_v34 = vadd.f32 %v1892_v33, %v3207_v55  ;;  %v2039_v10 = vpop.f32.mrb[64].mxu0 }
 0x1a7   : > { %v1337_v44 = vadd.f32 %v2039_v10, %v3213_v42  ;;  %v2051_v30 = vpop.f32.mrb[64].mxu1  ;;  %v1331_v52 = vpop.f32.mrb[65].mxu0 }
 0x1a8   : > { %v3244_v1 = vadd.f32 %v2051_v30, %v1232_v43  ;;  %v1332_v54 = vadd.f32 %v1331_v52, %v3210_v28  ;;  %v1371_v15 = vpop.f32.mrb[65].mxu1  ;;  %v1262_v61 = vadd.f32 %v1972_v49, %v1117_v34 }
 0x1a9   : > { %1411 = vst [vmem:[%s2388_s9 + $0x8] sm:$0xff] %v1337_v44  ;;  %v1442_v45 = vmul.f32 %v1337_v44, %v1337_v44  ;;  %v1372_v18 = vadd.f32 %v1371_v15, %v1227_v51 }
 0x1aa   : > { %1419 = vst [vmem:[%s2388_s9 + $0x48] sm:$0xff] %v3244_v1  ;;  %1410 = vst [vmem:[%s2388_s9] sm:$0xff] %v1332_v54  ;;  %v1426_v55 = vadd.f32 %v1337_v44, %v1332_v54  ;;  %v1441_v38 = vmul.f32 %v1332_v54, %v1332_v54  ;;  %v2042_v42 = vpop.f32.mrb[66].mxu0 }
 0x1ab   : > { %1418 = vst [vmem:[%s2388_s9 + $0x40] sm:$0xff] %v1372_v18  ;;  %v1347_v43 = vadd.f32 %v2042_v42, %v3219_v22  ;;  %v2054_v50 = vpop.f32.mrb[66].mxu1  ;;  %v1341_v28 = vpop.f32.mrb[67].mxu0  ;;  %v1449_v47 = vmul.f32 %v1372_v18, %v1372_v18 }
 0x1ac   : > { %v1457_v62 = vadd.f32 %v1442_v45, %v1441_v38  ;;  %v1387_v20 = vadd.f32 %v2054_v50, %v1242_v2  ;;  %v1342_v59 = vadd.f32 %v1341_v28, %v3216_v46  ;;  %v1381_v36 = vpop.f32.mrb[67].mxu1  ;;  %v1472_v38 = vld [vmem:[%s2383_s6] sm:$0xff] }
 0x1ad   : > { %1413 = vst [vmem:[%s2388_s9 + $0x18] sm:$0xff] %v1347_v43  ;;  %v1382_v51 = vadd.f32 %v1381_v36, %v1237_v6  ;;  %v1444_v14 = vmul.f32 %v1347_v43, %v1347_v43  ;;  %v1475_v28 = vld [vmem:[%s2393_s12] sm:$0xff] }
 0x1ae   : > { %1421 = vst [vmem:[%s2388_s9 + $0x58] sm:$0xff] %v1387_v20  ;;  %1412 = vst [vmem:[%s2388_s9 + $0x10] sm:$0xff] %v1342_v59  ;;  %v1427_v60 = vadd.f32 %v1426_v55, %v1342_v59  ;;  %v1443_v53 = vmul.f32 %v1342_v59, %v1342_v59  ;;  %v2045_v63 = vpop.f32.mrb[68].mxu0  ;;  %v1452_v34 = vmul.f32 %v1387_v20, %v1387_v20 }
 0x1af   : > { %1420 = vst [vmem:[%s2388_s9 + $0x50] sm:$0xff] %v1382_v51  ;;  %v1357_v22 = vadd.f32 %v2045_v63, %v3225_v13  ;;  %v2057_v40 = vpop.f32.mrb[68].mxu1  ;;  %v1351_v29 = vpop.f32.mrb[69].mxu0  ;;  %v1451_v5 = vmul.f32 %v1382_v51, %v1382_v51 }
 0x1b0   : > { %v1458_v41 = vadd.f32 %v1457_v62, %v1443_v53  ;;  %v1397_v46 = vadd.f32 %v2057_v40, %v1252_v26  ;;  %v1352_v57 = vadd.f32 %v1351_v29, %v3222_v48  ;;  %v1428_v6 = vadd.f32 %v1427_v60, %v1347_v43  ;;  %v1391_v0 = vpop.f32.mrb[69].mxu1 }
 0x1b1   : > { %1415 = vst [vmem:[%s2388_s9 + $0x28] sm:$0xff] %v1357_v22  ;;  %v1392_v2 = vadd.f32 %v1391_v0, %v1247_v21  ;;  %v1446_v39 = vmul.f32 %v1357_v22, %v1357_v22 }
 0x1b2   : > { %1423 = vst [vmem:[%s2388_s9 + $0x68] sm:$0xff] %v1397_v46  ;;  %1414 = vst [vmem:[%s2388_s9 + $0x20] sm:$0xff] %v1352_v57  ;;  %v1429_v7 = vadd.f32 %v1428_v6, %v1352_v57  ;;  %v1445_v8 = vmul.f32 %v1352_v57, %v1352_v57  ;;  %v1459_v9 = vadd.f32 %v1458_v41, %v1444_v14  ;;  %v2048_v13 = vpop.f32.mrb[70].mxu0 }
 0x1b3   : > { %1422 = vst [vmem:[%s2388_s9 + $0x60] sm:$0xff] %v1392_v2  ;;  %v1367_v12 = vadd.f32 %v2048_v13, %v3231_v32  ;;  %v2060_v17 = vpop.f32.mrb[70].mxu1  ;;  %v1361_v48 = vpop.f32.mrb[71].mxu0  ;;  %v1453_v30 = vmul.f32 %v1392_v2, %v1392_v2  ;;  %v1454_v15 = vmul.f32 %v1397_v46, %v1397_v46 }
 0x1b4   : > { %v1460_v3 = vadd.f32 %v1459_v9, %v1445_v8  ;;  %v1407_v24 = vadd.f32 %v2060_v17, %v1262_v61  ;;  %v1362_v21 = vadd.f32 %v1361_v48, %v3228_v11  ;;  %v1430_v25 = vadd.f32 %v1429_v7, %v1357_v22  ;;  %v1401_v16 = vpop.f32.mrb[71].mxu1 }
 0x1b5   : > { %1417 = vst [vmem:[%s2388_s9 + $0x38] sm:$0xff] %v1367_v12  ;;  %v1402_v58 = vadd.f32 %v1401_v16, %v3240_v4  ;;  %v1448_v26 = vmul.f32 %v1367_v12, %v1367_v12  ;;  %v1450_v11 = vmul.f32 %v3244_v1, %v3244_v1 }
 0x1b6   : > { %1425 = vst [vmem:[%s2388_s9 + $0x78] sm:$0xff] %v1407_v24  ;;  %1416 = vst [vmem:[%s2388_s9 + $0x30] sm:$0xff] %v1362_v21  ;;  %v1431_v23 = vadd.f32 %v1430_v25, %v1362_v21  ;;  %v1447_v35 = vmul.f32 %v1362_v21, %v1362_v21  ;;  %v1461_v37 = vadd.f32 %v1460_v3, %v1446_v39 }
 0x1b7   : > { %1424 = vst [vmem:[%s2388_s9 + $0x70] sm:$0xff] %v1402_v58  ;;  %v1455_v55 = vmul.f32 %v1402_v58, %v1402_v58  ;;  %v1456_v42 = vmul.f32 %v1407_v24, %v1407_v24 }
 0x1b8   : > { %v1432_v27 = vadd.f32 %v1431_v23, %v1367_v12  ;;  %v1462_v32 = vadd.f32 %v1461_v37, %v1447_v35 }
 0x1ba   : > { %v1433_v31 = vadd.f32 %v1432_v27, %v1372_v18  ;;  %v1463_v19 = vadd.f32 %v1462_v32, %v1448_v26 }
 0x1bc   : > { %v1434_v56 = vadd.f32 %v1433_v31, %v3244_v1  ;;  %v1464_v33 = vadd.f32 %v1463_v19, %v1449_v47 }
 0x1be   : > { %v1465_v4 = vadd.f32 %v1464_v33, %v1450_v11  ;;  %v1435_v49 = vadd.f32 %v1434_v56, %v1382_v51 }
 0x1c0   : > { %v1436_v10 = vadd.f32 %v1435_v49, %v1387_v20  ;;  %v1466_v44 = vadd.f32 %v1465_v4, %v1451_v5 }
 0x1c2   : > { %v1437_v52 = vadd.f32 %v1436_v10, %v1392_v2  ;;  %v1467_v54 = vadd.f32 %v1466_v44, %v1452_v34 }
 0x1c4   : > { %v1438_v61 = vadd.f32 %v1437_v52, %v1397_v46  ;;  %v1468_v45 = vadd.f32 %v1467_v54, %v1453_v30 }
 0x1c6   : > { %v1439_v18 = vadd.f32 %v1438_v61, %v1402_v58  ;;  %v1469_v1 = vadd.f32 %v1468_v45, %v1454_v15 }
 0x1c8   : > { %v1440_v43 = vadd.f32 %v1439_v18, %v1407_v24  ;;  %v1470_v50 = vadd.f32 %v1469_v1, %v1455_v55 }
 0x1ca   : > { %v1471_v62 = vadd.f32 %v1470_v50, %v1456_v42  ;;  %v1473_v59 = vadd.f32 %v1472_v38, %v1440_v43 }
 0x1cc   : > { %1474 = vst [vmem:[%s2383_s6] sm:$0xff] %v1473_v59  ;;  %v1476_v20 = vadd.f32 %v1475_v28, %v1471_v62 }
 0x1ce   : > { %1477 = vst [vmem:[%s2393_s12] sm:$0xff] %v1476_v20 }
 0x1cf PF: > { %s15_s19 = sadd.s32 1, %s2318_s19   ;;  %s3298_s15 = smov %s2310_s17 }
 0x1d0   : > { %p12_p8 = scmp.ge.s32.totalorder %s15_s19, 6   ;;  %s3299_s16 = smov %s2314_s18 }
 0x1d1   : > { %s3300_s17 = smov %s3303_s20  ;;  %s3301_s18 = smov %s3307_s21 }
 0x1d2   :  { %14 = sbr.rel (!%p12_p8) target bundleno = 3 (0x3), region = 131 }
 0x1d9   :  { %1534 = vsyncmov [#allocation3] }
 0x1dc   :  { %s1535_s6 = vpop.sfrf %1534 }
 0x1dd   :  { %p1652_p9 = scmp.ne.s32.totalorder %s1535_s6, 0 }
 0x1df   :  { %1539 = shalt.err (%p1652_p9)  }

// kernel: res_block_forward.4
= control target key start
LH: loop header
LB: loop body
LE: loop exit
PB: predicated region body
PF: predicated region fallthrough
CT: control target
= control target key end

     0   :  { %s2578_s21 = smov 0   ;;  %s2580_s22 = smov 0   ;;  %s3641_s0 = inlined_call_operand.vmem [shape: f32[2,18,18,128], index: 0, kind: input, shape index: {}]   ;;  %s3642_s1 = inlined_call_operand.vmem [shape: f32[1,128], index: 1, kind: input, shape index: {}]   ;;  %s3643_s2 = inlined_call_operand.vmem [shape: f32[1,128], index: 2, kind: input, shape index: {}]   ;;  %s3644_s3 = inlined_call_operand.vmem [shape: f32[1152,128], index: 3, kind: input, shape index: {}]   ;;  %s3645_s4 = inlined_call_operand.vmem [shape: f32[512,128], index: 4, kind: output, shape index: {0}]   ;;  %s3646_s5 = inlined_call_operand.vmem [shape: f32[2,8,128], index: 5, kind: output, shape index: {1}]   ;;  %s3647_s6 = inlined_call_operand.vmem [shape: f32[2,8,128], index: 6, kind: output, shape index: {2}]  }
   0x1   :  { %s2582_s23 = smov 0   ;;  %s2584_s24 = smov 0  }
   0x2   :  { %s2586_s25 = smov 0  }
   0x3 LB: > { %s26_s26 = sadd.s32 1, %s2532_s23  ;;  %s29_s27 = sadd.s32 1, %s2536_s24  ;;  %s2540_s25 = sphi %s2586_s25, %s17_s25   ;;  %s2536_s24 = sphi %s2584_s24, %s3651_s24   ;;  %s2532_s23 = sphi %s2582_s23, %s3650_s23   ;;  %s2528_s22 = sphi %s2580_s22, %s3649_s22   ;;  %s2524_s21 = sphi %s2578_s21, %s3648_s21  }
   0x4   : > { %p27_p0 = scmp.ge.s32.totalorder %s26_s26, 2  ;;  %p1849_p1 = scmp.ge.s32.totalorder %s2540_s25, 1 }
   0x5   : > { %p199_p2 = scmp.lt.s32.totalorder %s2540_s25, 5 }
   0x6   : > { %s3653_s26 = smov (%p27_p0, %s26_s26), 0  ;;  %s3655_s27 = smov (!%p27_p0, %s29_s27), %s2536_s24 }
   0x7   : > { %p200_p3 = pnand %p1849_p1, %p199_p2  ;;  %p31_p4 = scmp.ge.s32.totalorder %s3655_s27, 2 }
   0x8   : > { %s1850_s28 = sshll.u32 (!%p200_p3), %s2528_s22, 1  ;;  %p242_p5 = scmp.lt.s32.totalorder (!%p200_p3), %s2528_s22, 1 }
   0x9   : > { %s3657_s27 = smov (%p31_p4, %s3655_s27), 0  ;;  %203 = sbr.rel (%p200_p3) target bundleno = 463 (0x1cf), region = 32 }
   0xa   : > { %s233_s29 = sadd.s32 (!%p200_p3), %s2524_s21, %s1850_s28  ;;  %s1856_s30 = smul.u32 (!%p200_p3), 192, %s2524_s21 }
   0xb   : > { %s1851_s7 = sshll.u32 (!%p200_p3), %s233_s29, 4  ;;  %s252_s8 = smul.u32 (!%p200_p3), 432, %s2528_s22 }
   0xc   : > { %p235_p6 = scmp.lt.s32.totalorder (!%p200_p3), %s1851_s7, 63 }
   0xd   : > { %s253_s10 = sadd.s32 (!%p200_p3), %s1856_s30, %s252_s8 }
  0x10   : > { %s3659_s22 = smov (!%p242_p5, %s2528_s22), 1  ;;  %s3661_s7 = smov (!%p235_p6, %s1851_s7), 63 }
  0x11   : > { %s1853_s9 = sshll.u32 %s3659_s22, 3  ;;  %s1852_s11 = sshll.u32 %s3661_s7, 3 }
  0x12   : > { %s2615_s14 = scalar_lea.vmem %s3646_s5, %s1853_s9  ;;  %s2620_s17 = scalar_lea.vmem %s3645_s4, %s1852_s11 }
  0x13   : > { %s2625_s20 = scalar_lea.vmem %s3647_s6, %s1853_s9  ;;  %s2630_s22 = scalar_lea.vmem %s3641_s0, %s253_s10 }
  0x14   : > { %v310_v0 = vld [vmem:[%s2630_s22] sm:$0xff]  ;;  %v312_v1 = vld [vmem:[%s2630_s22 + $0x8] sm:$0xff]  ;;  %v314_v2 = vld [vmem:[%s2630_s22 + $0x18] sm:$0xff] }
  0x15   : > { %311 = vst [vmem:[#allocation2] sm:$0xff] %v310_v0  ;;  %313 = vst [vmem:[#allocation2 + $0x8] sm:$0xff] %v312_v1  ;;  %v316_v3 = vld [vmem:[%s2630_s22 + $0x20] sm:$0xff]  ;;  %v318_v4 = vld [vmem:[%s2630_s22 + $0x30] sm:$0xff] }
  0x16   : > { %315 = vst [vmem:[#allocation2 + $0x18] sm:$0xff] %v314_v2  ;;  %v320_v5 = vld [vmem:[%s2630_s22 + $0x38] sm:$0xff]  ;;  %317 = vst [vmem:[#allocation2 + $0x20] sm:$0xff] %v316_v3  ;;  %v322_v6 = vld [vmem:[%s2630_s22 + $0x48] sm:$0xff] }
  0x17   : > { %319 = vst [vmem:[#allocation2 + $0x30] sm:$0xff] %v318_v4  ;;  %321 = vst [vmem:[#allocation2 + $0x38] sm:$0xff] %v320_v5  ;;  %v324_v7 = vld [vmem:[%s2630_s22 + $0x50] sm:$0xff]  ;;  %v326_v8 = vld [vmem:[%s2630_s22 + $0x60] sm:$0xff] }
  0x18   : > { %323 = vst [vmem:[#allocation2 + $0x48] sm:$0xff] %v322_v6  ;;  %325 = vst [vmem:[#allocation2 + $0x50] sm:$0xff] %v324_v7  ;;  %v328_v9 = vld [vmem:[%s2630_s22 + $0x68] sm:$0xff]  ;;  %v330_v10 = vld [vmem:[%s2630_s22 + $0x78] sm:$0xff] }
  0x19   : > { %327 = vst [vmem:[#allocation2 + $0x60] sm:$0xff] %v326_v8  ;;  %v332_v11 = vld [vmem:[%s2630_s22 + $0x80] sm:$0xff]  ;;  %329 = vst [vmem:[#allocation2 + $0x68] sm:$0xff] %v328_v9  ;;  %v334_v12 = vld [vmem:[%s2630_s22 + $0x90] sm:$0xff] }
  0x1a   : > { %331 = vst [vmem:[#allocation2 + $0x78] sm:$0xff] %v330_v10  ;;  %333 = vst [vmem:[#allocation2 + $0x80] sm:$0xff] %v332_v11  ;;  %v336_v13 = vld [vmem:[%s2630_s22 + $0x98] sm:$0xff]  ;;  %v338_v14 = vld [vmem:[%s2630_s22 + $0xa8] sm:$0xff] }
  0x1b   : > { %335 = vst [vmem:[#allocation2 + $0x90] sm:$0xff] %v334_v12  ;;  %337 = vst [vmem:[#allocation2 + $0x98] sm:$0xff] %v336_v13  ;;  %v340_v15 = vld [vmem:[%s2630_s22 + $0xb0] sm:$0xff]  ;;  %v342_v16 = vld [vmem:[%s2630_s22 + $0xc0] sm:$0xff] }
  0x1c   : > { %339 = vst [vmem:[#allocation2 + $0xa8] sm:$0xff] %v338_v14  ;;  %v344_v17 = vld [vmem:[%s2630_s22 + $0xc8] sm:$0xff]  ;;  %341 = vst [vmem:[#allocation2 + $0xb0] sm:$0xff] %v340_v15  ;;  %v346_v18 = vld [vmem:[%s2630_s22 + $0xd8] sm:$0xff] }
  0x1d   : > { %343 = vst [vmem:[#allocation2 + $0xc0] sm:$0xff] %v342_v16  ;;  %345 = vst [vmem:[#allocation2 + $0xc8] sm:$0xff] %v344_v17  ;;  %v348_v19 = vld [vmem:[%s2630_s22 + $0xe0] sm:$0xff]  ;;  %v1857_v20 = vld [vmem:[%s2630_s22 + $0x10] sm:$0x3] }
  0x1e   : > { %347 = vst [vmem:[#allocation2 + $0xd8] sm:$0xff] %v346_v18  ;;  %349 = vst [vmem:[#allocation2 + $0xe0] sm:$0xff] %v348_v19  ;;  %v1858_v21 = vld [vmem:[%s2630_s22 + $0x28] sm:$0x3]  ;;  %v1859_v22 = vld [vmem:[%s2630_s22 + $0x40] sm:$0x3] }
  0x1f   : > { %360 = vst [vmem:[#allocation2 + $0x10] sm:$0x3] %v1857_v20  ;;  %v1860_v23 = vld [vmem:[%s2630_s22 + $0x58] sm:$0x3]  ;;  %362 = vst [vmem:[#allocation2 + $0x28] sm:$0x3] %v1858_v21 }
  0x20   : > { %364 = vst [vmem:[#allocation2 + $0x40] sm:$0x3] %v1859_v22  ;;  %366 = vst [vmem:[#allocation2 + $0x58] sm:$0x3] %v1860_v23  ;;  %v1861_v24 = vld [vmem:[%s2630_s22 + $0x70] sm:$0x3] }
  0x21   : > { %v1862_v25 = vld [vmem:[%s2630_s22 + $0x88] sm:$0x3]  ;;  %v1863_v26 = vld [vmem:[%s2630_s22 + $0xa0] sm:$0x3]  ;;  %368 = vst [vmem:[#allocation2 + $0x70] sm:$0x3] %v1861_v24 }
  0x22   : > { %370 = vst [vmem:[#allocation2 + $0x88] sm:$0x3] %v1862_v25  ;;  %372 = vst [vmem:[#allocation2 + $0xa0] sm:$0x3] %v1863_v26  ;;  %v1864_v27 = vld [vmem:[%s2630_s22 + $0xb8] sm:$0x3] }
  0x23   : > { %v1865_v28 = vld [vmem:[%s2630_s22 + $0xd0] sm:$0x3]  ;;  %v1866_v29 = vld [vmem:[%s2630_s22 + $0xe8] sm:$0x3]  ;;  %374 = vst [vmem:[#allocation2 + $0xb8] sm:$0x3] %v1864_v27 }
  0x24   : > { %376 = vst [vmem:[#allocation2 + $0xd0] sm:$0x3] %v1865_v28  ;;  %378 = vst [vmem:[#allocation2 + $0xe8] sm:$0x3] %v1866_v29 }
  0x25   : > { %382 = vsyncadd [#allocation3], 2880  ;;  %p1867_p7 = scmp.ne.s32.totalorder %s2524_s21, 0 }
  0x26   : > { %v2542_v30 = vmov (!%p1867_p7), 0.0  }
  0x27   : > { %386 = sbr.rel (%p1867_p7) target bundleno = 46 (0x2e), region = 73  ;;  %387 = vst [vmem:[%s2615_s14] sm:$0xff] (!%p1867_p7), %v2542_v30  ;;  %388 = vst [vmem:[%s2625_s20] sm:$0xff] (!%p1867_p7), %v2542_v30 }
  0x2e PF: > { %2520 = dma.done.wait [#allocation3], 2880 }
  0x2f   : > { %2521 = vsyncadd [#allocation3], 4294964416  ;;  %v603_v31 = vld [vmem:[%s3644_s3 + $0x80] sm:$0xff]  ;;  %v604_v32 = vld [vmem:[%s3644_s3 + $0x88] sm:$0xff]  ;;  %vm755_vm0 = vcmask 1046528   ;;  %vm812_vm4 = vcmask 1045504  }
  0x30   : > { %v635_v33 = vld [vmem:[%s3644_s3 + $0x180] sm:$0xff]  ;;  %v2281_v34 = vpack.c.bf16 %v604_v32, %v603_v31  ;;  %v636_v35 = vld [vmem:[%s3644_s3 + $0x188] sm:$0xff]  ;;  %v605_v42 = vld [vmem:[%s3644_s3 + $0x90] sm:$0xff] }
  0x31   : > { %v587_v36 = vld [vmem:[%s3644_s3] sm:$0xff]  ;;  %v588_v37 = vld [vmem:[%s3644_s3 + $0x8] sm:$0xff]  ;;  %v2313_v38 = vpack.c.bf16 %v636_v35, %v635_v33  ;;  %v606_v44 = vld [vmem:[%s3644_s3 + $0x98] sm:$0xff] }
  0x32   : > { %v2283_v39 = vpack.c.bf16 %v588_v37, %v587_v36  ;;  %v619_v40 = vld [vmem:[%s3644_s3 + $0x100] sm:$0xff]  ;;  %v620_v41 = vld [vmem:[%s3644_s3 + $0x108] sm:$0xff]  ;;  %2282 = vmatprep.subr.bf16.mxu0 %v2281_v34  ;;  %v637_v45 = vld [vmem:[%s3644_s3 + $0x190] sm:$0xff]  ;;  %v2285_v47 = vpack.c.bf16 %v606_v44, %v605_v42 }
  0x33   : > { %v2315_v43 = vpack.c.bf16 %v620_v41, %v619_v40  ;;  %v638_v46 = vld [vmem:[%s3644_s3 + $0x198] sm:$0xff]  ;;  %2314 = vmatprep.subr.bf16.mxu1 %v2313_v38  ;;  %v589_v49 = vld [vmem:[%s3644_s3 + $0x10] sm:$0xff]  ;;  %v607_v54 = vld [vmem:[%s3644_s3 + $0xa0] sm:$0xff] }
  0x34   : > { %2284 = vmatpush3.bf16.msra.mxu0 %v2283_v39  ;;  %v2317_v48 = vpack.c.bf16 %v638_v46, %v637_v45  ;;  %v590_v50 = vld [vmem:[%s3644_s3 + $0x18] sm:$0xff]  ;;  %v621_v51 = vld [vmem:[%s3644_s3 + $0x110] sm:$0xff]  ;;  %v608_v55 = vld [vmem:[%s3644_s3 + $0xa8] sm:$0xff] }
  0x35   : > { %2316 = vmatpush3.bf16.msra.mxu1 %v2315_v43  ;;  %v2287_v52 = vpack.c.bf16 %v590_v50, %v589_v49  ;;  %v622_v53 = vld [vmem:[%s3644_s3 + $0x118] sm:$0xff]  ;;  %2286 = vmatprep.subr.bf16.mxu0 %v2285_v47  ;;  %v2289_v57 = vpack.c.bf16 %v608_v55, %v607_v54  ;;  %v639_v58 = vld [vmem:[%s3644_s3 + $0x1a0] sm:$0xff]  ;;  %v640_v59 = vld [vmem:[%s3644_s3 + $0x1a8] sm:$0xff] }
  0x36   : > { %2318 = vmatprep.subr.bf16.mxu1 %v2317_v48  ;;  %v2319_v56 = vpack.c.bf16 %v622_v53, %v621_v51  ;;  %v591_v60 = vld [vmem:[%s3644_s3 + $0x20] sm:$0xff]  ;;  %v2321_v61 = vpack.c.bf16 %v640_v59, %v639_v58  ;;  %v592_v62 = vld [vmem:[%s3644_s3 + $0x28] sm:$0xff]  ;;  %v609_v2 = vld [vmem:[%s3644_s3 + $0xb0] sm:$0xff] }
  0x37   : > { %v623_v63 = vld [vmem:[%s3644_s3 + $0x120] sm:$0xff]  ;;  %v624_v0 = vld [vmem:[%s3644_s3 + $0x128] sm:$0xff]  ;;  %v2291_v1 = vpack.c.bf16 %v592_v62, %v591_v60  ;;  %v610_v3 = vld [vmem:[%s3644_s3 + $0xb8] sm:$0xff] }
  0x38   : > { %2288 = vmatpush3.bf16.msra.mxu0 %v2287_v52  ;;  %v641_v4 = vld [vmem:[%s3644_s3 + $0x1b0] sm:$0xff]  ;;  %v2323_v5 = vpack.c.bf16 %v624_v0, %v623_v63  ;;  %v2293_v6 = vpack.c.bf16 %v610_v3, %v609_v2  ;;  %v642_v7 = vld [vmem:[%s3644_s3 + $0x1b8] sm:$0xff]  ;;  %v611_v13 = vld [vmem:[%s3644_s3 + $0xc0] sm:$0xff] }
  0x39   : > { %2320 = vmatpush3.bf16.msra.mxu1 %v2319_v56  ;;  %2290 = vmatprep.subr.bf16.mxu0 %v2289_v57  ;;  %v593_v8 = vld [vmem:[%s3644_s3 + $0x30] sm:$0xff]  ;;  %v594_v9 = vld [vmem:[%s3644_s3 + $0x38] sm:$0xff]  ;;  %v2325_v10 = vpack.c.bf16 %v642_v7, %v641_v4  ;;  %v612_v14 = vld [vmem:[%s3644_s3 + $0xc8] sm:$0xff] }
  0x3a   : > { %2322 = vmatprep.subr.bf16.mxu1 %v2321_v61  ;;  %v625_v11 = vld [vmem:[%s3644_s3 + $0x130] sm:$0xff]  ;;  %v626_v12 = vld [vmem:[%s3644_s3 + $0x138] sm:$0xff]  ;;  %v643_v15 = vld [vmem:[%s3644_s3 + $0x1c0] sm:$0xff]  ;;  %v2295_v17 = vpack.c.bf16 %v594_v9, %v593_v8  ;;  %v2297_v20 = vpack.c.bf16 %v612_v14, %v611_v13 }
  0x3b   : > { %v644_v16 = vld [vmem:[%s3644_s3 + $0x1c8] sm:$0xff]  ;;  %v595_v18 = vld [vmem:[%s3644_s3 + $0x40] sm:$0xff]  ;;  %v2327_v19 = vpack.c.bf16 %v626_v12, %v625_v11  ;;  %v613_v25 = vld [vmem:[%s3644_s3 + $0xd0] sm:$0xff] }
  0x3c   : > { %2292 = vmatpush3.bf16.msra.mxu0 %v2291_v1  ;;  %v596_v21 = vld [vmem:[%s3644_s3 + $0x48] sm:$0xff]  ;;  %v627_v22 = vld [vmem:[%s3644_s3 + $0x140] sm:$0xff]  ;;  %v2329_v24 = vpack.c.bf16 %v644_v16, %v643_v15  ;;  %v614_v26 = vld [vmem:[%s3644_s3 + $0xd8] sm:$0xff] }
  0x3d   : > { %2324 = vmatpush3.bf16.msra.mxu1 %v2323_v5  ;;  %2294 = vmatprep.subr.bf16.mxu0 %v2293_v6  ;;  %v628_v23 = vld [vmem:[%s3644_s3 + $0x148] sm:$0xff]  ;;  %v645_v27 = vld [vmem:[%s3644_s3 + $0x1d0] sm:$0xff]  ;;  %v646_v28 = vld [vmem:[%s3644_s3 + $0x1d8] sm:$0xff]  ;;  %v2299_v31 = vpack.c.bf16 %v596_v21, %v595_v18  ;;  %v2301_v37 = vpack.c.bf16 %v614_v26, %v613_v25 }
  0x3e   : > { %2326 = vmatprep.subr.bf16.mxu1 %v2325_v10  ;;  %v597_v29 = vld [vmem:[%s3644_s3 + $0x50] sm:$0xff]  ;;  %v598_v30 = vld [vmem:[%s3644_s3 + $0x58] sm:$0xff]  ;;  %v615_v34 = vld [vmem:[%s3644_s3 + $0xe0] sm:$0xff]  ;;  %v2331_v36 = vpack.c.bf16 %v628_v23, %v627_v22  ;;  %v2333_v42 = vpack.c.bf16 %v646_v28, %v645_v27 }
  0x3f   : > { %v629_v32 = vld [vmem:[%s3644_s3 + $0x150] sm:$0xff]  ;;  %v630_v33 = vld [vmem:[%s3644_s3 + $0x158] sm:$0xff]  ;;  %v616_v35 = vld [vmem:[%s3644_s3 + $0xe8] sm:$0xff]  ;;  %v2303_v49 = vpack.c.bf16 %v598_v30, %v597_v29 }
  0x40   : > { %2296 = vmatpush3.bf16.msra.mxu0 %v2295_v17  ;;  %v647_v38 = vld [vmem:[%s3644_s3 + $0x1e0] sm:$0xff]  ;;  %v648_v39 = vld [vmem:[%s3644_s3 + $0x1e8] sm:$0xff]  ;;  %v617_v45 = vld [vmem:[%s3644_s3 + $0xf0] sm:$0xff]  ;;  %v2335_v53 = vpack.c.bf16 %v630_v33, %v629_v32  ;;  %v2305_v54 = vpack.c.bf16 %v616_v35, %v615_v34 }
  0x41   : > { %2328 = vmatpush3.bf16.msra.mxu1 %v2327_v19  ;;  %2298 = vmatprep.subr.bf16.mxu0 %v2297_v20  ;;  %v599_v40 = vld [vmem:[%s3644_s3 + $0x60] sm:$0xff]  ;;  %v600_v41 = vld [vmem:[%s3644_s3 + $0x68] sm:$0xff]  ;;  %v618_v46 = vld [vmem:[%s3644_s3 + $0xf8] sm:$0xff]  ;;  %v2337_v58 = vpack.c.bf16 %v648_v39, %v647_v38 }
  0x42   : > { %2330 = vmatprep.subr.bf16.mxu1 %v2329_v24  ;;  %v631_v43 = vld [vmem:[%s3644_s3 + $0x160] sm:$0xff]  ;;  %v632_v44 = vld [vmem:[%s3644_s3 + $0x168] sm:$0xff]  ;;  %v2842_v47 = vld [vmem:[%s3644_s3 + $0x1f0] sm:$0xff]  ;;  %v2307_v59 = vpack.c.bf16 %v600_v41, %v599_v40  ;;  %v2309_v0 = vpack.c.bf16 %v618_v46, %v617_v45 }
  0x43   : > { %v650_v48 = vld [vmem:[%s3644_s3 + $0x1f8] sm:$0xff]  ;;  %v2850_v50 = vld [vmem:[%s3644_s3 + $0x70] sm:$0xff]  ;;  %v2870_v56 = vld [vmem:[%s3642_s1] ss:$0 sm:$0xff]  ;;  %v2339_v60 = vpack.c.bf16 %v632_v44, %v631_v43 }
  0x44   : > { %2300 = vmatpush3.bf16.msra.mxu0 %v2299_v31  ;;  %v2855_v51 = vld [vmem:[%s3644_s3 + $0x78] sm:$0xff]  ;;  %v2860_v52 = vld [vmem:[%s3644_s3 + $0x170] sm:$0xff]  ;;  %v2875_v57 = vld [vmem:[%s3643_s2] ss:$0 sm:$0xff]  ;;  %v2341_v7 = vpack.c.bf16 %v650_v48, %v2842_v47 }
  0x45   : > { %2332 = vmatpush3.bf16.msra.mxu1 %v2331_v36  ;;  %2302 = vmatprep.subr.bf16.mxu0 %v2301_v37  ;;  %v2865_v55 = vld [vmem:[%s3644_s3 + $0x178] sm:$0xff]  ;;  %v395_v61 = vld [vmem:[#allocation2] sm:$0xff]  ;;  %v396_v62 = vld [vmem:[#allocation2 + $0x8] sm:$0xff]  ;;  %v2311_v8 = vpack.c.bf16 %v2855_v51, %v2850_v50 }
  0x46   : > { %2334 = vmatprep.subr.bf16.mxu1 %v2333_v42  ;;  %v398_v63 = vld [vmem:[#allocation2 + $0x18] sm:$0xff]  ;;  %v431_v1 = vmul.f32 %v2870_v56, %v395_v61  ;;  %v432_v2 = vmul.f32 %v2870_v56, %v396_v62  ;;  %v2883_v4 = vld [vmem:[%s3644_s3 + $0x280] sm:$0xff]  ;;  %v2888_v5 = vld [vmem:[%s3644_s3 + $0x288] sm:$0xff]  ;;  %v2343_v9 = vpack.c.bf16 %v2865_v55, %v2860_v52 }
  0x47   : > { %v434_v3 = vmul.f32 %v2870_v56, %v398_v63  ;;  %v2893_v6 = vld [vmem:[%s3644_s3 + $0x200] sm:$0xff]  ;;  %v2345_v10 = vpack.c.bf16 %v2888_v5, %v2883_v4  ;;  %v2905_v11 = vld [vmem:[%s3644_s3 + $0x208] sm:$0xff]  ;;  %v397_v12 = vld [vmem:[#allocation2 + $0x10] sm:$0x3] }
  0x48   : > { %2304 = vmatpush3.bf16.msra.mxu0 %v2303_v49  ;;  %v399_v13 = vld [vmem:[#allocation2 + $0x20] sm:$0xff]  ;;  %v467_v14 = vadd.f32 %v2875_v57, %v431_v1  ;;  %v468_v15 = vadd.f32 %v2875_v57, %v432_v2  ;;  %v401_v17 = vld [vmem:[#allocation2 + $0x30] sm:$0xff]  ;;  %v2347_v18 = vpack.c.bf16 %v2905_v11, %v2893_v6  ;;  %v433_v19 = vmul.f32 %v2870_v56, %v397_v12  ;;  %v670_v35 = vld [vmem:[%s3644_s3 + $0x298] sm:$0xff] }
  0x49   : > { %2336 = vmatpush3.bf16.msra.mxu1 %v2335_v53  ;;  %2306 = vmatprep.subr.bf16.mxu0 %v2305_v54  ;;  %v470_v16 = vadd.f32 %v2875_v57, %v434_v3  ;;  %v435_v20 = vmul.f32 %v2870_v56, %v399_v13  ;;  %v437_v21 = vmul.f32 %v2870_v56, %v401_v17  ;;  %v669_v34 = vld [vmem:[%s3644_s3 + $0x290] sm:$0xff]  ;;  %v2939_v39 = vld [vmem:[%s3644_s3 + $0x218] sm:$0xff]  ;;  %v400_v43 = vld [vmem:[#allocation2 + $0x28] sm:$0x3] }
  0x4a   : > { %2338 = vmatprep.subr.bf16.mxu1 %v2337_v58  ;;  %vm497_vm1 = vcmp.ge.f32.partialorder %v467_v14, 0.0  ;;  %vm498_vm2 = vcmp.ge.f32.partialorder %v468_v15, 0.0  ;;  %v527_v22 = vmul.f32 0.2, %v467_v14  ;;  %v528_v23 = vmul.f32 0.2, %v468_v15 }
  0x4b   : > { %vm500_vm3 = vcmp.ge.f32.partialorder %v470_v16, 0.0  ;;  %v530_v24 = vmul.f32 0.2, %v470_v16  ;;  %v469_v25 = vadd.f32 %v2875_v57, %v433_v19  ;;  %v471_v26 = vadd.f32 %v2875_v57, %v435_v20  ;;  %v2932_v36 = vld [vmem:[%s3644_s3 + $0x210] sm:$0xff]  ;;  %v402_v48 = vld [vmem:[#allocation2 + $0x38] sm:$0xff]  ;;  %v404_v49 = vld [vmem:[#allocation2 + $0x48] sm:$0xff] }
  0x4c   : > { %2308 = vmatpush3.bf16.msra.mxu0 %v2307_v59  ;;  %v557_v27 = vsel %vm497_vm1, %v467_v14, %v527_v22  ;;  %v2917_v28 = vsel %vm498_vm2, %v468_v15, %v528_v23  ;;  %v473_v29 = vadd.f32 %v2875_v57, %v437_v21  ;;  %v2349_v53 = vpack.c.bf16 %v670_v35, %v669_v34  ;;  %v671_v54 = vld [vmem:[%s3644_s3 + $0x2a0] sm:$0xff]  ;;  %v672_v55 = vld [vmem:[%s3644_s3 + $0x2a8] sm:$0xff]  ;;  %v405_v13 = vld [vmem:[#allocation2 + $0x50] sm:$0xff] }
  0x4d   : > { %2340 = vmatpush3.bf16.msra.mxu1 %v2339_v60  ;;  %2310 = vmatprep.subr.bf16.mxu0 %v2309_v0  ;;  %v756_v30 = vrot.slane %v557_v27, 1  ;;  %v757_v31 = vrot.slane %v2917_v28, 1  ;;  %v2921_v32 = vsel %vm500_vm3, %v470_v16, %v530_v24  ;;  %v813_v33 = vrot.slane %v557_v27, 2  ;;  %v699_v58 = vld [vmem:[%s3644_s3 + $0x380] sm:$0xff]  ;;  %v700_v63 = vld [vmem:[%s3644_s3 + $0x388] sm:$0xff] }
  0x4e   : > { %2342 = vmatprep.subr.bf16.mxu1 %v2341_v7  ;;  %1112 = vmatprep.mubr.f32.mxu1 %v2921_v32  ;;  %v814_v37 = vrot.slane %v2917_v28, 2  ;;  %vm499_vm5 = vcmp.ge.f32.partialorder %v469_v25, 0.0  ;;  %v529_v38 = vmul.f32 0.2, %v469_v25  ;;  %vm501_vm6 = vcmp.ge.f32.partialorder %v471_v26, 0.0  ;;  %v655_v0 = vld [vmem:[%s3644_s3 + $0x220] sm:$0xff] }
  0x4f   : > { %v758_v40 = vsel %vm755_vm0, %v756_v30, %v757_v31  ;;  %v531_v41 = vmul.f32 0.2, %v471_v26  ;;  %v761_v42 = vrot.slane %v2921_v32, 1  ;;  %vm503_vm7 = vcmp.ge.f32.partialorder %v473_v29, 0.0  ;;  %v656_v1 = vld [vmem:[%s3644_s3 + $0x228] sm:$0xff]  ;;  %v683_v7 = vld [vmem:[%s3644_s3 + $0x300] sm:$0xff] }
  0x50   : > { %2312 = vmatpush3.bf16.msra.mxu0 %v2311_v8  ;;  %967 = vmatprep.mubr.f32.mxu0 %v758_v40  ;;  %v815_v44 = vsel %vm812_vm4, %v813_v33, %v814_v37  ;;  %v559_v45 = vsel %vm499_vm5, %v469_v25, %v529_v38  ;;  %v533_v46 = vmul.f32 0.2, %v473_v29  ;;  %v818_v47 = vrot.slane %v2921_v32, 2  ;;  %v684_v8 = vld [vmem:[%s3644_s3 + $0x308] sm:$0xff] }
  0x51   : > { %2344 = vmatpush3.bf16.msra.mxu1 %v2343_v9  ;;  %2346 = vmatprep.subr.bf16.mxu0 %v2345_v10  ;;  %v759_v50 = vrot.slane %v559_v45, 1  ;;  %v2946_v51 = vsel %vm501_vm6, %v471_v26, %v531_v41  ;;  %v816_v52 = vrot.slane %v559_v45, 2  ;;  %v2351_v62 = vpack.c.bf16 %v2939_v39, %v2932_v36  ;;  %v403_v9 = vld [vmem:[#allocation2 + $0x40] sm:$0x3] }
  0x52   : > { %v762_v59 = vrot.slane %v2946_v51, 1  ;;  %v2959_v60 = vsel %vm503_vm7, %v473_v29, %v533_v46  ;;  %v819_v61 = vrot.slane %v2946_v51, 2  ;;  %v436_v4 = vmul.f32 %v2870_v56, %v400_v43  ;;  %v674_v43 = vld [vmem:[%s3644_s3 + $0x2b8] sm:$0xff] }
  0x53   : > { %968 = vmatmul.mubr.f32.vlgmr.msra.gmra.mrb[0].mxu0 %v557_v27  ;;  %v760_v2 = vsel %vm755_vm0, %v757_v31, %v759_v50  ;;  %v817_v3 = vsel %vm812_vm4, %v814_v37, %v816_v52  ;;  %v766_v5 = vrot.slane %v2959_v60, 1  ;;  %v438_v11 = vmul.f32 %v2870_v56, %v402_v48  ;;  %v702_v48 = vld [vmem:[%s3644_s3 + $0x398] sm:$0xff] }
  0x54   : > { %1113 = vmatmul.mubr.f32.vlgmr.msra.gmra.mrb[0].mxu1 %v815_v44  ;;  %2348 = vmatpush3.bf16.msra.mxu0 %v2347_v18  ;;  %v2990_v6 = vsel %vm755_vm0, %v761_v42, %v762_v59  ;;  %v2995_v10 = vsel %vm812_vm4, %v818_v47, %v819_v61  ;;  %v823_v12 = vrot.slane %v2959_v60, 2  ;;  %v472_v14 = vadd.f32 %v2875_v57, %v436_v4  ;;  %v407_v18 = vld [vmem:[#allocation2 + $0x60] sm:$0xff]  ;;  %v673_v42 = vld [vmem:[%s3644_s3 + $0x2b0] sm:$0xff] }
  0x55   : > { %972 = vmatprep.mubr.f32.mxu0 %v760_v2  ;;  %1117 = vmatprep.mubr.f32.mxu1 %v2946_v51  ;;  %v440_v15 = vmul.f32 %v2870_v56, %v404_v49  ;;  %v2353_v16 = vpack.c.bf16 %v672_v55, %v671_v54  ;;  %v2377_v17 = vpack.c.bf16 %v700_v63, %v699_v58  ;;  %v701_v47 = vld [vmem:[%s3644_s3 + $0x390] sm:$0xff]  ;;  %v658_v55 = vld [vmem:[%s3644_s3 + $0x238] sm:$0xff] }
  0x56   : > { %2350 = vmatprep.subr.bf16.mxu0 %v2349_v53  ;;  %v474_v19 = vadd.f32 %v2875_v57, %v438_v11  ;;  %v2355_v20 = vpack.c.bf16 %v656_v1, %v655_v0  ;;  %v2379_v21 = vpack.c.bf16 %v684_v8, %v683_v7  ;;  %v439_v22 = vmul.f32 %v2870_v56, %v403_v9  ;;  %v657_v49 = vld [vmem:[%s3644_s3 + $0x230] sm:$0xff]  ;;  %v406_v0 = vld [vmem:[#allocation2 + $0x58] sm:$0x3]  ;;  %v408_v1 = vld [vmem:[#allocation2 + $0x68] sm:$0xff] }
  0x57   : > { %973 = vmatmul.mubr.f32.gmra.mrb[2].mxu0 %v2917_v28  ;;  %vm502_vm8 = vcmp.ge.f32.partialorder %v472_v14, 0.0  ;;  %v532_v23 = vmul.f32 0.2, %v472_v14  ;;  %v476_v24 = vadd.f32 %v2875_v57, %v440_v15  ;;  %v441_v25 = vmul.f32 %v2870_v56, %v405_v13  ;;  %2378 = vmatprep.subr.bf16.mxu1 %v2377_v17  ;;  %v685_v58 = vld [vmem:[%s3644_s3 + $0x310] sm:$0xff]  ;;  %v675_v7 = vld [vmem:[%s3644_s3 + $0x2c0] sm:$0xff]  ;;  %v676_v8 = vld [vmem:[%s3644_s3 + $0x2c8] sm:$0xff] }
  0x58   : > { %1118 = vmatmul.mubr.f32.gmra.mrb[2].mxu1 %v817_v3  ;;  %977 = vmatprep.mubr.f32.mxu0 %v2990_v6  ;;  %vm504_vm9 = vcmp.ge.f32.partialorder %v474_v19, 0.0  ;;  %v534_v26 = vmul.f32 0.2, %v474_v19  ;;  %v475_v27 = vadd.f32 %v2875_v57, %v439_v22  ;;  %v443_v28 = vmul.f32 %v2870_v56, %v407_v18  ;;  %v704_v15 = vld [vmem:[%s3644_s3 + $0x3a8] sm:$0xff]  ;;  %v687_v22 = vld [vmem:[%s3644_s3 + $0x320] sm:$0xff] }
  0x59   : > { %1122 = vmatprep.mubr.f32.mxu1 %v2959_v60  ;;  %2352 = vmatpush3.bf16.msra.mxu0 %v2351_v62  ;;  %v562_v29 = vsel %vm502_vm8, %v472_v14, %v532_v23  ;;  %vm506_vm10 = vcmp.ge.f32.partialorder %v476_v24, 0.0  ;;  %v536_v30 = vmul.f32 0.2, %v476_v24  ;;  %v477_v31 = vadd.f32 %v2875_v57, %v441_v25  ;;  %v703_v14 = vld [vmem:[%s3644_s3 + $0x3a0] sm:$0xff]  ;;  %v688_v23 = vld [vmem:[%s3644_s3 + $0x328] sm:$0xff] }
  0x5a   : > { %2354 = vmatprep.subr.bf16.mxu0 %v2353_v16  ;;  %v764_v33 = vrot.slane %v562_v29, 1  ;;  %v3012_v34 = vsel %vm504_vm9, %v474_v19, %v534_v26  ;;  %v821_v35 = vrot.slane %v562_v29, 2  ;;  %2380 = vmatpush3.bf16.msra.mxu1 %v2379_v21  ;;  %vm505_vm11 = vcmp.ge.f32.partialorder %v475_v27, 0.0  ;;  %v659_v16 = vld [vmem:[%s3644_s3 + $0x240] sm:$0xff]  ;;  %v660_v21 = vld [vmem:[%s3644_s3 + $0x248] sm:$0xff] }
  0x5b   : > { %978 = vmatmul.mubr.f32.gmra.mrb[4].mxu0 %v2921_v32  ;;  %v767_v36 = vrot.slane %v3012_v34, 1  ;;  %v3016_v37 = vsel %vm506_vm10, %v476_v24, %v536_v30  ;;  %v824_v38 = vrot.slane %v3012_v34, 2  ;;  %v535_v39 = vmul.f32 0.2, %v475_v27  ;;  %v409_v30 = vld [vmem:[#allocation2 + $0x70] sm:$0x3] }
  0x5c   : > { %1123 = vmatmul.mubr.f32.gmra.mrb[4].mxu1 %v2995_v10  ;;  %v3022_v40 = vsel %vm755_vm0, %v762_v59, %v764_v33  ;;  %v3028_v32 = vsel %vm812_vm4, %v819_v61, %v821_v35  ;;  %vm507_vm12 = vcmp.ge.f32.partialorder %v477_v31, 0.0  ;;  %v537_v41 = vmul.f32 0.2, %v477_v31  ;;  %v686_v59 = vld [vmem:[%s3644_s3 + $0x318] sm:$0xff] }
  0x5d   : > { %1127 = vmatprep.mubr.f32.mxu1 %v3012_v34  ;;  %2356 = vmatpush3.bf16.msra.mxu0 %v2355_v20  ;;  %v3038_v44 = vsel %vm755_vm0, %v766_v5, %v767_v36  ;;  %v565_v45 = vsel %vm505_vm11, %v475_v27, %v535_v39  ;;  %v771_v46 = vrot.slane %v3016_v37, 1  ;;  %v479_v54 = vadd.f32 %v2875_v57, %v443_v28  ;;  %v410_v5 = vld [vmem:[#allocation2 + $0x78] sm:$0xff] }
  0x5e   : > { %982 = vmatprep.mubr.f32.mxu0 %v3022_v40  ;;  %v769_v50 = vrot.slane %v565_v45, 1  ;;  %v3052_v52 = vsel %vm507_vm12, %v477_v31, %v537_v41  ;;  %v826_v53 = vrot.slane %v565_v45, 2  ;;  %v828_v61 = vrot.slane %v3016_v37, 2  ;;  %v411_v31 = vld [vmem:[#allocation2 + $0x80] sm:$0xff] }
  0x5f   : > { %983 = vmatmul.mubr.f32.gmra.mrb[6].mxu0 %v2946_v51  ;;  %v772_v51 = vrot.slane %v3052_v52, 1  ;;  %v829_v62 = vrot.slane %v3052_v52, 2  ;;  %v2357_v63 = vpack.c.bf16 %v674_v43, %v673_v42  ;;  %v3073_v2 = vsel %vm812_vm4, %v823_v12, %v824_v38 }
  0x60   : > { %1128 = vmatmul.mubr.f32.gmra.mrb[6].mxu1 %v3028_v32  ;;  %987 = vmatprep.mubr.f32.mxu0 %v3038_v44  ;;  %v3076_v3 = vsel %vm755_vm0, %v767_v36, %v769_v50  ;;  %vm509_vm13 = vcmp.ge.f32.partialorder %v479_v54, 0.0  ;;  %v539_v4 = vmul.f32 0.2, %v479_v54  ;;  %v3085_v9 = vsel %vm812_vm4, %v824_v38, %v826_v53  ;;  %v413_v38 = vld [vmem:[#allocation2 + $0x90] sm:$0xff] }
  0x61   : > { %1132 = vmatprep.mubr.f32.mxu1 %v3016_v37  ;;  %v3090_v11 = vsel %vm755_vm0, %v771_v46, %v772_v51  ;;  %2358 = vmatprep.subr.bf16.mxu0 %v2357_v63  ;;  %v2381_v12 = vpack.c.bf16 %v702_v48, %v701_v47  ;;  %v2359_v13 = vpack.c.bf16 %v658_v55, %v657_v49  ;;  %v677_v55 = vld [vmem:[%s3644_s3 + $0x2d0] sm:$0xff] }
  0x62   : > { %v3105_v17 = vsel %vm812_vm4, %v828_v61, %v829_v62  ;;  %v2383_v18 = vpack.c.bf16 %v686_v59, %v685_v58  ;;  %v442_v19 = vmul.f32 %v2870_v56, %v406_v0  ;;  %v444_v20 = vmul.f32 %v2870_v56, %v408_v1  ;;  %v678_v58 = vld [vmem:[%s3644_s3 + $0x2d8] sm:$0xff]  ;;  %v705_v1 = vld [vmem:[%s3644_s3 + $0x3b0] sm:$0xff] }
  0x63   : > { %988 = vmatmul.mubr.f32.gmra.mrb[8].mxu0 %v2959_v60  ;;  %v3121_v24 = vsel %vm509_vm13, %v479_v54, %v539_v4  ;;  %v446_v25 = vmul.f32 %v2870_v56, %v410_v5  ;;  %v2361_v26 = vpack.c.bf16 %v676_v8, %v675_v7  ;;  %2382 = vmatprep.subr.bf16.mxu1 %v2381_v12  ;;  %v706_v4 = vld [vmem:[%s3644_s3 + $0x3b8] sm:$0xff]  ;;  %v661_v5 = vld [vmem:[%s3644_s3 + $0x250] sm:$0xff] }
  0x64   : > { %1133 = vmatmul.mubr.f32.gmra.mrb[8].mxu1 %v3073_v2  ;;  %992 = vmatprep.mubr.f32.mxu0 %v3076_v3  ;;  %v478_v27 = vadd.f32 %v2875_v57, %v442_v19  ;;  %v480_v28 = vadd.f32 %v2875_v57, %v444_v20  ;;  %v2385_v29 = vpack.c.bf16 %v704_v15, %v703_v14  ;;  %v776_v48 = vrot.slane %v3121_v24, 1  ;;  %v662_v14 = vld [vmem:[%s3644_s3 + $0x258] sm:$0xff]  ;;  %v689_v15 = vld [vmem:[%s3644_s3 + $0x330] sm:$0xff] }
  0x65   : > { %1137 = vmatprep.mubr.f32.mxu1 %v3052_v52  ;;  %2360 = vmatpush3.bf16.msra.mxu0 %v2359_v13  ;;  %v482_v33 = vadd.f32 %v2875_v57, %v446_v25  ;;  %v2363_v35 = vpack.c.bf16 %v660_v21, %v659_v16  ;;  %v2387_v36 = vpack.c.bf16 %v688_v23, %v687_v22  ;;  %v833_v61 = vrot.slane %v3121_v24, 2 }
  0x66   : > { %2384 = vmatpush3.bf16.msra.mxu1 %v2383_v18  ;;  %vm508_vm14 = vcmp.ge.f32.partialorder %v478_v27, 0.0  ;;  %v538_v39 = vmul.f32 0.2, %v478_v27  ;;  %vm510_vm15 = vcmp.ge.f32.partialorder %v480_v28, 0.0  ;;  %v540_v41 = vmul.f32 0.2, %v480_v28  ;;  %2362 = vmatprep.subr.bf16.mxu0 %v2361_v26 }
  0x67   : > { %993 = vmatmul.mubr.f32.gmra.mrb[10].mxu0 %v3012_v34  ;;  %vm512_vm1 = vcmp.ge.f32.partialorder %v482_v33, 0.0  ;;  %v542_v42 = vmul.f32 0.2, %v482_v33  ;;  %v445_v43 = vmul.f32 %v2870_v56, %v409_v30  ;;  %v447_v45 = vmul.f32 %v2870_v56, %v411_v31  ;;  %2386 = vmatprep.subr.bf16.mxu1 %v2385_v29  ;;  %v412_v18 = vld [vmem:[#allocation2 + $0x88] sm:$0x3] }
  0x68   : > { %1138 = vmatmul.mubr.f32.gmra.mrb[10].mxu1 %v3085_v9  ;;  %997 = vmatprep.mubr.f32.mxu0 %v3090_v11  ;;  %v568_v46 = vsel %vm508_vm14, %v478_v27, %v538_v39  ;;  %v3134_v47 = vsel %vm510_vm15, %v480_v28, %v540_v41  ;;  %v449_v49 = vmul.f32 %v2870_v56, %v413_v38  ;;  %v414_v27 = vld [vmem:[#allocation2 + $0x98] sm:$0xff]  ;;  %v416_v31 = vld [vmem:[#allocation2 + $0xa8] sm:$0xff]  ;;  %v679_v39 = vld [vmem:[%s3644_s3 + $0x2e0] sm:$0xff] }
  0x69   : > { %1142 = vmatprep.mubr.f32.mxu1 %v3121_v24  ;;  %v774_v50 = vrot.slane %v568_v46, 1  ;;  %v831_v53 = vrot.slane %v568_v46, 2  ;;  %v777_v54 = vrot.slane %v3134_v47, 1  ;;  %2364 = vmatpush3.bf16.msra.mxu0 %v2363_v35  ;;  %v3147_v59 = vsel %vm512_vm1, %v482_v33, %v542_v42  ;;  %v680_v41 = vld [vmem:[%s3644_s3 + $0x2e8] sm:$0xff]  ;;  %v707_v42 = vld [vmem:[%s3644_s3 + $0x3c0] sm:$0xff] }
  0x6a   : > { %2388 = vmatpush3.bf16.msra.mxu1 %v2387_v36  ;;  %v481_v63 = vadd.f32 %v2875_v57, %v445_v43  ;;  %v483_v0 = vadd.f32 %v2875_v57, %v447_v45  ;;  %v834_v12 = vrot.slane %v3134_v47, 2  ;;  %v485_v13 = vadd.f32 %v2875_v57, %v449_v49  ;;  %v663_v49 = vld [vmem:[%s3644_s3 + $0x260] sm:$0xff] }
  0x6b   : > { %998 = vmatmul.mubr.f32.gmra.mrb[12].mxu0 %v3016_v37  ;;  %v3165_v7 = vsel %vm755_vm0, %v772_v51, %v774_v50  ;;  %v3170_v8 = vsel %vm812_vm4, %v829_v62, %v831_v53  ;;  %v690_v51 = vld [vmem:[%s3644_s3 + $0x338] sm:$0xff]  ;;  %v3186_v62 = vsel %vm755_vm0, %v776_v48, %v777_v54  ;;  %v781_v20 = vrot.slane %v3147_v59, 1  ;;  %v708_v48 = vld [vmem:[%s3644_s3 + $0x3c8] sm:$0xff] }
  0x6c   : > { %1143 = vmatmul.mubr.f32.gmra.mrb[12].mxu1 %v3105_v17  ;;  %1002 = vmatprep.mubr.f32.mxu0 %v3165_v7  ;;  %vm511_vm2 = vcmp.ge.f32.partialorder %v481_v63, 0.0  ;;  %v541_v16 = vmul.f32 0.2, %v481_v63  ;;  %vm513_vm3 = vcmp.ge.f32.partialorder %v483_v0, 0.0  ;;  %v543_v19 = vmul.f32 0.2, %v483_v0 }
  0x6d   : > { %1147 = vmatprep.mubr.f32.mxu1 %v3134_v47  ;;  %vm515_vm5 = vcmp.ge.f32.partialorder %v485_v13, 0.0  ;;  %v545_v21 = vmul.f32 0.2, %v485_v13  ;;  %v2365_v23 = vpack.c.bf16 %v678_v58, %v677_v55  ;;  %v2389_v25 = vpack.c.bf16 %v706_v4, %v705_v1  ;;  %v664_v50 = vld [vmem:[%s3644_s3 + $0x268] sm:$0xff] }
  0x6e   : > { %v571_v22 = vsel %vm511_vm2, %v481_v63, %v541_v16  ;;  %v2367_v26 = vpack.c.bf16 %v662_v14, %v661_v5  ;;  %v3192_v29 = vsel %vm513_vm3, %v483_v0, %v543_v19  ;;  %v3196_v33 = vsel %vm812_vm4, %v833_v61, %v834_v12  ;;  %v691_v61 = vld [vmem:[%s3644_s3 + $0x340] sm:$0xff]  ;;  %v692_v63 = vld [vmem:[%s3644_s3 + $0x348] sm:$0xff] }
  0x6f   : > { %1003 = vmatmul.mubr.f32.gmra.mrb[14].mxu0 %v3052_v52  ;;  %v779_v28 = vrot.slane %v571_v22, 1  ;;  %v836_v30 = vrot.slane %v571_v22, 2  ;;  %v782_v35 = vrot.slane %v3192_v29, 1  ;;  %2366 = vmatprep.subr.bf16.mxu0 %v2365_v23  ;;  %v2391_v36 = vpack.c.bf16 %v690_v51, %v689_v15 }
  0x70   : > { %1148 = vmatmul.mubr.f32.gmra.mrb[14].mxu1 %v3170_v8  ;;  %1007 = vmatprep.mubr.f32.mxu0 %v3186_v62  ;;  %v448_v38 = vmul.f32 %v2870_v56, %v412_v18  ;;  %v3213_v45 = vsel %vm515_vm5, %v485_v13, %v545_v21  ;;  %v450_v46 = vmul.f32 %v2870_v56, %v414_v27  ;;  %v838_v55 = vrot.slane %v3147_v59, 2  ;;  %v417_v13 = vld [vmem:[#allocation2 + $0xb0] sm:$0xff] }
  0x71   : > { %1152 = vmatprep.mubr.f32.mxu1 %v3147_v59  ;;  %v3210_v43 = vsel %vm755_vm0, %v777_v54, %v779_v28  ;;  %2390 = vmatprep.subr.bf16.mxu1 %v2389_v25  ;;  %v3227_v53 = vsel %vm812_vm4, %v834_v12, %v836_v30  ;;  %v3232_v54 = vsel %vm755_vm0, %v781_v20, %v782_v35  ;;  %v839_v0 = vrot.slane %v3192_v29, 2  ;;  %v415_v12 = vld [vmem:[#allocation2 + $0xa0] sm:$0x3]  ;;  %v709_v25 = vld [vmem:[%s3644_s3 + $0x3d0] sm:$0xff] }
  0x72   : > { %2368 = vmatpush3.bf16.msra.mxu0 %v2367_v26  ;;  %2392 = vmatpush3.bf16.msra.mxu1 %v2391_v36  ;;  %v484_v58 = vadd.f32 %v2875_v57, %v448_v38  ;;  %v486_v1 = vadd.f32 %v2875_v57, %v450_v46  ;;  %v452_v4 = vmul.f32 %v2870_v56, %v416_v31  ;;  %v786_v21 = vrot.slane %v3213_v45, 1  ;;  %v710_v26 = vld [vmem:[%s3644_s3 + $0x3d8] sm:$0xff]  ;;  %v693_v36 = vld [vmem:[%s3644_s3 + $0x350] sm:$0xff] }
  0x73   : > { %1008 = vmatmul.mubr.f32.gmra.mrb[16].mxu0 %v3121_v24  ;;  %v2369_v5 = vpack.c.bf16 %v680_v41, %v679_v39  ;;  %v2393_v15 = vpack.c.bf16 %v708_v48, %v707_v42  ;;  %v2371_v51 = vpack.c.bf16 %v664_v50, %v663_v49  ;;  %v2395_v19 = vpack.c.bf16 %v692_v63, %v691_v61  ;;  %v694_v46 = vld [vmem:[%s3644_s3 + $0x358] sm:$0xff]  ;;  %v419_v48 = vld [vmem:[#allocation2 + $0xc0] sm:$0xff] }
  0x74   : > { %1153 = vmatmul.mubr.f32.gmra.mrb[16].mxu1 %v3196_v33  ;;  %1012 = vmatprep.mubr.f32.mxu0 %v3210_v43  ;;  %vm514_vm6 = vcmp.ge.f32.partialorder %v484_v58, 0.0  ;;  %v544_v14 = vmul.f32 0.2, %v484_v58  ;;  %vm516_vm7 = vcmp.ge.f32.partialorder %v486_v1, 0.0  ;;  %v546_v16 = vmul.f32 0.2, %v486_v1 }
  0x75   : > { %1157 = vmatprep.mubr.f32.mxu1 %v3192_v29  ;;  %v488_v18 = vadd.f32 %v2875_v57, %v452_v4  ;;  %2370 = vmatprep.subr.bf16.mxu0 %v2369_v5  ;;  %v451_v22 = vmul.f32 %v2870_v56, %v415_v12  ;;  %v453_v23 = vmul.f32 %v2870_v56, %v417_v13  ;;  %v843_v41 = vrot.slane %v3213_v45, 2  ;;  %v682_v61 = vld [vmem:[%s3644_s3 + $0x2f8] sm:$0xff]  ;;  %v711_v63 = vld [vmem:[%s3644_s3 + $0x3e0] sm:$0xff]  ;;  %v712_v5 = vld [vmem:[%s3644_s3 + $0x3e8] sm:$0xff] }
  0x76   : > { %v574_v20 = vsel %vm514_vm6, %v484_v58, %v544_v14  ;;  %2394 = vmatprep.subr.bf16.mxu1 %v2393_v15  ;;  %v3262_v27 = vsel %vm812_vm4, %v838_v55, %v839_v0  ;;  %v3265_v30 = vsel %vm516_vm7, %v486_v1, %v546_v16  ;;  %2372 = vmatpush3.bf16.msra.mxu0 %v2371_v51  ;;  %v681_v58 = vld [vmem:[%s3644_s3 + $0x2f0] sm:$0xff]  ;;  %v666_v13 = vld [vmem:[%s3644_s3 + $0x278] sm:$0xff]  ;;  %v695_v51 = vld [vmem:[%s3644_s3 + $0x360] sm:$0xff] }
  0x77   : > { %1013 = vmatmul.mubr.f32.gmra.mrb[18].mxu0 %v3134_v47  ;;  %v784_v28 = vrot.slane %v574_v20, 1  ;;  %v841_v31 = vrot.slane %v574_v20, 2  ;;  %v787_v38 = vrot.slane %v3265_v30, 1  ;;  %v548_v39 = vmul.f32 0.2, %v488_v18  ;;  %2396 = vmatpush3.bf16.msra.mxu1 %v2395_v19  ;;  %v665_v12 = vld [vmem:[%s3644_s3 + $0x270] sm:$0xff] }
  0x78   : > { %1158 = vmatmul.mubr.f32.gmra.mrb[18].mxu1 %v3227_v53  ;;  %1017 = vmatprep.mubr.f32.mxu0 %v3232_v54  ;;  %v487_v42 = vadd.f32 %v2875_v57, %v451_v22  ;;  %vm518_vm8 = vcmp.ge.f32.partialorder %v488_v18, 0.0  ;;  %v489_v50 = vadd.f32 %v2875_v57, %v453_v23  ;;  %v2397_v55 = vpack.c.bf16 %v710_v26, %v709_v25  ;;  %v418_v22 = vld [vmem:[#allocation2 + $0xb8] sm:$0x3]  ;;  %v420_v23 = vld [vmem:[#allocation2 + $0xc8] sm:$0xff] }
  0x79   : > { %1162 = vmatprep.mubr.f32.mxu1 %v3213_v45  ;;  %v3280_v49 = vsel %vm755_vm0, %v782_v35, %v784_v28  ;;  %v3294_v35 = vsel %vm812_vm4, %v839_v0, %v841_v31  ;;  %v3297_v1 = vsel %vm755_vm0, %v786_v21, %v787_v38  ;;  %v844_v4 = vrot.slane %v3265_v30, 2  ;;  %v696_v21 = vld [vmem:[%s3644_s3 + $0x368] sm:$0xff] }
  0x7a   : > { %vm517_vm9 = vcmp.ge.f32.partialorder %v487_v42, 0.0  ;;  %v547_v0 = vmul.f32 0.2, %v487_v42  ;;  %vm519_vm10 = vcmp.ge.f32.partialorder %v489_v50, 0.0  ;;  %v549_v14 = vmul.f32 0.2, %v489_v50  ;;  %2398 = vmatprep.subr.bf16.mxu1 %v2397_v55 }
  0x7b   : > { %1018 = vmatmul.mubr.f32.gmra.mrb[20].mxu0 %v3147_v59  ;;  %v2399_v15 = vpack.c.bf16 %v694_v46, %v693_v36  ;;  %v3316_v16 = vsel %vm518_vm8, %v488_v18, %v548_v39  ;;  %v455_v19 = vmul.f32 %v2870_v56, %v419_v48  ;;  %v2373_v20 = vpack.c.bf16 %v682_v61, %v681_v58  ;;  %v714_v46 = vld [vmem:[%s3644_s3 + $0x3f8] sm:$0xff]  ;;  %v697_v48 = vld [vmem:[%s3644_s3 + $0x370] sm:$0xff]  ;;  %v715_v61 = vld [vmem:[%s3644_s3 + $0x400] sm:$0xff] }
  0x7c   : > { %1163 = vmatmul.mubr.f32.gmra.mrb[20].mxu1 %v3262_v27  ;;  %1022 = vmatprep.mubr.f32.mxu0 %v3280_v49  ;;  %v577_v25 = vsel %vm517_vm9, %v487_v42, %v547_v0  ;;  %v3323_v26 = vsel %vm519_vm10, %v489_v50, %v549_v14  ;;  %v2401_v28 = vpack.c.bf16 %v712_v5, %v711_v63  ;;  %v713_v42 = vld [vmem:[%s3644_s3 + $0x3f0] sm:$0xff]  ;;  %v698_v58 = vld [vmem:[%s3644_s3 + $0x378] sm:$0xff]  ;;  %v716_v63 = vld [vmem:[%s3644_s3 + $0x408] sm:$0xff] }
  0x7d   : > { %1167 = vmatprep.mubr.f32.mxu1 %v3265_v30  ;;  %2400 = vmatpush3.bf16.msra.mxu1 %v2399_v15  ;;  %v2375_v31 = vpack.c.bf16 %v666_v13, %v665_v12  ;;  %v3329_v18 = vsel %vm812_vm4, %v843_v41, %v844_v4  ;;  %v789_v36 = vrot.slane %v577_v25, 1  ;;  %v491_v39 = vadd.f32 %v2875_v57, %v455_v19 }
  0x7e   : > { %2374 = vmatprep.subr.bf16.mxu0 %v2373_v20  ;;  %v2403_v41 = vpack.c.bf16 %v696_v21, %v695_v51  ;;  %v454_v50 = vmul.f32 %v2870_v56, %v418_v22  ;;  %v456_v55 = vmul.f32 %v2870_v56, %v420_v23  ;;  %v846_v12 = vrot.slane %v577_v25, 2  ;;  %2402 = vmatprep.subr.bf16.mxu1 %v2401_v28 }
  0x7f   : > { %1023 = vmatmul.mubr.f32.gmra.mrb[22].mxu0 %v3192_v29  ;;  %v3356_v5 = vsel %vm755_vm0, %v787_v38, %v789_v36  ;;  %v791_v56 = vrot.slane %v3316_v16, 1  ;;  %v792_v13 = vrot.slane %v3323_v26, 1  ;;  %v551_v0 = vmul.f32 0.2, %v491_v39 }
  0x80   : > { %1168 = vmatmul.mubr.f32.gmra.mrb[22].mxu1 %v3294_v35  ;;  %1027 = vmatprep.mubr.f32.mxu0 %v3297_v1  ;;  %v490_v14 = vadd.f32 %v2875_v57, %v454_v50  ;;  %v492_v15 = vadd.f32 %v2875_v57, %v456_v55  ;;  %vm521_vm11 = vcmp.ge.f32.partialorder %v491_v39, 0.0  ;;  %v2405_v51 = vpack.c.bf16 %v714_v46, %v713_v42  ;;  %v718_v50 = vld [vmem:[%s3644_s3 + $0x418] sm:$0xff] }
  0x81   : > { %1172 = vmatprep.mubr.f32.mxu1 %v3316_v16  ;;  %2376 = vmatpush3.bf16.msra.mxu0 %v2375_v31  ;;  %v2407_v19 = vpack.c.bf16 %v698_v58, %v697_v48  ;;  %v2409_v38 = vpack.c.bf16 %v716_v63, %v715_v61  ;;  %v3369_v21 = vsel %vm812_vm4, %v844_v4, %v846_v12  ;;  %v848_v22 = vrot.slane %v3316_v16, 2  ;;  %v719_v58 = vld [vmem:[%s3644_s3 + $0x420] sm:$0xff]  ;;  %v720_v61 = vld [vmem:[%s3644_s3 + $0x428] sm:$0xff]  ;;  %v722_v63 = vld [vmem:[%s3644_s3 + $0x438] sm:$0xff] }
  0x82   : > { %2404 = vmatpush3.bf16.msra.mxu1 %v2403_v41  ;;  %vm520_vm12 = vcmp.ge.f32.partialorder %v490_v14, 0.0  ;;  %v550_v20 = vmul.f32 0.2, %v490_v14  ;;  %v3372_v57 = vsel %vm755_vm0, %v791_v56, %v792_v13  ;;  %v849_v23 = vrot.slane %v3323_v26, 2  ;;  %v717_v41 = vld [vmem:[%s3644_s3 + $0x410] sm:$0xff]  ;;  %v726_v12 = vld [vmem:[%s3644_s3 + $0x458] sm:$0xff] }
  0x83   : > { %1028 = vmatmul.mubr.f32.gmra.mrb[24].mxu0 %v3213_v45  ;;  %2406 = vmatprep.subr.bf16.mxu1 %v2405_v51  ;;  %v3376_v25 = vsel %vm521_vm11, %v491_v39, %v551_v0  ;;  %v552_v31 = vmul.f32 0.2, %v492_v15  ;;  %vm522_vm13 = vcmp.ge.f32.partialorder %v492_v15, 0.0  ;;  %v2413_v55 = vpack.c.bf16 %v718_v50, %v717_v41  ;;  %v728_v56 = vld [vmem:[%s3644_s3 + $0x468] sm:$0xff] }
  0x84   : > { %1173 = vmatmul.mubr.f32.gmra.mrb[24].mxu1 %v3329_v18  ;;  %1032 = vmatprep.mubr.f32.mxu0 %v3356_v5  ;;  %v580_v28 = vsel %vm520_vm12, %v490_v14, %v550_v20  ;;  %v3383_v4 = vsel %vm812_vm4, %v848_v22, %v849_v23 }
  0x85   : > { %1177 = vmatprep.mubr.f32.mxu1 %v3323_v26  ;;  %2410 = vmatprep.subr.bf16.mxu0 %v2409_v38  ;;  %v794_v36 = vrot.slane %v580_v28, 1  ;;  %v851_v42 = vrot.slane %v580_v28, 2  ;;  %v3388_v46 = vsel %vm522_vm13, %v492_v15, %v552_v31 }
  0x86   : > { %2408 = vmatpush3.bf16.msra.mxu1 %v2407_v19  ;;  %v873_v22 = vrot.slane %v3388_v46, 1  ;;  %v880_v50 = vrot.slane %v3388_v46, 2 }
  0x87   : > { %1033 = vmatmul.mubr.f32.gmra.mrb[26].mxu0 %v3265_v30  ;;  %2441 = vmatprep.subr.bf16.mxu1 %v2409_v38  ;;  %v3386_v39 = vsel %vm755_vm0, %v792_v13, %v794_v36  ;;  %v3395_v48 = vsel %vm812_vm4, %v849_v23, %v851_v42  ;;  %v730_v13 = vld [vmem:[%s3644_s3 + $0x478] sm:$0xff] }
  0x88   : > { %1178 = vmatmul.mubr.f32.gmra.mrb[26].mxu1 %v3369_v21  ;;  %1037 = vmatprep.mubr.f32.mxu0 %v3372_v57 }
  0x89   : > { %1182 = vmatprep.mubr.f32.mxu1 %v3376_v25 }
  0x8b   : > { %1038 = vmatmul.mubr.f32.gmra.mrb[28].mxu0 %v3316_v16 }
  0x8c   : > { %1183 = vmatmul.mubr.f32.gmra.mrb[28].mxu1 %v3383_v4  ;;  %1042 = vmatprep.mubr.f32.mxu0 %v3386_v39 }
  0x8d   : > { %1187 = vmatprep.mubr.f32.mxu1 %v3388_v46 }
  0x8f   : > { %1043 = vmatmul.mubr.f32.gmra.mrb[30].mxu0 %v3323_v26 }
  0x90   : > { %1188 = vmatmul.mubr.f32.gmra.mrb[30].mxu1 %v3395_v48  ;;  %1257 = vmatprep.mubr.f32.mxu0 %v2995_v10  ;;  %v2417_v10 = vpack.c.bf16 %v720_v61, %v719_v58 }
  0x91   : > { %1402 = vmatprep.mubr.f32.mxu1 %v3038_v44 }
  0x93   : > { %1258 = vmatmul.mubr.f32.vlgmr.msra.gmra.mrb[32].mxu0 %v2990_v6  ;;  %v721_v6 = vld [vmem:[%s3644_s3 + $0x430] sm:$0xff] }
  0x94   : > { %1403 = vmatmul.mubr.f32.vlgmr.msra.gmra.mrb[32].mxu1 %v2959_v60  ;;  %2412 = vmatpush3.bf16.msra.mxu0 %v2409_v38  ;;  %v2421_v60 = vpack.c.bf16 %v722_v63, %v721_v6 }
  0x95   : > { %1262 = vmatprep.mubr.f32.mxu0 %v3028_v32  ;;  %1407 = vmatprep.mubr.f32.mxu1 %v3076_v3  ;;  %v724_v32 = vld [vmem:[%s3644_s3 + $0x448] sm:$0xff] }
  0x96   : > { %2414 = vmatprep.subr.bf16.mxu0 %v2413_v55  ;;  %2449 = vmatpush3.bf16.msra.mxu1 %v2409_v38 }
  0x97   : > { %1263 = vmatmul.mubr.f32.gmra.mrb[34].mxu0 %v3022_v40  ;;  %2442 = vmatprep.subr.bf16.mxu1 %v2413_v55  ;;  %v723_v40 = vld [vmem:[%s3644_s3 + $0x440] sm:$0xff] }
  0x98   : > { %1408 = vmatmul.mubr.f32.gmra.mrb[34].mxu1 %v3012_v34  ;;  %1267 = vmatprep.mubr.f32.mxu0 %v3073_v2  ;;  %v2425_v34 = vpack.c.bf16 %v724_v32, %v723_v40 }
  0x99   : > { %1412 = vmatprep.mubr.f32.mxu1 %v3090_v11  ;;  %2416 = vmatpush3.bf16.msra.mxu0 %v2413_v55 }
  0x9a   : > { %2418 = vmatprep.subr.bf16.mxu0 %v2417_v10  ;;  %2450 = vmatpush3.bf16.msra.mxu1 %v2413_v55 }
  0x9b   : > { %1268 = vmatmul.mubr.f32.gmra.mrb[36].mxu0 %v3038_v44  ;;  %2443 = vmatprep.subr.bf16.mxu1 %v2417_v10  ;;  %v725_v44 = vld [vmem:[%s3644_s3 + $0x450] sm:$0xff] }
  0x9c   : > { %1413 = vmatmul.mubr.f32.gmra.mrb[36].mxu1 %v3016_v37  ;;  %1272 = vmatprep.mubr.f32.mxu0 %v3085_v9  ;;  %v2429_v37 = vpack.c.bf16 %v726_v12, %v725_v44 }
  0x9d   : > { %1417 = vmatprep.mubr.f32.mxu1 %v3165_v7  ;;  %2420 = vmatpush3.bf16.msra.mxu0 %v2417_v10 }
  0x9e   : > { %2422 = vmatprep.subr.bf16.mxu0 %v2421_v60  ;;  %2451 = vmatpush3.bf16.msra.mxu1 %v2417_v10 }
  0x9f   : > { %1273 = vmatmul.mubr.f32.gmra.mrb[38].mxu0 %v3076_v3  ;;  %2444 = vmatprep.subr.bf16.mxu1 %v2421_v60  ;;  %v727_v3 = vld [vmem:[%s3644_s3 + $0x460] sm:$0xff] }
  0xa0   : > { %1418 = vmatmul.mubr.f32.gmra.mrb[38].mxu1 %v3052_v52  ;;  %1277 = vmatprep.mubr.f32.mxu0 %v3105_v17  ;;  %v2433_v52 = vpack.c.bf16 %v728_v56, %v727_v3 }
  0xa1   : > { %1422 = vmatprep.mubr.f32.mxu1 %v3186_v62  ;;  %2424 = vmatpush3.bf16.msra.mxu0 %v2421_v60 }
  0xa2   : > { %2426 = vmatprep.subr.bf16.mxu0 %v2425_v34  ;;  %2452 = vmatpush3.bf16.msra.mxu1 %v2421_v60 }
  0xa3   : > { %1278 = vmatmul.mubr.f32.gmra.mrb[40].mxu0 %v3090_v11  ;;  %2445 = vmatprep.subr.bf16.mxu1 %v2425_v34  ;;  %v729_v11 = vld [vmem:[%s3644_s3 + $0x470] sm:$0xff] }
  0xa4   : > { %1423 = vmatmul.mubr.f32.gmra.mrb[40].mxu1 %v3121_v24  ;;  %1282 = vmatprep.mubr.f32.mxu0 %v3170_v8  ;;  %v2437_v24 = vpack.c.bf16 %v730_v13, %v729_v11 }
  0xa5   : > { %1427 = vmatprep.mubr.f32.mxu1 %v3210_v43  ;;  %2428 = vmatpush3.bf16.msra.mxu0 %v2425_v34 }
  0xa6   : > { %2430 = vmatprep.subr.bf16.mxu0 %v2429_v37  ;;  %2453 = vmatpush3.bf16.msra.mxu1 %v2425_v34 }
  0xa7   : > { %1283 = vmatmul.mubr.f32.gmra.mrb[42].mxu0 %v3165_v7  ;;  %2446 = vmatprep.subr.bf16.mxu1 %v2429_v37  ;;  %v421_v7 = vld [vmem:[#allocation2 + $0xd0] sm:$0x3] }
  0xa8   : > { %1428 = vmatmul.mubr.f32.gmra.mrb[42].mxu1 %v3134_v47  ;;  %1287 = vmatprep.mubr.f32.mxu0 %v3196_v33  ;;  %v2498_v47 = vld [vmem:[%s3642_s1] ss:$0 sm:$0xff] }
  0xa9   : > { %1432 = vmatprep.mubr.f32.mxu1 %v3232_v54  ;;  %2432 = vmatpush3.bf16.msra.mxu0 %v2429_v37  ;;  %v457_v0 = vmul.f32 %v2498_v47, %v421_v7 }
  0xaa   : > { %2434 = vmatprep.subr.bf16.mxu0 %v2433_v52  ;;  %2454 = vmatpush3.bf16.msra.mxu1 %v2429_v37 }
  0xab   : > { %1288 = vmatmul.mubr.f32.gmra.mrb[44].mxu0 %v3186_v62  ;;  %2447 = vmatprep.subr.bf16.mxu1 %v2433_v52  ;;  %v423_v62 = vld [vmem:[#allocation2 + $0xe0] sm:$0xff] }
  0xac   : > { %1433 = vmatmul.mubr.f32.gmra.mrb[44].mxu1 %v3147_v59  ;;  %1292 = vmatprep.mubr.f32.mxu0 %v3227_v53  ;;  %v422_v59 = vld [vmem:[#allocation2 + $0xd8] sm:$0xff]  ;;  %v459_v51 = vmul.f32 %v2498_v47, %v423_v62 }
  0xad   : > { %1437 = vmatprep.mubr.f32.mxu1 %v3280_v49  ;;  %2436 = vmatpush3.bf16.msra.mxu0 %v2433_v52  ;;  %v458_v15 = vmul.f32 %v2498_v47, %v422_v59 }
  0xae   : > { %2438 = vmatprep.subr.bf16.mxu0 %v2437_v24  ;;  %2455 = vmatpush3.bf16.msra.mxu1 %v2433_v52 }
  0xaf   : > { %1293 = vmatmul.mubr.f32.gmra.mrb[46].mxu0 %v3210_v43  ;;  %2448 = vmatprep.subr.bf16.mxu1 %v2437_v24  ;;  %v2499_v43 = vld [vmem:[%s3643_s2] ss:$0 sm:$0xff] }
  0xb0   : > { %1438 = vmatmul.mubr.f32.gmra.mrb[46].mxu1 %v3192_v29  ;;  %1297 = vmatprep.mubr.f32.mxu0 %v3262_v27  ;;  %v493_v14 = vadd.f32 %v2499_v43, %v457_v0  ;;  %v424_v29 = vld [vmem:[#allocation2 + $0xe8] sm:$0x3]  ;;  %v494_v38 = vadd.f32 %v2499_v43, %v458_v15  ;;  %v495_v20 = vadd.f32 %v2499_v43, %v459_v51 }
  0xb1   : > { %1442 = vmatprep.mubr.f32.mxu1 %v3297_v1  ;;  %2440 = vmatpush3.bf16.msra.mxu0 %v2437_v24 }
  0xb2   : > { %2456 = vmatpush3.bf16.msra.mxu1 %v2437_v24  ;;  %v553_v19 = vmul.f32 0.2, %v493_v14  ;;  %vm523_vm14 = vcmp.ge.f32.partialorder %v493_v14, 0.0  ;;  %v554_v28 = vmul.f32 0.2, %v494_v38  ;;  %vm524_vm15 = vcmp.ge.f32.partialorder %v494_v38, 0.0 }
  0xb3   : > { %1298 = vmatmul.mubr.f32.gmra.mrb[48].mxu0 %v3232_v54  ;;  %v460_v54 = vmul.f32 %v2498_v47, %v424_v29  ;;  %vm525_vm1 = vcmp.ge.f32.partialorder %v495_v20, 0.0 }
  0xb4   : > { %1443 = vmatmul.mubr.f32.gmra.mrb[48].mxu1 %v3213_v45  ;;  %1302 = vmatprep.mubr.f32.mxu0 %v3294_v35  ;;  %v872_v45 = vrot.slane %v3376_v25, 1  ;;  %v583_v23 = vsel %vm523_vm14, %v493_v14, %v553_v19  ;;  %v584_v42 = vsel %vm524_vm15, %v494_v38, %v554_v28 }
  0xb5   : > { %1447 = vmatprep.mubr.f32.mxu1 %v3356_v5  ;;  %v496_v31 = vadd.f32 %v2499_v43, %v460_v54  ;;  %v875_v36 = vrot.slane %v583_v23, 1  ;;  %v889_v58 = vrot.slane %v584_v42, 1  ;;  %v882_v10 = vrot.slane %v583_v23, 2 }
  0xb7   : > { %1303 = vmatmul.mubr.f32.gmra.mrb[50].mxu0 %v3280_v49  ;;  %v555_v49 = vmul.f32 0.2, %v495_v20  ;;  %vm526_vm2 = vcmp.ge.f32.partialorder %v496_v31, 0.0  ;;  %v876_v55 = vsel %vm755_vm0, %v873_v22, %v875_v36 }
  0xb8   : > { %1448 = vmatmul.mubr.f32.gmra.mrb[50].mxu1 %v3265_v30  ;;  %1307 = vmatprep.mubr.f32.mxu0 %v3329_v18  ;;  %v874_v30 = vsel %vm755_vm0, %v872_v45, %v873_v22 }
  0xb9   : > { %1452 = vmatprep.mubr.f32.mxu1 %v3372_v57  ;;  %v585_v41 = vsel %vm525_vm1, %v495_v20, %v555_v49 }
  0xba   : > { %v890_v61 = vrot.slane %v585_v41, 1 }
  0xbb   : > { %1308 = vmatmul.mubr.f32.gmra.mrb[52].mxu0 %v3297_v1  ;;  %v556_v1 = vmul.f32 0.2, %v496_v31 }
  0xbc   : > { %1453 = vmatmul.mubr.f32.gmra.mrb[52].mxu1 %v3316_v16  ;;  %1312 = vmatprep.mubr.f32.mxu0 %v3369_v21  ;;  %v879_v16 = vrot.slane %v3376_v25, 2  ;;  %v891_v6 = vsel %vm755_vm0, %v889_v58, %v890_v61 }
  0xbd   : > { %1457 = vmatprep.mubr.f32.mxu1 %v3386_v39 }
  0xbf   : > { %1313 = vmatmul.mubr.f32.gmra.mrb[54].mxu0 %v3356_v5  ;;  %v586_v5 = vsel %vm526_vm2, %v496_v31, %v556_v1 }
  0xc0   : > { %1458 = vmatmul.mubr.f32.gmra.mrb[54].mxu1 %v3323_v26  ;;  %1317 = vmatprep.mubr.f32.mxu0 %v3383_v4  ;;  %v881_v26 = vsel %vm812_vm4, %v879_v16, %v880_v50  ;;  %v892_v63 = vrot.slane %v586_v5, 1 }
  0xc1   : > { %1462 = vmatprep.mubr.f32.mxu1 %v874_v30 }
  0xc2   : > { %v893_v60 = vsel %vm755_vm0, %v890_v61, %v892_v63 }
  0xc3   : > { %1318 = vmatmul.mubr.f32.gmra.mrb[56].mxu0 %v3372_v57  ;;  %v883_v57 = vsel %vm812_vm4, %v880_v50, %v882_v10 }
  0xc4   : > { %1463 = vmatmul.mubr.f32.gmra.mrb[56].mxu1 %v3376_v25  ;;  %1322 = vmatprep.mubr.f32.mxu0 %v3395_v48  ;;  %v896_v25 = vrot.slane %v584_v42, 2 }
  0xc5   : > { %1467 = vmatprep.mubr.f32.mxu1 %v876_v55 }
  0xc7   : > { %1323 = vmatmul.mubr.f32.gmra.mrb[58].mxu0 %v3386_v39  ;;  %v897_v39 = vrot.slane %v585_v41, 2 }
  0xc8   : > { %1468 = vmatmul.mubr.f32.gmra.mrb[58].mxu1 %v3388_v46  ;;  %1327 = vmatprep.mubr.f32.mxu0 %v881_v26 }
  0xc9   : > { %1472 = vmatprep.mubr.f32.mxu1 %v891_v6 }
  0xcb   : > { %1328 = vmatmul.mubr.f32.gmra.mrb[60].mxu0 %v874_v30 }
  0xcc   : > { %1473 = vmatmul.mubr.f32.gmra.mrb[60].mxu1 %v584_v42  ;;  %1332 = vmatprep.mubr.f32.mxu0 %v883_v57 }
  0xcd   : > { %1477 = vmatprep.mubr.f32.mxu1 %v893_v60 }
  0xcf   : > { %1333 = vmatmul.mubr.f32.gmra.mrb[62].mxu0 %v876_v55 }
  0xd0   : > { %1478 = vmatmul.mubr.f32.gmra.mrb[62].mxu1 %v585_v41  ;;  %2257 = vmatprep.mubr.f32.mxu0 %v3073_v2  ;;  %v899_v2 = vrot.slane %v586_v5, 2 }
  0xd1   : > { %2269 = vmatprep.mubr.f32.mxu1 %v3329_v18  ;;  %v898_v18 = vsel %vm812_vm4, %v896_v25, %v897_v39 }
  0xd3   : > { %2258 = vmatmul.mubr.f32.vlgmr.msra.gmra.mrb[64].mxu0 %v3085_v9  ;;  %v900_v9 = vsel %vm812_vm4, %v897_v39, %v899_v2 }
  0xd4   : > { %2270 = vmatmul.mubr.f32.vlgmr.msra.gmra.mrb[64].mxu1 %v3369_v21  ;;  %2260 = vmatprep.mubr.f32.mxu0 %v3105_v17 }
  0xd5   : > { %2272 = vmatprep.mubr.f32.mxu1 %v3383_v4 }
  0xd7   : > { %2261 = vmatmul.mubr.f32.gmra.mrb[66].mxu0 %v3170_v8 }
  0xd8   : > { %2273 = vmatmul.mubr.f32.gmra.mrb[66].mxu1 %v3395_v48  ;;  %2263 = vmatprep.mubr.f32.mxu0 %v3196_v33 }
  0xd9   : > { %2275 = vmatprep.mubr.f32.mxu1 %v881_v26 }
  0xdb   : > { %2264 = vmatmul.mubr.f32.gmra.mrb[68].mxu0 %v3227_v53 }
  0xdc   : > { %2276 = vmatmul.mubr.f32.gmra.mrb[68].mxu1 %v883_v57  ;;  %2266 = vmatprep.mubr.f32.mxu0 %v3262_v27 }
  0xdd   : > { %2278 = vmatprep.mubr.f32.mxu1 %v898_v18 }
  0xdf   : > { %2267 = vmatmul.mubr.f32.gmra.mrb[70].mxu0 %v3294_v35 }
  0xe0   : > { %2279 = vmatmul.mubr.f32.gmra.mrb[70].mxu1 %v900_v9 }
 0x126   : > { %v1905_v17 = vpop.f32.mrb[0].mxu0 }
 0x127   : > { %v1985_v8 = vpop.f32.mrb[0].mxu1  ;;  %v1906_v21 = vpop.f32.mrb[1].mxu0 }
 0x128   : > { %v1907_v4 = vadd.f32 %v1906_v21, %v1905_v17  ;;  %v1986_v33 = vpop.f32.mrb[1].mxu1 }
 0x129   : > { %v1987_v46 = vadd.f32 %v1986_v33, %v1985_v8 }
 0x12a   : > { %v1908_v48 = vpop.f32.mrb[2].mxu0 }
 0x12b   : > { %v3525_v40 = vadd.f32 %v1987_v46, %v1907_v4  ;;  %v1988_v32 = vpop.f32.mrb[2].mxu1  ;;  %v1909_v53 = vpop.f32.mrb[3].mxu0 }
 0x12c   : > { %v1910_v34 = vadd.f32 %v1909_v53, %v1908_v48  ;;  %v1989_v44 = vpop.f32.mrb[3].mxu1 }
 0x12d   : > { %v1990_v27 = vadd.f32 %v1989_v44, %v1988_v32 }
 0x12e   : > { %v1911_v12 = vpop.f32.mrb[4].mxu0 }
 0x12f   : > { %v3527_v37 = vadd.f32 %v1990_v27, %v1910_v34  ;;  %v1991_v3 = vpop.f32.mrb[4].mxu1  ;;  %v1912_v35 = vpop.f32.mrb[5].mxu0 }
 0x130   : > { %v1913_v56 = vadd.f32 %v1912_v35, %v1911_v12  ;;  %v1992_v52 = vpop.f32.mrb[5].mxu1 }
 0x131   : > { %v1993_v11 = vadd.f32 %v1992_v52, %v1991_v3 }
 0x132   : > { %v1914_v13 = vpop.f32.mrb[6].mxu0 }
 0x133   : > { %v3529_v24 = vadd.f32 %v1993_v11, %v1913_v56  ;;  %v1994_v7 = vpop.f32.mrb[6].mxu1  ;;  %v1915_v47 = vpop.f32.mrb[7].mxu0 }
 0x134   : > { %v1916_v0 = vadd.f32 %v1915_v47, %v1914_v13  ;;  %v1995_v59 = vpop.f32.mrb[7].mxu1 }
 0x135   : > { %v1996_v62 = vadd.f32 %v1995_v59, %v1994_v7 }
 0x136   : > { %v1917_v43 = vpop.f32.mrb[8].mxu0 }
 0x137   : > { %v3531_v14 = vadd.f32 %v1996_v62, %v1916_v0  ;;  %v1997_v15 = vpop.f32.mrb[8].mxu1  ;;  %v1918_v51 = vpop.f32.mrb[9].mxu0 }
 0x138   : > { %v1919_v29 = vadd.f32 %v1918_v51, %v1917_v43  ;;  %v1998_v19 = vpop.f32.mrb[9].mxu1 }
 0x139   : > { %v1999_v38 = vadd.f32 %v1998_v19, %v1997_v15 }
 0x13a   : > { %v1920_v20 = vpop.f32.mrb[10].mxu0 }
 0x13b   : > { %v3533_v54 = vadd.f32 %v1999_v38, %v1919_v29  ;;  %v2000_v45 = vpop.f32.mrb[10].mxu1  ;;  %v1921_v22 = vpop.f32.mrb[11].mxu0 }
 0x13c   : > { %v1922_v23 = vadd.f32 %v1921_v22, %v1920_v20  ;;  %v2001_v28 = vpop.f32.mrb[11].mxu1 }
 0x13d   : > { %v2002_v49 = vadd.f32 %v2001_v28, %v2000_v45 }
 0x13e   : > { %v1923_v31 = vpop.f32.mrb[12].mxu0 }
 0x13f   : > { %v3535_v30 = vadd.f32 %v2002_v49, %v1922_v23  ;;  %v2003_v36 = vpop.f32.mrb[12].mxu1  ;;  %v1924_v42 = vpop.f32.mrb[13].mxu0 }
 0x140   : > { %v1925_v41 = vadd.f32 %v1924_v42, %v1923_v31  ;;  %v2004_v1 = vpop.f32.mrb[13].mxu1 }
 0x141   : > { %v2005_v16 = vadd.f32 %v2004_v1, %v2003_v36 }
 0x142   : > { %v1926_v50 = vpop.f32.mrb[14].mxu0 }
 0x143   : > { %v3537_v55 = vadd.f32 %v2005_v16, %v1925_v41  ;;  %v2006_v58 = vpop.f32.mrb[14].mxu1  ;;  %v1927_v61 = vpop.f32.mrb[15].mxu0 }
 0x144   : > { %v1928_v5 = vadd.f32 %v1927_v61, %v1926_v50  ;;  %v2007_v26 = vpop.f32.mrb[15].mxu1 }
 0x145   : > { %v2008_v10 = vadd.f32 %v2007_v26, %v2006_v58 }
 0x146   : > { %v1929_v6 = vpop.f32.mrb[16].mxu0 }
 0x147   : > { %v3539_v63 = vadd.f32 %v2008_v10, %v1928_v5  ;;  %v2009_v57 = vpop.f32.mrb[16].mxu1  ;;  %v1930_v60 = vpop.f32.mrb[17].mxu0 }
 0x148   : > { %v1931_v25 = vadd.f32 %v1930_v60, %v1929_v6  ;;  %v2010_v39 = vpop.f32.mrb[17].mxu1 }
 0x149   : > { %v2011_v2 = vadd.f32 %v2010_v39, %v2009_v57 }
 0x14a   : > { %v1932_v18 = vpop.f32.mrb[18].mxu0 }
 0x14b   : > { %v3541_v9 = vadd.f32 %v2011_v2, %v1931_v25  ;;  %v2012_v17 = vpop.f32.mrb[18].mxu1  ;;  %v1933_v8 = vpop.f32.mrb[19].mxu0 }
 0x14c   : > { %v1934_v21 = vadd.f32 %v1933_v8, %v1932_v18  ;;  %v2013_v4 = vpop.f32.mrb[19].mxu1 }
 0x14d   : > { %v2014_v33 = vadd.f32 %v2013_v4, %v2012_v17 }
 0x14e   : > { %v1935_v46 = vpop.f32.mrb[20].mxu0 }
 0x14f   : > { %v3543_v48 = vadd.f32 %v2014_v33, %v1934_v21  ;;  %v2015_v32 = vpop.f32.mrb[20].mxu1  ;;  %v1936_v53 = vpop.f32.mrb[21].mxu0 }
 0x150   : > { %v1937_v34 = vadd.f32 %v1936_v53, %v1935_v46  ;;  %v2016_v44 = vpop.f32.mrb[21].mxu1 }
 0x151   : > { %v2017_v27 = vadd.f32 %v2016_v44, %v2015_v32 }
 0x152   : > { %v1938_v12 = vpop.f32.mrb[22].mxu0 }
 0x153   : > { %v3545_v3 = vadd.f32 %v2017_v27, %v1937_v34  ;;  %v2018_v35 = vpop.f32.mrb[22].mxu1  ;;  %v1939_v56 = vpop.f32.mrb[23].mxu0 }
 0x154   : > { %v1940_v52 = vadd.f32 %v1939_v56, %v1938_v12  ;;  %v2019_v11 = vpop.f32.mrb[23].mxu1 }
 0x155   : > { %v2020_v13 = vadd.f32 %v2019_v11, %v2018_v35 }
 0x156   : > { %v1941_v7 = vpop.f32.mrb[24].mxu0 }
 0x157   : > { %v3547_v47 = vadd.f32 %v2020_v13, %v1940_v52  ;;  %v2021_v0 = vpop.f32.mrb[24].mxu1  ;;  %v1942_v59 = vpop.f32.mrb[25].mxu0 }
 0x158   : > { %v1943_v62 = vadd.f32 %v1942_v59, %v1941_v7  ;;  %v2022_v43 = vpop.f32.mrb[25].mxu1 }
 0x159   : > { %v2023_v15 = vadd.f32 %v2022_v43, %v2021_v0 }
 0x15a   : > { %v1944_v51 = vpop.f32.mrb[26].mxu0 }
 0x15b   : > { %v3549_v29 = vadd.f32 %v2023_v15, %v1943_v62  ;;  %v2024_v19 = vpop.f32.mrb[26].mxu1  ;;  %v1945_v38 = vpop.f32.mrb[27].mxu0 }
 0x15c   : > { %v1946_v20 = vadd.f32 %v1945_v38, %v1944_v51  ;;  %v2025_v45 = vpop.f32.mrb[27].mxu1 }
 0x15d   : > { %v2026_v22 = vadd.f32 %v2025_v45, %v2024_v19 }
 0x15e   : > { %v1947_v23 = vpop.f32.mrb[28].mxu0 }
 0x15f   : > { %v3551_v28 = vadd.f32 %v2026_v22, %v1946_v20  ;;  %v2027_v49 = vpop.f32.mrb[28].mxu1  ;;  %v1948_v31 = vpop.f32.mrb[29].mxu0 }
 0x160   : > { %v1949_v36 = vadd.f32 %v1948_v31, %v1947_v23  ;;  %v2028_v42 = vpop.f32.mrb[29].mxu1 }
 0x161   : > { %v2029_v41 = vadd.f32 %v2028_v42, %v2027_v49 }
 0x162   : > { %v1950_v1 = vpop.f32.mrb[30].mxu0 }
 0x163   : > { %v3553_v16 = vadd.f32 %v2029_v41, %v1949_v36  ;;  %v2030_v50 = vpop.f32.mrb[30].mxu1  ;;  %v1951_v58 = vpop.f32.mrb[31].mxu0 }
 0x164   : > { %v1952_v61 = vadd.f32 %v1951_v58, %v1950_v1  ;;  %v2031_v5 = vpop.f32.mrb[31].mxu1 }
 0x165   : > { %v2032_v26 = vadd.f32 %v2031_v5, %v2030_v50 }
 0x166   : > { %v2065_v10 = vpop.f32.mrb[32].mxu0 }
 0x167   : > { %v3555_v6 = vadd.f32 %v2032_v26, %v1952_v61  ;;  %v2066_v57 = vpop.f32.mrb[33].mxu0  ;;  %v2145_v60 = vpop.f32.mrb[32].mxu1 }
 0x168   : > { %v2067_v25 = vadd.f32 %v2066_v57, %v2065_v10  ;;  %v2146_v39 = vpop.f32.mrb[33].mxu1 }
 0x169   : > { %v2147_v2 = vadd.f32 %v2146_v39, %v2145_v60 }
 0x16a   : > { %v1260_v18 = vadd.f32 %v2067_v25, %v3525_v40  ;;  %v2068_v17 = vpop.f32.mrb[34].mxu0 }
 0x16b   : > { %v2069_v8 = vpop.f32.mrb[35].mxu0  ;;  %v2148_v21 = vpop.f32.mrb[34].mxu1 }
 0x16c   : > { %v2070_v4 = vadd.f32 %v2069_v8, %v2068_v17  ;;  %v2149_v33 = vpop.f32.mrb[35].mxu1  ;;  %v3558_v46 = vadd.f32 %v2147_v2, %v1260_v18 }
 0x16d   : > { %v2150_v32 = vadd.f32 %v2149_v33, %v2148_v21 }
 0x16e   : > { %v1265_v53 = vadd.f32 %v2070_v4, %v3527_v37  ;;  %v2071_v34 = vpop.f32.mrb[36].mxu0 }
 0x16f   : > { %v2072_v44 = vpop.f32.mrb[37].mxu0  ;;  %v2151_v27 = vpop.f32.mrb[36].mxu1 }
 0x170   : > { %v2073_v12 = vadd.f32 %v2072_v44, %v2071_v34  ;;  %v2152_v35 = vpop.f32.mrb[37].mxu1  ;;  %v3561_v56 = vadd.f32 %v2150_v32, %v1265_v53 }
 0x171   : > { %v2153_v52 = vadd.f32 %v2152_v35, %v2151_v27 }
 0x172   : > { %v1270_v40 = vadd.f32 %v2073_v12, %v3529_v24  ;;  %v2074_v11 = vpop.f32.mrb[38].mxu0 }
 0x173   : > { %v2075_v13 = vpop.f32.mrb[39].mxu0  ;;  %v2154_v7 = vpop.f32.mrb[38].mxu1 }
 0x174   : > { %v2076_v0 = vadd.f32 %v2075_v13, %v2074_v11  ;;  %v2155_v59 = vpop.f32.mrb[39].mxu1  ;;  %v3564_v62 = vadd.f32 %v2153_v52, %v1270_v40 }
 0x175   : > { %v2156_v43 = vadd.f32 %v2155_v59, %v2154_v7 }
 0x176   : > { %v1275_v37 = vadd.f32 %v2076_v0, %v3531_v14  ;;  %v2077_v15 = vpop.f32.mrb[40].mxu0 }
 0x177   : > { %v2078_v51 = vpop.f32.mrb[41].mxu0  ;;  %v2157_v19 = vpop.f32.mrb[40].mxu1 }
 0x178   : > { %v2079_v38 = vadd.f32 %v2078_v51, %v2077_v15  ;;  %v2158_v20 = vpop.f32.mrb[41].mxu1  ;;  %v3567_v45 = vadd.f32 %v2156_v43, %v1275_v37 }
 0x179   : > { %v2159_v22 = vadd.f32 %v2158_v20, %v2157_v19 }
 0x17a   : > { %v1280_v24 = vadd.f32 %v2079_v38, %v3533_v54  ;;  %v2080_v23 = vpop.f32.mrb[42].mxu0 }
 0x17b   : > { %v2081_v49 = vpop.f32.mrb[43].mxu0  ;;  %v2160_v31 = vpop.f32.mrb[42].mxu1 }
 0x17c   : > { %v2082_v36 = vadd.f32 %v2081_v49, %v2080_v23  ;;  %v2161_v42 = vpop.f32.mrb[43].mxu1  ;;  %v3570_v41 = vadd.f32 %v2159_v22, %v1280_v24 }
 0x17d   : > { %v2162_v1 = vadd.f32 %v2161_v42, %v2160_v31 }
 0x17e   : > { %v1285_v14 = vadd.f32 %v2082_v36, %v3535_v30  ;;  %v2083_v50 = vpop.f32.mrb[44].mxu0 }
 0x17f   : > { %v2084_v58 = vpop.f32.mrb[45].mxu0  ;;  %v2163_v61 = vpop.f32.mrb[44].mxu1 }
 0x180   : > { %v2085_v5 = vadd.f32 %v2084_v58, %v2083_v50  ;;  %v2164_v26 = vpop.f32.mrb[45].mxu1  ;;  %v3573_v10 = vadd.f32 %v2162_v1, %v1285_v14 }
 0x181   : > { %v2165_v57 = vadd.f32 %v2164_v26, %v2163_v61 }
 0x182   : > { %v1290_v54 = vadd.f32 %v2085_v5, %v3537_v55  ;;  %v2086_v60 = vpop.f32.mrb[46].mxu0 }
 0x183   : > { %v2087_v25 = vpop.f32.mrb[47].mxu0  ;;  %v2166_v39 = vpop.f32.mrb[46].mxu1 }
 0x184   : > { %v2088_v2 = vadd.f32 %v2087_v25, %v2086_v60  ;;  %v2167_v18 = vpop.f32.mrb[47].mxu1  ;;  %v3576_v17 = vadd.f32 %v2165_v57, %v1290_v54 }
 0x185   : > { %v2168_v8 = vadd.f32 %v2167_v18, %v2166_v39 }
 0x186   : > { %v1295_v30 = vadd.f32 %v2088_v2, %v3539_v63  ;;  %v2089_v21 = vpop.f32.mrb[48].mxu0 }
 0x187   : > { %v2090_v4 = vpop.f32.mrb[49].mxu0  ;;  %v2169_v33 = vpop.f32.mrb[48].mxu1 }
 0x188   : > { %v2091_v32 = vadd.f32 %v2090_v4, %v2089_v21  ;;  %v2170_v53 = vpop.f32.mrb[49].mxu1  ;;  %v3579_v34 = vadd.f32 %v2168_v8, %v1295_v30 }
 0x189   : > { %v2171_v44 = vadd.f32 %v2170_v53, %v2169_v33 }
 0x18a   : > { %v1300_v55 = vadd.f32 %v2091_v32, %v3541_v9  ;;  %v2092_v27 = vpop.f32.mrb[50].mxu0 }
 0x18b   : > { %v2093_v12 = vpop.f32.mrb[51].mxu0  ;;  %v2172_v35 = vpop.f32.mrb[50].mxu1 }
 0x18c   : > { %v2094_v52 = vadd.f32 %v2093_v12, %v2092_v27  ;;  %v2173_v40 = vpop.f32.mrb[51].mxu1  ;;  %v1445_v11 = vadd.f32 %v2171_v44, %v1300_v55 }
 0x18d   : > { %v2174_v13 = vadd.f32 %v2173_v40, %v2172_v35 }
 0x18e   : > { %v1305_v7 = vadd.f32 %v2094_v52, %v3543_v48  ;;  %v2095_v63 = vpop.f32.mrb[52].mxu0 }
 0x18f   : > { %v2096_v0 = vpop.f32.mrb[53].mxu0  ;;  %v2175_v59 = vpop.f32.mrb[52].mxu1 }
 0x190   : > { %v2097_v43 = vadd.f32 %v2096_v0, %v2095_v63  ;;  %v2176_v37 = vpop.f32.mrb[53].mxu1  ;;  %v1450_v15 = vadd.f32 %v2174_v13, %v1305_v7 }
 0x191   : > { %v2177_v51 = vadd.f32 %v2176_v37, %v2175_v59 }
 0x192   : > { %v1310_v19 = vadd.f32 %v2097_v43, %v3545_v3  ;;  %v2098_v38 = vpop.f32.mrb[54].mxu0 }
 0x193   : > { %v2099_v9 = vpop.f32.mrb[55].mxu0  ;;  %v2178_v20 = vpop.f32.mrb[54].mxu1 }
 0x194   : > { %v2100_v22 = vadd.f32 %v2099_v9, %v2098_v38  ;;  %v2179_v24 = vpop.f32.mrb[55].mxu1  ;;  %v1455_v23 = vadd.f32 %v2177_v51, %v1310_v19 }
 0x195   : > { %v2180_v49 = vadd.f32 %v2179_v24, %v2178_v20 }
 0x196   : > { %v1315_v31 = vadd.f32 %v2100_v22, %v3547_v47  ;;  %v2101_v36 = vpop.f32.mrb[56].mxu0 }
 0x197   : > { %v2102_v48 = vpop.f32.mrb[57].mxu0  ;;  %v2181_v42 = vpop.f32.mrb[56].mxu1 }
 0x198   : > { %v2103_v1 = vadd.f32 %v2102_v48, %v2101_v36  ;;  %v2182_v14 = vpop.f32.mrb[57].mxu1  ;;  %v1460_v50 = vadd.f32 %v2180_v49, %v1315_v31 }
 0x199   : > { %v2183_v58 = vadd.f32 %v2182_v14, %v2181_v42 }
 0x19a   : > { %v1320_v61 = vadd.f32 %v2103_v1, %v3549_v29  ;;  %v2104_v5 = vpop.f32.mrb[58].mxu0 }
 0x19b   : > { %v2105_v3 = vpop.f32.mrb[59].mxu0  ;;  %v2184_v26 = vpop.f32.mrb[58].mxu1 }
 0x19c   : > { %v2106_v57 = vadd.f32 %v2105_v3, %v2104_v5  ;;  %v2185_v54 = vpop.f32.mrb[59].mxu1  ;;  %v1465_v60 = vadd.f32 %v2183_v58, %v1320_v61 }
 0x19d   : > { %v2186_v25 = vadd.f32 %v2185_v54, %v2184_v26 }
 0x19e   : > { %v1325_v39 = vadd.f32 %v2106_v57, %v3551_v28  ;;  %v2107_v2 = vpop.f32.mrb[60].mxu0 }
 0x19f   : > { %v2108_v47 = vpop.f32.mrb[61].mxu0  ;;  %v2187_v18 = vpop.f32.mrb[60].mxu1 }
 0x1a0   : > { %v2109_v8 = vadd.f32 %v2108_v47, %v2107_v2  ;;  %v2188_v30 = vpop.f32.mrb[61].mxu1  ;;  %v1470_v21 = vadd.f32 %v2186_v25, %v1325_v39 }
 0x1a1   : > { %v2189_v4 = vadd.f32 %v2188_v30, %v2187_v18 }
 0x1a2   : > { %v1330_v33 = vadd.f32 %v2109_v8, %v3553_v16  ;;  %v2110_v32 = vpop.f32.mrb[62].mxu0 }
 0x1a3   : > { %v2111_v29 = vpop.f32.mrb[63].mxu0  ;;  %v2190_v53 = vpop.f32.mrb[62].mxu1 }
 0x1a4   : > { %v2112_v44 = vadd.f32 %v2111_v29, %v2110_v32  ;;  %v2191_v55 = vpop.f32.mrb[63].mxu1  ;;  %v3588_v27 = vadd.f32 %v2189_v4, %v1330_v33 }
 0x1a5   : > { %v2192_v28 = vadd.f32 %v2191_v55, %v2190_v53 }
 0x1a6   : > { %v1335_v12 = vadd.f32 %v2112_v44, %v3555_v6  ;;  %v2259_v35 = vpop.f32.mrb[64].mxu0 }
 0x1a7   : > { %v1555_v52 = vadd.f32 %v2259_v35, %v3561_v56  ;;  %v2271_v40 = vpop.f32.mrb[64].mxu1  ;;  %v1549_v13 = vpop.f32.mrb[65].mxu0 }
 0x1a8   : > { %v3592_v16 = vadd.f32 %v2271_v40, %v1450_v15  ;;  %v1550_v7 = vadd.f32 %v1549_v13, %v3558_v46  ;;  %v1589_v63 = vpop.f32.mrb[65].mxu1  ;;  %v1480_v0 = vadd.f32 %v2192_v28, %v1335_v12 }
 0x1a9   : > { %1629 = vst [vmem:[%s2620_s17 + $0x8] sm:$0xff] %v1555_v52  ;;  %v1660_v59 = vmul.f32 %v1555_v52, %v1555_v52  ;;  %v1590_v43 = vadd.f32 %v1589_v63, %v1445_v11 }
 0x1aa   : > { %1637 = vst [vmem:[%s2620_s17 + $0x48] sm:$0xff] %v3592_v16  ;;  %1628 = vst [vmem:[%s2620_s17] sm:$0xff] %v1550_v7  ;;  %v1644_v6 = vadd.f32 %v1555_v52, %v1550_v7  ;;  %v1659_v37 = vmul.f32 %v1550_v7, %v1550_v7  ;;  %v2262_v56 = vpop.f32.mrb[66].mxu0 }
 0x1ab   : > { %1636 = vst [vmem:[%s2620_s17 + $0x40] sm:$0xff] %v1590_v43  ;;  %v1565_v15 = vadd.f32 %v2262_v56, %v3567_v45  ;;  %v2274_v51 = vpop.f32.mrb[66].mxu1  ;;  %v1559_v46 = vpop.f32.mrb[67].mxu0  ;;  %v1667_v33 = vmul.f32 %v1590_v43, %v1590_v43 }
 0x1ac   : > { %v1675_v19 = vadd.f32 %v1660_v59, %v1659_v37  ;;  %v1605_v38 = vadd.f32 %v2274_v51, %v1460_v50  ;;  %v1560_v9 = vadd.f32 %v1559_v46, %v3564_v62  ;;  %v1599_v20 = vpop.f32.mrb[67].mxu1  ;;  %v1690_v37 = vld [vmem:[%s2615_s14] sm:$0xff] }
 0x1ad   : > { %1631 = vst [vmem:[%s2620_s17 + $0x18] sm:$0xff] %v1565_v15  ;;  %v1600_v11 = vadd.f32 %v1599_v20, %v1455_v23  ;;  %v1662_v31 = vmul.f32 %v1565_v15, %v1565_v15  ;;  %v1693_v46 = vld [vmem:[%s2625_s20] sm:$0xff] }
 0x1ae   : > { %1639 = vst [vmem:[%s2620_s17 + $0x58] sm:$0xff] %v1605_v38  ;;  %1630 = vst [vmem:[%s2620_s17 + $0x10] sm:$0xff] %v1560_v9  ;;  %v1645_v22 = vadd.f32 %v1644_v6, %v1560_v9  ;;  %v1661_v24 = vmul.f32 %v1560_v9, %v1560_v9  ;;  %v2265_v49 = vpop.f32.mrb[68].mxu0  ;;  %v1670_v12 = vmul.f32 %v1605_v38, %v1605_v38 }
 0x1af   : > { %1638 = vst [vmem:[%s2620_s17 + $0x50] sm:$0xff] %v1600_v11  ;;  %v1575_v45 = vadd.f32 %v2265_v49, %v3573_v10  ;;  %v2277_v36 = vpop.f32.mrb[68].mxu1  ;;  %v1569_v48 = vpop.f32.mrb[69].mxu0  ;;  %v1669_v55 = vmul.f32 %v1600_v11, %v1600_v11 }
 0x1b0   : > { %v1676_v42 = vadd.f32 %v1675_v19, %v1661_v24  ;;  %v1615_v62 = vadd.f32 %v2277_v36, %v1470_v21  ;;  %v1570_v1 = vadd.f32 %v1569_v48, %v3570_v41  ;;  %v1646_v23 = vadd.f32 %v1645_v22, %v1565_v15  ;;  %v1609_v14 = vpop.f32.mrb[69].mxu1 }
 0x1b1   : > { %1633 = vst [vmem:[%s2620_s17 + $0x28] sm:$0xff] %v1575_v45  ;;  %v1610_v50 = vadd.f32 %v1609_v14, %v1465_v60  ;;  %v1664_v3 = vmul.f32 %v1575_v45, %v1575_v45 }
 0x1b2   : > { %1641 = vst [vmem:[%s2620_s17 + $0x68] sm:$0xff] %v1615_v62  ;;  %1632 = vst [vmem:[%s2620_s17 + $0x20] sm:$0xff] %v1570_v1  ;;  %v1647_v58 = vadd.f32 %v1646_v23, %v1570_v1  ;;  %v1663_v61 = vmul.f32 %v1570_v1, %v1570_v1  ;;  %v1677_v5 = vadd.f32 %v1676_v42, %v1662_v31  ;;  %v2268_v10 = vpop.f32.mrb[70].mxu0 }
 0x1b3   : > { %1640 = vst [vmem:[%s2620_s17 + $0x60] sm:$0xff] %v1610_v50  ;;  %v1585_v26 = vadd.f32 %v2268_v10, %v3579_v34  ;;  %v2280_v57 = vpop.f32.mrb[70].mxu1  ;;  %v1579_v41 = vpop.f32.mrb[71].mxu0  ;;  %v1671_v40 = vmul.f32 %v1610_v50, %v1610_v50  ;;  %v1672_v63 = vmul.f32 %v1615_v62, %v1615_v62 }
 0x1b4   : > { %v1678_v54 = vadd.f32 %v1677_v5, %v1663_v61  ;;  %v1625_v25 = vadd.f32 %v2280_v57, %v1480_v0  ;;  %v1580_v60 = vadd.f32 %v1579_v41, %v3576_v17  ;;  %v1648_v39 = vadd.f32 %v1647_v58, %v1575_v45  ;;  %v1619_v2 = vpop.f32.mrb[71].mxu1 }
 0x1b5   : > { %1635 = vst [vmem:[%s2620_s17 + $0x38] sm:$0xff] %v1585_v26  ;;  %v1620_v47 = vadd.f32 %v1619_v2, %v3588_v27  ;;  %v1666_v21 = vmul.f32 %v1585_v26, %v1585_v26  ;;  %v1668_v17 = vmul.f32 %v3592_v16, %v3592_v16 }
 0x1b6   : > { %1643 = vst [vmem:[%s2620_s17 + $0x78] sm:$0xff] %v1625_v25  ;;  %1634 = vst [vmem:[%s2620_s17 + $0x30] sm:$0xff] %v1580_v60  ;;  %v1649_v18 = vadd.f32 %v1648_v39, %v1580_v60  ;;  %v1665_v8 = vmul.f32 %v1580_v60, %v1580_v60  ;;  %v1679_v30 = vadd.f32 %v1678_v54, %v1664_v3 }
 0x1b7   : > { %1642 = vst [vmem:[%s2620_s17 + $0x70] sm:$0xff] %v1620_v47  ;;  %v1673_v6 = vmul.f32 %v1620_v47, %v1620_v47  ;;  %v1674_v56 = vmul.f32 %v1625_v25, %v1625_v25 }
 0x1b8   : > { %v1650_v4 = vadd.f32 %v1649_v18, %v1585_v26  ;;  %v1680_v34 = vadd.f32 %v1679_v30, %v1665_v8 }
 0x1ba   : > { %v1651_v32 = vadd.f32 %v1650_v4, %v1590_v43  ;;  %v1681_v29 = vadd.f32 %v1680_v34, %v1666_v21 }
 0x1bc   : > { %v1652_v53 = vadd.f32 %v1651_v32, %v3592_v16  ;;  %v1682_v44 = vadd.f32 %v1681_v29, %v1667_v33 }
 0x1be   : > { %v1683_v27 = vadd.f32 %v1682_v44, %v1668_v17  ;;  %v1653_v28 = vadd.f32 %v1652_v53, %v1600_v11 }
 0x1c0   : > { %v1654_v35 = vadd.f32 %v1653_v28, %v1605_v38  ;;  %v1684_v52 = vadd.f32 %v1683_v27, %v1669_v55 }
 0x1c2   : > { %v1655_v13 = vadd.f32 %v1654_v35, %v1610_v50  ;;  %v1685_v7 = vadd.f32 %v1684_v52, %v1670_v12 }
 0x1c4   : > { %v1656_v0 = vadd.f32 %v1655_v13, %v1615_v62  ;;  %v1686_v59 = vadd.f32 %v1685_v7, %v1671_v40 }
 0x1c6   : > { %v1657_v43 = vadd.f32 %v1656_v0, %v1620_v47  ;;  %v1687_v16 = vadd.f32 %v1686_v59, %v1672_v63 }
 0x1c8   : > { %v1658_v15 = vadd.f32 %v1657_v43, %v1625_v25  ;;  %v1688_v51 = vadd.f32 %v1687_v16, %v1673_v6 }
 0x1ca   : > { %v1689_v19 = vadd.f32 %v1688_v51, %v1674_v56  ;;  %v1691_v9 = vadd.f32 %v1690_v37, %v1658_v15 }
 0x1cc   : > { %1692 = vst [vmem:[%s2615_s14] sm:$0xff] %v1691_v9  ;;  %v1694_v38 = vadd.f32 %v1693_v46, %v1689_v19 }
 0x1ce   : > { %1695 = vst [vmem:[%s2625_s20] sm:$0xff] %v1694_v38 }
 0x1cf PF: > { %s17_s25 = sadd.s32 1, %s2540_s25   ;;  %s3648_s21 = smov %s2532_s23 }
 0x1d0   : > { %p14_p8 = scmp.ge.s32.totalorder %s17_s25, 6   ;;  %s3649_s22 = smov %s2536_s24 }
 0x1d1   : > { %s3650_s23 = smov %s3653_s26  ;;  %s3651_s24 = smov %s3657_s27 }
 0x1d2   :  { %16 = sbr.rel (!%p14_p8) target bundleno = 3 (0x3), region = 139 }
 0x1d9   :  { %1752 = vsyncmov [#allocation3] }
 0x1dc   :  { %s1753_s14 = vpop.sfrf %1752 }
 0x1dd   :  { %p1872_p9 = scmp.ne.s32.totalorder %s1753_s14, 0 }
 0x1df   :  { %1757 = shalt.err (%p1872_p9)  }

</bundles_post_ra>
